<compile_context>
chip_gen: v6e
topology: v6e:2x2x1
jax: 0.10.0
libtpu: 0.0.40
codegen_flags: <defaults>
</compile_context>

<pallas_src>
import math
import functools

import numpy as np
import jax
import jax.numpy as jnp
from jax import lax
from jax.experimental import pallas as pl
from jax.experimental.pallas import tpu as pltpu

PREC = lax.Precision.HIGHEST   # keep f32 matmuls exact so the correctness check is tight
LN_EPS = 1e-6
# TODO(synk): LayerNorm1d is not defined in the provided spec; assuming a standard
# layer norm over d_model (biased variance, eps=1e-6, learnable gamma/beta).


def _layer_norm(x, gamma, beta):
    mu = jnp.mean(x, axis=-1, keepdims=True)
    xc = x - mu
    var = jnp.mean(xc * xc, axis=-1, keepdims=True)
    return xc * lax.rsqrt(var + LN_EPS) * gamma + beta


# --------------------------- Pallas kernels ---------------------------

def ln_qkv_attn_kernel(x_ref, gamma_ref, beta_ref,
                       wq_ref, bq_ref, wk_ref, bk_ref, wv_ref, bv_ref,
                       out_ref, *, n_head, d_h):
    # One batch element per grid step.
    x = x_ref[0]                                           # (n_tok, d_model)
    h = _layer_norm(x, gamma_ref[...], beta_ref[...])

    q = jnp.dot(h, wq_ref[...], precision=PREC,
                preferred_element_type=jnp.float32) + bq_ref[...]
    k = jnp.dot(h, wk_ref[...], precision=PREC,
                preferred_element_type=jnp.float32) + bk_ref[...]
    v = jnp.dot(h, wv_ref[...], precision=PREC,
                preferred_element_type=jnp.float32) + bv_ref[...]
    v = jnp.maximum(v, 0.0)                                # ReLU on the value path

    inv_temper = 1.0 / math.sqrt(d_h)
    for head in range(n_head):                             # static unroll, n_head is small
        sl = slice(head * d_h, (head + 1) * d_h)
        qh, kh, vh = q[:, sl], k[:, sl], v[:, sl]
        # scores = qh @ kh.T / sqrt(d_h); contract on d_h directly (no explicit .T)
        s = lax.dot_general(qh, kh, (((1,), (1,)), ((), ())),
                            precision=PREC,
                            preferred_element_type=jnp.float32) * inv_temper
        # NOTE: torch applies dropout to scores before softmax; identity at inference.
        s = s - jnp.max(s, axis=-1, keepdims=True)
        p = jnp.exp(s)
        attn = p / jnp.sum(p, axis=-1, keepdims=True)
        oh = jnp.dot(attn, vh, precision=PREC,
                     preferred_element_type=jnp.float32)
        out_ref[0, :, sl] = oh.astype(out_ref.dtype)       # standard head-concat layout


def proj_residual_kernel(h_ref, res_ref, wp_ref, bp_ref, out_ref):
    proj = jnp.dot(h_ref[0], wp_ref[...], precision=PREC,
                   preferred_element_type=jnp.float32) + bp_ref[...]
    out_ref[0] = (proj + res_ref[0]).astype(out_ref.dtype)


# --------------------------- wrapper ---------------------------

def transformer_layer_forward(x, params, *, n_head):
    """Pallas port of TransformerLayer.forward (inference; dropout = identity)."""
    bs, n_tok, d_model = x.shape
    d_k = params["wq"].shape[1]
    d_v = params["wv"].shape[1]
    assert d_k % n_head == 0
    assert d_v == d_k, "torch's .view / proj require d_v == d_k"
    d_h = d_k // n_head

    gamma = params["gamma"].reshape(1, d_model)
    beta = params["beta"].reshape(1, d_model)
    bq = params["bq"].reshape(1, d_k)
    bk = params["bk"].reshape(1, d_k)
    bv = params["bv"].reshape(1, d_v)
    bp = params["bp"].reshape(1, d_model)

    def full(shape):                 # grid-invariant block (weights / biases)
        return pl.BlockSpec(shape, lambda b, _s=shape: (0,) * len(_s))

    def per_batch(shape):            # one batch element per grid step
        return pl.BlockSpec(shape, lambda b, _s=shape: (b,) + (0,) * (len(_s) - 1))

    attn_out = pl.pallas_call(
        functools.partial(ln_qkv_attn_kernel, n_head=n_head, d_h=d_h),
        out_shape=jax.ShapeDtypeStruct((bs, n_tok, d_k), x.dtype),
        grid=(bs,),
        in_specs=[
            per_batch((1, n_tok, d_model)),                 # x
            full((1, d_model)), full((1, d_model)),         # gamma, beta
            full((d_model, d_k)), full((1, d_k)),           # Wq, bq
            full((d_model, d_k)), full((1, d_k)),           # Wk, bk
            full((d_model, d_v)), full((1, d_v)),           # Wv, bv
        ],
        out_specs=per_batch((1, n_tok, d_k)),
        compiler_params=pltpu.CompilerParams(dimension_semantics=("parallel",)),
    )(x, gamma, beta, params["wq"], bq, params["wk"], bk, params["wv"], bv)

    # torch's head re-merge is a raw contiguous .view of (bs, n_head, n_tok, d_h)
    # into (bs, n_tok, n_head*d_h). Reproduce it as wrapper-side layout plumbing.
    h = (attn_out.reshape(bs, n_tok, n_head, d_h)
                 .transpose(0, 2, 1, 3)
                 .reshape(bs, n_tok, n_head * d_h))

    out = pl.pallas_call(
        proj_residual_kernel,
        out_shape=jax.ShapeDtypeStruct((bs, n_tok, d_model), x.dtype),
        grid=(bs,),
        in_specs=[
            per_batch((1, n_tok, d_v)),                     # merged heads
            per_batch((1, n_tok, d_model)),                 # residual (= enc_input)
            full((d_v, d_model)), full((1, d_model)),       # Wp, bp
        ],
        out_specs=per_batch((1, n_tok, d_model)),
        compiler_params=pltpu.CompilerParams(dimension_semantics=("parallel",)),
    )(h, x, params["wp"], bp)

    return out, None   # matches (enc_output, enc_slf_attn=None)


# --------------------------- pure-JAX reference ---------------------------

def reference_forward(x, params, n_head):
    bs, n_tok, d_model = x.shape
    d_k = params["wq"].shape[1]
    d_v = params["wv"].shape[1]
    d_h = d_k // n_head
    residual = x
    h = _layer_norm(x, params["gamma"], params["beta"])
    q = jnp.dot(h, params["wq"], precision=PREC) + params["bq"]
    k = jnp.dot(h, params["wk"], precision=PREC) + params["bk"]
    v = jnp.maximum(jnp.dot(h, params["wv"], precision=PREC) + params["bv"], 0.0)

    def split_heads(e, dh):
        return (e.reshape(bs, n_tok, n_head, dh).transpose(0, 2, 1, 3)
                  .reshape(bs * n_head, n_tok, dh))

    qh, kh, vh = split_heads(q, d_h), split_heads(k, d_h), split_heads(v, d_v // n_head)
    scores = jnp.einsum("bqd,bkd->bqk", qh, kh, precision=PREC) / math.sqrt(d_h)
    attn = jax.nn.softmax(scores, axis=-1)
    o = jnp.einsum("bqk,bkd->bqd", attn, vh, precision=PREC)
    # torch's contiguous .view(bs, n_tok, -1) of the (bs, n_head, n_tok, d_h) tensor
    o = o.reshape(bs, n_head, n_tok, d_h).reshape(bs, n_tok, n_head * d_h)
    return jnp.dot(o, params["wp"], precision=PREC) + params["bp"] + residual


if __name__ == "__main__":
    # Small shapes consistent with the module; feature dims are 128 so every
    # HBM-facing block stays lane-dense (multiple of 128 on the last axis).
    bs, n_tok = 2, 16
    d_model, d_k, d_v, n_head = 128, 128, 128, 4
    # d_ff / dropout probs exist in the torch __init__ but are unused in forward (eval).

    key = jax.random.PRNGKey(0)
    ks = jax.random.split(key, 9)
    scale = 0.05
    params = dict(
        gamma=jnp.ones((d_model,), jnp.float32),
        beta=jnp.zeros((d_model,), jnp.float32),
        wq=scale * jax.random.normal(ks[0], (d_model, d_k), jnp.float32),
        bq=scale * jax.random.normal(ks[1], (d_k,), jnp.float32),
        wk=scale * jax.random.normal(ks[2], (d_model, d_k), jnp.float32),
        bk=scale * jax.random.normal(ks[3], (d_k,), jnp.float32),
        wv=scale * jax.random.normal(ks[4], (d_model, d_v), jnp.float32),
        bv=scale * jax.random.normal(ks[5], (d_v,), jnp.float32),
        wp=scale * jax.random.normal(ks[6], (d_v, d_model), jnp.float32),
        bp=scale * jax.random.normal(ks[7], (d_model,), jnp.float32),
    )
    x = jax.random.normal(ks[8], (bs, n_tok, d_model), jnp.float32)

    out, attn = transformer_layer_forward(x, params, n_head=n_head)
    out = jax.block_until_ready(out)

    ref = reference_forward(x, params, n_head)
    assert out.shape == (bs, n_tok, d_model)
    assert attn is None
    np.testing.assert_allclose(np.asarray(out), np.asarray(ref), rtol=1e-4, atol=1e-4)
    print("KERNEL_OK")
</pallas_src>

<mosaic_0001>
module attributes {stable_mosaic.version = 11 : i64} {
  func.func @ln_qkv_attn_kernel(%arg0: i32, %arg1: memref<1x16x128xf32, #tpu.memory_space<vmem>>, %arg2: memref<1x128xf32, #tpu.memory_space<vmem>>, %arg3: memref<1x128xf32, #tpu.memory_space<vmem>>, %arg4: memref<128x128xf32, #tpu.memory_space<vmem>>, %arg5: memref<1x128xf32, #tpu.memory_space<vmem>>, %arg6: memref<128x128xf32, #tpu.memory_space<vmem>>, %arg7: memref<1x128xf32, #tpu.memory_space<vmem>>, %arg8: memref<128x128xf32, #tpu.memory_space<vmem>>, %arg9: memref<1x128xf32, #tpu.memory_space<vmem>>, %arg10: memref<1x16x128xf32, #tpu.memory_space<vmem>>) attributes {dimension_semantics = [#tpu.dimension_semantics<parallel>], iteration_bounds = array<i64: 2>, scalar_prefetch = 0 : i64, scratch_operands = 0 : i64, tpu.core_type = #tpu.core_type<tc>, window_params = [{transform_indices = @transform_0, window_bounds = array<i64: 1, 16, 128>}, {pipeline_mode = #tpu.pipeline_mode<synchronous>, transform_indices = @transform_1, window_bounds = array<i64: 1, 128>}, {pipeline_mode = #tpu.pipeline_mode<synchronous>, transform_indices = @transform_2, window_bounds = array<i64: 1, 128>}, {pipeline_mode = #tpu.pipeline_mode<synchronous>, transform_indices = @transform_3, window_bounds = array<i64: 128, 128>}, {pipeline_mode = #tpu.pipeline_mode<synchronous>, transform_indices = @transform_4, window_bounds = array<i64: 1, 128>}, {pipeline_mode = #tpu.pipeline_mode<synchronous>, transform_indices = @transform_5, window_bounds = array<i64: 128, 128>}, {pipeline_mode = #tpu.pipeline_mode<synchronous>, transform_indices = @transform_6, window_bounds = array<i64: 1, 128>}, {pipeline_mode = #tpu.pipeline_mode<synchronous>, transform_indices = @transform_7, window_bounds = array<i64: 128, 128>}, {pipeline_mode = #tpu.pipeline_mode<synchronous>, transform_indices = @transform_8, window_bounds = array<i64: 1, 128>}, {transform_indices = @transform_9, window_bounds = array<i64: 1, 16, 128>}]} {
    %c0 = arith.constant 0 : index
    %c0_0 = arith.constant 0 : index
    %c0_1 = arith.constant 0 : index
    %0 = vector.load %arg1[%c0, %c0_0, %c0_1] : memref<1x16x128xf32, #tpu.memory_space<vmem>>, vector<1x16x128xf32>
    %1 = vector.shape_cast %0 : vector<1x16x128xf32> to vector<16x128xf32>
    %c0_2 = arith.constant 0 : index
    %c0_3 = arith.constant 0 : index
    %2 = vector.load %arg2[%c0_2, %c0_3] : memref<1x128xf32, #tpu.memory_space<vmem>>, vector<1x128xf32>
    %c0_4 = arith.constant 0 : index
    %c0_5 = arith.constant 0 : index
    %3 = vector.load %arg3[%c0_4, %c0_5] : memref<1x128xf32, #tpu.memory_space<vmem>>, vector<1x128xf32>
    %cst = arith.constant dense<0.000000e+00> : vector<16xf32>
    %4 = vector.multi_reduction <add>, %1, %cst [1] : vector<16x128xf32> to vector<16xf32>
    %5 = vector.shape_cast %4 : vector<16xf32> to vector<16x1xf32>
    %cst_6 = arith.constant 1.280000e+02 : f32
    %6 = vector.broadcast %cst_6 : f32 to vector<16x1xf32>
    %7 = arith.divf %5, %6 : vector<16x1xf32>
    %8 = vector.broadcast %7 : vector<16x1xf32> to vector<16x128xf32>
    %9 = arith.subf %1, %8 : vector<16x128xf32>
    %10 = arith.mulf %9, %9 : vector<16x128xf32>
    %cst_7 = arith.constant dense<0.000000e+00> : vector<16xf32>
    %11 = vector.multi_reduction <add>, %10, %cst_7 [1] : vector<16x128xf32> to vector<16xf32>
    %12 = vector.shape_cast %11 : vector<16xf32> to vector<16x1xf32>
    %cst_8 = arith.constant 1.280000e+02 : f32
    %13 = vector.broadcast %cst_8 : f32 to vector<16x1xf32>
    %14 = arith.divf %12, %13 : vector<16x1xf32>
    %cst_9 = arith.constant 9.99999997E-7 : f32
    %15 = vector.broadcast %cst_9 : f32 to vector<16x1xf32>
    %16 = arith.addf %14, %15 : vector<16x1xf32>
    %17 = math.rsqrt %16 : vector<16x1xf32>
    %18 = vector.broadcast %17 : vector<16x1xf32> to vector<16x128xf32>
    %19 = arith.mulf %9, %18 : vector<16x128xf32>
    %20 = vector.broadcast %2 : vector<1x128xf32> to vector<16x128xf32>
    %21 = arith.mulf %19, %20 : vector<16x128xf32>
    %22 = vector.broadcast %3 : vector<1x128xf32> to vector<16x128xf32>
    %23 = arith.addf %21, %22 : vector<16x128xf32>
    %c0_10 = arith.constant 0 : index
    %c0_11 = arith.constant 0 : index
    %24 = vector.load %arg4[%c0_10, %c0_11] : memref<128x128xf32, #tpu.memory_space<vmem>>, vector<128x128xf32>
    %cst_12 = arith.constant dense<0.000000e+00> : vector<16x128xf32>
    %25 = tpu.matmul %23, %24, %cst_12 {dimension_numbers = #tpu.dot_dimension_numbers<[1], [0], [0], [1], [0, 0, 1, 1], [], []>, precision = #tpu.contract_precision<fp32>} : vector<16x128xf32>, vector<128x128xf32>, vector<16x128xf32> -> vector<16x128xf32>
    %c0_13 = arith.constant 0 : index
    %c0_14 = arith.constant 0 : index
    %26 = vector.load %arg5[%c0_13, %c0_14] : memref<1x128xf32, #tpu.memory_space<vmem>>, vector<1x128xf32>
    %27 = vector.broadcast %26 : vector<1x128xf32> to vector<16x128xf32>
    %28 = arith.addf %25, %27 : vector<16x128xf32>
    %c0_15 = arith.constant 0 : index
    %c0_16 = arith.constant 0 : index
    %29 = vector.load %arg6[%c0_15, %c0_16] : memref<128x128xf32, #tpu.memory_space<vmem>>, vector<128x128xf32>
    %cst_17 = arith.constant dense<0.000000e+00> : vector<16x128xf32>
    %30 = tpu.matmul %23, %29, %cst_17 {dimension_numbers = #tpu.dot_dimension_numbers<[1], [0], [0], [1], [0, 0, 1, 1], [], []>, precision = #tpu.contract_precision<fp32>} : vector<16x128xf32>, vector<128x128xf32>, vector<16x128xf32> -> vector<16x128xf32>
    %c0_18 = arith.constant 0 : index
    %c0_19 = arith.constant 0 : index
    %31 = vector.load %arg7[%c0_18, %c0_19] : memref<1x128xf32, #tpu.memory_space<vmem>>, vector<1x128xf32>
    %32 = vector.broadcast %31 : vector<1x128xf32> to vector<16x128xf32>
    %33 = arith.addf %30, %32 : vector<16x128xf32>
    %c0_20 = arith.constant 0 : index
    %c0_21 = arith.constant 0 : index
    %34 = vector.load %arg8[%c0_20, %c0_21] : memref<128x128xf32, #tpu.memory_space<vmem>>, vector<128x128xf32>
    %cst_22 = arith.constant dense<0.000000e+00> : vector<16x128xf32>
    %35 = tpu.matmul %23, %34, %cst_22 {dimension_numbers = #tpu.dot_dimension_numbers<[1], [0], [0], [1], [0, 0, 1, 1], [], []>, precision = #tpu.contract_precision<fp32>} : vector<16x128xf32>, vector<128x128xf32>, vector<16x128xf32> -> vector<16x128xf32>
    %c0_23 = arith.constant 0 : index
    %c0_24 = arith.constant 0 : index
    %36 = vector.load %arg9[%c0_23, %c0_24] : memref<1x128xf32, #tpu.memory_space<vmem>>, vector<1x128xf32>
    %37 = vector.broadcast %36 : vector<1x128xf32> to vector<16x128xf32>
    %38 = arith.addf %35, %37 : vector<16x128xf32>
    %cst_25 = arith.constant 0.000000e+00 : f32
    %39 = vector.broadcast %cst_25 : f32 to vector<16x128xf32>
    %40 = arith.maximumf %38, %39 : vector<16x128xf32>
    %41 = vector.extract_strided_slice %28 {offsets = [0, 0], sizes = [16, 32], strides = [1, 1]} : vector<16x128xf32> to vector<16x32xf32>
    %42 = vector.extract_strided_slice %33 {offsets = [0, 0], sizes = [16, 32], strides = [1, 1]} : vector<16x128xf32> to vector<16x32xf32>
    %43 = vector.extract_strided_slice %40 {offsets = [0, 0], sizes = [16, 32], strides = [1, 1]} : vector<16x128xf32> to vector<16x32xf32>
    %cst_26 = arith.constant dense<0.000000e+00> : vector<16x16xf32>
    %44 = tpu.matmul %41, %42, %cst_26 {dimension_numbers = #tpu.dot_dimension_numbers<[1], [1], [0], [0], [0, 0, 1, 0], [], []>, precision = #tpu.contract_precision<fp32>} : vector<16x32xf32>, vector<16x32xf32>, vector<16x16xf32> -> vector<16x16xf32>
    %cst_27 = arith.constant 0.176776692 : f32
    %45 = vector.broadcast %cst_27 : f32 to vector<16x16xf32>
    %46 = arith.mulf %44, %45 : vector<16x16xf32>
    %cst_28 = arith.constant dense<0xFF800000> : vector<16xf32>
    %47 = vector.multi_reduction <maximumf>, %46, %cst_28 [1] : vector<16x16xf32> to vector<16xf32>
    %48 = vector.shape_cast %47 : vector<16xf32> to vector<16x1xf32>
    %49 = vector.broadcast %48 : vector<16x1xf32> to vector<16x16xf32>
    %50 = arith.subf %46, %49 : vector<16x16xf32>
    %51 = math.exp %50 : vector<16x16xf32>
    %cst_29 = arith.constant dense<0.000000e+00> : vector<16xf32>
    %52 = vector.multi_reduction <add>, %51, %cst_29 [1] : vector<16x16xf32> to vector<16xf32>
    %53 = vector.shape_cast %52 : vector<16xf32> to vector<16x1xf32>
    %54 = vector.broadcast %53 : vector<16x1xf32> to vector<16x16xf32>
    %55 = arith.divf %51, %54 : vector<16x16xf32>
    %cst_30 = arith.constant dense<0.000000e+00> : vector<16x32xf32>
    %56 = tpu.matmul %55, %43, %cst_30 {dimension_numbers = #tpu.dot_dimension_numbers<[1], [0], [0], [1], [0, 0, 1, 1], [], []>, precision = #tpu.contract_precision<fp32>} : vector<16x16xf32>, vector<16x32xf32>, vector<16x32xf32> -> vector<16x32xf32>
    %c0_31 = arith.constant 0 : index
    %c0_32 = arith.constant 0 : index
    %c0_33 = arith.constant 0 : index
    %57 = vector.load %arg10[%c0_31, %c0_32, %c0_33] : memref<1x16x128xf32, #tpu.memory_space<vmem>>, vector<1x16x32xf32>
    %58 = vector.shape_cast %57 : vector<1x16x32xf32> to vector<16x32xf32>
    %59 = vector.shape_cast %56 : vector<16x32xf32> to vector<1x16x32xf32>
    tpu.vector_store %arg10[%c0_31, %c0_32, %c0_33], %59 {strides = array<i32>} : memref<1x16x128xf32, #tpu.memory_space<vmem>>, vector<1x16x32xf32>,
    %60 = vector.extract_strided_slice %28 {offsets = [0, 32], sizes = [16, 32], strides = [1, 1]} : vector<16x128xf32> to vector<16x32xf32>
    %61 = vector.extract_strided_slice %33 {offsets = [0, 32], sizes = [16, 32], strides = [1, 1]} : vector<16x128xf32> to vector<16x32xf32>
    %62 = vector.extract_strided_slice %40 {offsets = [0, 32], sizes = [16, 32], strides = [1, 1]} : vector<16x128xf32> to vector<16x32xf32>
    %cst_34 = arith.constant dense<0.000000e+00> : vector<16x16xf32>
    %63 = tpu.matmul %60, %61, %cst_34 {dimension_numbers = #tpu.dot_dimension_numbers<[1], [1], [0], [0], [0, 0, 1, 0], [], []>, precision = #tpu.contract_precision<fp32>} : vector<16x32xf32>, vector<16x32xf32>, vector<16x16xf32> -> vector<16x16xf32>
    %cst_35 = arith.constant 0.176776692 : f32
    %64 = vector.broadcast %cst_35 : f32 to vector<16x16xf32>
    %65 = arith.mulf %63, %64 : vector<16x16xf32>
    %cst_36 = arith.constant dense<0xFF800000> : vector<16xf32>
    %66 = vector.multi_reduction <maximumf>, %65, %cst_36 [1] : vector<16x16xf32> to vector<16xf32>
    %67 = vector.shape_cast %66 : vector<16xf32> to vector<16x1xf32>
    %68 = vector.broadcast %67 : vector<16x1xf32> to vector<16x16xf32>
    %69 = arith.subf %65, %68 : vector<16x16xf32>
    %70 = math.exp %69 : vector<16x16xf32>
    %cst_37 = arith.constant dense<0.000000e+00> : vector<16xf32>
    %71 = vector.multi_reduction <add>, %70, %cst_37 [1] : vector<16x16xf32> to vector<16xf32>
    %72 = vector.shape_cast %71 : vector<16xf32> to vector<16x1xf32>
    %73 = vector.broadcast %72 : vector<16x1xf32> to vector<16x16xf32>
    %74 = arith.divf %70, %73 : vector<16x16xf32>
    %cst_38 = arith.constant dense<0.000000e+00> : vector<16x32xf32>
    %75 = tpu.matmul %74, %62, %cst_38 {dimension_numbers = #tpu.dot_dimension_numbers<[1], [0], [0], [1], [0, 0, 1, 1], [], []>, precision = #tpu.contract_precision<fp32>} : vector<16x16xf32>, vector<16x32xf32>, vector<16x32xf32> -> vector<16x32xf32>
    %c0_39 = arith.constant 0 : index
    %c0_40 = arith.constant 0 : index
    %c32 = arith.constant 32 : index
    %76 = vector.load %arg10[%c0_39, %c0_40, %c32] : memref<1x16x128xf32, #tpu.memory_space<vmem>>, vector<1x16x32xf32>
    %77 = vector.shape_cast %76 : vector<1x16x32xf32> to vector<16x32xf32>
    %78 = vector.shape_cast %75 : vector<16x32xf32> to vector<1x16x32xf32>
    tpu.vector_store %arg10[%c0_39, %c0_40, %c32], %78 {strides = array<i32>} : memref<1x16x128xf32, #tpu.memory_space<vmem>>, vector<1x16x32xf32>,
    %79 = vector.extract_strided_slice %28 {offsets = [0, 64], sizes = [16, 32], strides = [1, 1]} : vector<16x128xf32> to vector<16x32xf32>
    %80 = vector.extract_strided_slice %33 {offsets = [0, 64], sizes = [16, 32], strides = [1, 1]} : vector<16x128xf32> to vector<16x32xf32>
    %81 = vector.extract_strided_slice %40 {offsets = [0, 64], sizes = [16, 32], strides = [1, 1]} : vector<16x128xf32> to vector<16x32xf32>
    %cst_41 = arith.constant dense<0.000000e+00> : vector<16x16xf32>
    %82 = tpu.matmul %79, %80, %cst_41 {dimension_numbers = #tpu.dot_dimension_numbers<[1], [1], [0], [0], [0, 0, 1, 0], [], []>, precision = #tpu.contract_precision<fp32>} : vector<16x32xf32>, vector<16x32xf32>, vector<16x16xf32> -> vector<16x16xf32>
    %cst_42 = arith.constant 0.176776692 : f32
    %83 = vector.broadcast %cst_42 : f32 to vector<16x16xf32>
    %84 = arith.mulf %82, %83 : vector<16x16xf32>
    %cst_43 = arith.constant dense<0xFF800000> : vector<16xf32>
    %85 = vector.multi_reduction <maximumf>, %84, %cst_43 [1] : vector<16x16xf32> to vector<16xf32>
    %86 = vector.shape_cast %85 : vector<16xf32> to vector<16x1xf32>
    %87 = vector.broadcast %86 : vector<16x1xf32> to vector<16x16xf32>
    %88 = arith.subf %84, %87 : vector<16x16xf32>
    %89 = math.exp %88 : vector<16x16xf32>
    %cst_44 = arith.constant dense<0.000000e+00> : vector<16xf32>
    %90 = vector.multi_reduction <add>, %89, %cst_44 [1] : vector<16x16xf32> to vector<16xf32>
    %91 = vector.shape_cast %90 : vector<16xf32> to vector<16x1xf32>
    %92 = vector.broadcast %91 : vector<16x1xf32> to vector<16x16xf32>
    %93 = arith.divf %89, %92 : vector<16x16xf32>
    %cst_45 = arith.constant dense<0.000000e+00> : vector<16x32xf32>
    %94 = tpu.matmul %93, %81, %cst_45 {dimension_numbers = #tpu.dot_dimension_numbers<[1], [0], [0], [1], [0, 0, 1, 1], [], []>, precision = #tpu.contract_precision<fp32>} : vector<16x16xf32>, vector<16x32xf32>, vector<16x32xf32> -> vector<16x32xf32>
    %c0_46 = arith.constant 0 : index
    %c0_47 = arith.constant 0 : index
    %c64 = arith.constant 64 : index
    %95 = vector.load %arg10[%c0_46, %c0_47, %c64] : memref<1x16x128xf32, #tpu.memory_space<vmem>>, vector<1x16x32xf32>
    %96 = vector.shape_cast %95 : vector<1x16x32xf32> to vector<16x32xf32>
    %97 = vector.shape_cast %94 : vector<16x32xf32> to vector<1x16x32xf32>
    tpu.vector_store %arg10[%c0_46, %c0_47, %c64], %97 {strides = array<i32>} : memref<1x16x128xf32, #tpu.memory_space<vmem>>, vector<1x16x32xf32>,
    %98 = vector.extract_strided_slice %28 {offsets = [0, 96], sizes = [16, 32], strides = [1, 1]} : vector<16x128xf32> to vector<16x32xf32>
    %99 = vector.extract_strided_slice %33 {offsets = [0, 96], sizes = [16, 32], strides = [1, 1]} : vector<16x128xf32> to vector<16x32xf32>
    %100 = vector.extract_strided_slice %40 {offsets = [0, 96], sizes = [16, 32], strides = [1, 1]} : vector<16x128xf32> to vector<16x32xf32>
    %cst_48 = arith.constant dense<0.000000e+00> : vector<16x16xf32>
    %101 = tpu.matmul %98, %99, %cst_48 {dimension_numbers = #tpu.dot_dimension_numbers<[1], [1], [0], [0], [0, 0, 1, 0], [], []>, precision = #tpu.contract_precision<fp32>} : vector<16x32xf32>, vector<16x32xf32>, vector<16x16xf32> -> vector<16x16xf32>
    %cst_49 = arith.constant 0.176776692 : f32
    %102 = vector.broadcast %cst_49 : f32 to vector<16x16xf32>
    %103 = arith.mulf %101, %102 : vector<16x16xf32>
    %cst_50 = arith.constant dense<0xFF800000> : vector<16xf32>
    %104 = vector.multi_reduction <maximumf>, %103, %cst_50 [1] : vector<16x16xf32> to vector<16xf32>
    %105 = vector.shape_cast %104 : vector<16xf32> to vector<16x1xf32>
    %106 = vector.broadcast %105 : vector<16x1xf32> to vector<16x16xf32>
    %107 = arith.subf %103, %106 : vector<16x16xf32>
    %108 = math.exp %107 : vector<16x16xf32>
    %cst_51 = arith.constant dense<0.000000e+00> : vector<16xf32>
    %109 = vector.multi_reduction <add>, %108, %cst_51 [1] : vector<16x16xf32> to vector<16xf32>
    %110 = vector.shape_cast %109 : vector<16xf32> to vector<16x1xf32>
    %111 = vector.broadcast %110 : vector<16x1xf32> to vector<16x16xf32>
    %112 = arith.divf %108, %111 : vector<16x16xf32>
    %cst_52 = arith.constant dense<0.000000e+00> : vector<16x32xf32>
    %113 = tpu.matmul %112, %100, %cst_52 {dimension_numbers = #tpu.dot_dimension_numbers<[1], [0], [0], [1], [0, 0, 1, 1], [], []>, precision = #tpu.contract_precision<fp32>} : vector<16x16xf32>, vector<16x32xf32>, vector<16x32xf32> -> vector<16x32xf32>
    %c0_53 = arith.constant 0 : index
    %c0_54 = arith.constant 0 : index
    %c96 = arith.constant 96 : index
    %114 = vector.load %arg10[%c0_53, %c0_54, %c96] : memref<1x16x128xf32, #tpu.memory_space<vmem>>, vector<1x16x32xf32>
    %115 = vector.shape_cast %114 : vector<1x16x32xf32> to vector<16x32xf32>
    %116 = vector.shape_cast %113 : vector<16x32xf32> to vector<1x16x32xf32>
    tpu.vector_store %arg10[%c0_53, %c0_54, %c96], %116 {strides = array<i32>} : memref<1x16x128xf32, #tpu.memory_space<vmem>>, vector<1x16x32xf32>,
    return
  }
  func.func @transform_0(%arg0: i32) -> (i32, i32, i32) {
    %c0_i32 = arith.constant 0 : i32
    %c0_i32_0 = arith.constant 0 : i32
    %c0_i32_1 = arith.constant 0 : i32
    return %arg0, %c0_i32, %c0_i32_0 : i32, i32, i32
  }
  func.func @transform_1(%arg0: i32) -> (i32, i32) {
    %c0_i32 = arith.constant 0 : i32
    %c0_i32_0 = arith.constant 0 : i32
    %c0_i32_1 = arith.constant 0 : i32
    return %c0_i32, %c0_i32_0 : i32, i32
  }
  func.func @transform_2(%arg0: i32) -> (i32, i32) {
    %c0_i32 = arith.constant 0 : i32
    %c0_i32_0 = arith.constant 0 : i32
    %c0_i32_1 = arith.constant 0 : i32
    return %c0_i32, %c0_i32_0 : i32, i32
  }
  func.func @transform_3(%arg0: i32) -> (i32, i32) {
    %c0_i32 = arith.constant 0 : i32
    %c0_i32_0 = arith.constant 0 : i32
    %c0_i32_1 = arith.constant 0 : i32
    return %c0_i32, %c0_i32_0 : i32, i32
  }
  func.func @transform_4(%arg0: i32) -> (i32, i32) {
    %c0_i32 = arith.constant 0 : i32
    %c0_i32_0 = arith.constant 0 : i32
    %c0_i32_1 = arith.constant 0 : i32
    return %c0_i32, %c0_i32_0 : i32, i32
  }
  func.func @transform_5(%arg0: i32) -> (i32, i32) {
    %c0_i32 = arith.constant 0 : i32
    %c0_i32_0 = arith.constant 0 : i32
    %c0_i32_1 = arith.constant 0 : i32
    return %c0_i32, %c0_i32_0 : i32, i32
  }
  func.func @transform_6(%arg0: i32) -> (i32, i32) {
    %c0_i32 = arith.constant 0 : i32
    %c0_i32_0 = arith.constant 0 : i32
    %c0_i32_1 = arith.constant 0 : i32
    return %c0_i32, %c0_i32_0 : i32, i32
  }
  func.func @transform_7(%arg0: i32) -> (i32, i32) {
    %c0_i32 = arith.constant 0 : i32
    %c0_i32_0 = arith.constant 0 : i32
    %c0_i32_1 = arith.constant 0 : i32
    return %c0_i32, %c0_i32_0 : i32, i32
  }
  func.func @transform_8(%arg0: i32) -> (i32, i32) {
    %c0_i32 = arith.constant 0 : i32
    %c0_i32_0 = arith.constant 0 : i32
    %c0_i32_1 = arith.constant 0 : i32
    return %c0_i32, %c0_i32_0 : i32, i32
  }
  func.func @transform_9(%arg0: i32) -> (i32, i32, i32) {
    %c0_i32 = arith.constant 0 : i32
    %c0_i32_0 = arith.constant 0 : i32
    %c0_i32_1 = arith.constant 0 : i32
    return %arg0, %c0_i32, %c0_i32_0 : i32, i32, i32
  }
}

</mosaic_0001>

<bundles_post_ra>
// kernel: tpu_custom_call.1
= control target key start
LH: loop header
LB: loop body
LE: loop exit
PB: predicated region body
PF: predicated region fallthrough
CT: control target
= control target key end

     0   :  { %s10465_s0 = inlined_call_operand.hbm [shape: f32[2,16,128], index: 0, kind: input, shape index: {}]   ;;  %s10466_s1 = inlined_call_operand.vmem [shape: f32[1,128], index: 1, kind: input, shape index: {}]   ;;  %s10467_s2 = inlined_call_operand.vmem [shape: f32[1,128], index: 2, kind: input, shape index: {}]   ;;  %s10468_s3 = inlined_call_operand.hbm [shape: f32[128,128], index: 3, kind: input, shape index: {}]   ;;  %s10469_s4 = inlined_call_operand.vmem [shape: f32[1,128], index: 4, kind: input, shape index: {}]   ;;  %s10470_s5 = inlined_call_operand.hbm [shape: f32[128,128], index: 5, kind: input, shape index: {}]   ;;  %s10471_s6 = inlined_call_operand.vmem [shape: f32[1,128], index: 6, kind: input, shape index: {}]   ;;  %s10472_s7 = inlined_call_operand.hbm [shape: f32[128,128], index: 7, kind: input, shape index: {}]   ;;  %s10473_s8 = inlined_call_operand.vmem [shape: f32[1,128], index: 8, kind: input, shape index: {}]   ;;  %s10474_s9 = inlined_call_operand.hbm [shape: f32[2,16,128], index: 9, kind: output, shape index: {}]  }
   0x1   :  { %10482 = sst [smem:[#allocation16_spill]] %s10468_s3 }
   0x2   :  { %10483 = sst [smem:[#allocation17_spill]] %s10470_s5 }
   0x3   :  { %10484 = sst [smem:[#allocation18_spill]] %s10472_s7 }
   0x4   :  { %14 = vsyncpa [#allocation3], 0 }
   0x5   :  { %16 = vsyncpa [#allocation3 + $0x1], 0 }
   0x6   :  { %17 = vsyncpa [#allocation6], 0 }
   0x7   :  { %18 = vsyncpa [#allocation9], 0 }
   0x8   :  { %19 = vsyncpa [#allocation4], 0 }
   0x9   :  { %21 = vsyncpa [#allocation4 + $0x1], 0  ;;  %s8801_s30 = smov 0   ;;  %s8803_s10 = smov 0  }
   0xa   :  { %s8805_s11 = smov 0   ;;  %s8807_s12 = smov 0  }
   0xb LB: > { %s8822_s13 = sadd.s32 4294967295, %s8737_s12   ;;  %s6930_s14 = sadd.s32 4294967294, %s8737_s12   ;;  %s8737_s12 = sphi %s8807_s12, %s10510_s12   ;;  %s8733_s11 = sphi %s8805_s11, %s10509_s11   ;;  %s8729_s10 = sphi %s8803_s10, %s10508_s10   ;;  %s8725_s30 = sphi %s8801_s30, %s10507_s30  }
   0xc   : > { %p47_p0 = scmp.ne.s32.totalorder %s8729_s10, %s8725_s30  ;;  %p10475_p1 = scmp.eq.s32.totalorder %s8822_s13, 0 }
   0xd   : > { %p239_p2 = scmp.eq.s32.totalorder %s8822_s13, 1  ;;  %p245_p3 = scmp.eq.s32.totalorder %s6930_s14, 1 }
   0xe   : > { %p8831_p4 = por %p10475_p1, %p47_p0  ;;  %p6931_p5 = scmp.ge.s32.totalorder %s8737_s12, 1 }
   0xf   : > { %p8836_p6 = por %p245_p3, %p47_p0  ;;  %p252_p7 = scmp.lt.s32.totalorder %s8737_s12, 3 }
  0x10   : > { %s10485_s15 = scalar_select %p8831_p4, 1, 0 }
  0x11   : > { %s10486_s16 = scalar_select %p8836_p6, 1, 0 }
  0x12   : > { %p8841_p8 = pnand %p6931_p5, %p252_p7  ;;  %s8739_s18 = smov [#allocation5]  }
  0x13   : > { %s270_s19 = sshll.u32 %s8739_s18, 4  ;;  %s8740_s21 = smov [#allocation7]   ;;  %s271_s19 = int_to_ptr.vmem [resolvable:$true] %s270_s19 }
  0x14   : > { %s10487_s17 = scalar_select %p8841_p8, 1, 0 }
  0x15   : > { %p8455_p9 = pneg %p8841_p8  ;;  %s286_s22 = sshll.u32 %s8740_s21, 4  ;;  %s287_s22 = int_to_ptr.vmem [resolvable:$true] %s286_s22 }
  0x16   : > { %s8741_s23 = smov [#allocation8]   ;;  %s8570_s25 = scalar_lea.vmem %s271_s19, 2048 }
  0x17   : > { %p8850_p11 = pnand %p8455_p9, %p10475_p1  ;;  %s302_s24 = sshll.u32 %s8741_s23, 4  ;;  %s303_s24 = int_to_ptr.vmem [resolvable:$true] %s302_s24 }
  0x18   : > { %p8571_p13 = scmp.ne.s32.totalorder %s271_s19, %s8570_s25  ;;  %p8578_p5 = scmp.lt.s32.totalorder %s271_s19, %s271_s19 }
  0x19   : > { %p8561_p12 = pneg %p8850_p11  ;;  %p8579_p7 = scmp.lt.s32.totalorder %s8570_s25, %s8570_s25 }
  0x1b   : > { %p8573_p0 = pnand %p8571_p13, %p8561_p12  ;;  %p8580_p9 = por %p8579_p7, %p8578_p5 }
  0x1d   : > { %p8574_p3 = pneg %p8573_p0 }
  0x1f   : > { %p8581_p10 = pnand %p8580_p9, %p8574_p3 }
  0x21   : > { %8584 = shalt.err (!%p8581_p10)
}
  0x22   : > { %s10476_s26 = smov 128   ;;  %s10477_s27 = smov 8  }
  0x23   : > { %s10489_s3 = sld [smem:[#allocation16_spill]]  ;;  %s8596_s14 = scalar_lea.vmem %s287_s22, 2048 }
  0x24   : > { %p8597_p13 = scmp.ne.s32.totalorder %s287_s22, %s8596_s14  ;;  %p8604_p3 = scmp.lt.s32.totalorder %s287_s22, %s287_s22 }
  0x25   : > { %p8605_p10 = scmp.lt.s32.totalorder %s8596_s14, %s8596_s14 }
  0x26   : > { %p8599_p0 = pnand %p8597_p13, %p8561_p12 }
  0x27   : > { %p8606_p7 = por %p8605_p10, %p8604_p3 }
  0x28   : > { %p8600_p5 = pneg %p8599_p0 }
  0x29   : > { %8458 = dma.hbm_to_vmem [thread:$0]  (!%p8850_p11), %s10489_s3, 2048, %s271_s19, [#allocation6], %s10476_s26, %s10476_s26, %s10477_s27  }
  0x2a   : > { %p8607_p9 = pnand %p8606_p7, %p8600_p5 }
  0x2c   : > { %8610 = shalt.err (!%p8607_p9)
}
  0x2d   : > { %s10490_s5 = sld [smem:[#allocation17_spill]]  ;;  %s8622_s19 = scalar_lea.vmem %s303_s24, 2048 }
  0x2e   : > { %p8623_p1 = scmp.ne.s32.totalorder %s303_s24, %s8622_s19  ;;  %p8630_p3 = scmp.lt.s32.totalorder %s303_s24, %s303_s24 }
  0x2f   : > { %p8631_p5 = scmp.lt.s32.totalorder %s8622_s19, %s8622_s19 }
  0x30   : > { %p8625_p13 = pnand %p8623_p1, %p8561_p12 }
  0x31   : > { %p8632_p10 = por %p8631_p5, %p8630_p3 }
  0x32   : > { %p8626_p0 = pneg %p8625_p13 }
  0x33   : > { %8461 = dma.hbm_to_vmem [thread:$0]  (!%p8850_p11), %s10490_s5, 2048, %s287_s22, [#allocation6], %s10476_s26, %s10476_s26, %s10477_s27  }
  0x34   : > { %p8633_p7 = pnand %p8632_p10, %p8626_p0 }
  0x36   : > { %8636 = shalt.err (!%p8633_p7)
}
  0x37   : > { %s10491_s7 = sld [smem:[#allocation18_spill]]  ;;  %s8890_s22 = sadd.s32 1, %s8737_s12  }
  0x38   : > { %s31_s20 = ssub.s32 %s8737_s12, %s8890_s22  ;;  %s34_s28 = sadd.s32 1, %s8733_s11 }
  0x39   : > { %p32_p1 = scmp.eq.s32.totalorder %s31_s20, 0  ;;  %p41_p12 = scmp.ne.s32.totalorder %s8733_s11, %s8729_s10 }
  0x3a   : > { %p42_p9 = scmp.eq.s32.totalorder %s8737_s12, 0  ;;  %p8476_p13 = scmp.lt.s32.totalorder %s8737_s12, 2 }
  0x3b   : > { %s8900_s29 = scalar_select %p32_p1, %s8733_s11, %s34_s28  }
  0x3c   : > { %p43_p0 = por %p42_p9, %p41_p12  ;;  %p8904_p3 = por %p239_p2, %p41_p12 }
  0x3d   : > { %8464 = dma.hbm_to_vmem [thread:$0]  (!%p8850_p11), %s10491_s7, 2048, %s303_s24, [#allocation9], %s10476_s26, %s10476_s26, %s10477_s27  }
  0x3e   : > { %s10492_s14 = scalar_select %p8904_p3, 1, 0 }
  0x3f   : > { %s319_s18 = sand.u32 1, %s8733_s11   ;;  %s6955_s21 = sshll.u32 %s8737_s12, 8 }
  0x40   : > { %s6936_s24 = sshll.u32 %s319_s18, 4  ;;  %s8913_s25 = scalar_lea.hbm %s10465_s0, %s6955_s21 }
  0x41   : > { %s323_s20 = scalar_lea.vmem [#allocation2], %s6936_s24  ;;  %p8915_p11 = pnand %p8476_p13, %p43_p0 }
  0x42   : > { %s330_s28 = sshll.u32 %s323_s20, 4  ;;  %s8921_s27 = scalar_lea.sflag [#allocation3], %s319_s18  ;;  %s8919_s28 = int_to_ptr.vmem [resolvable:$true] %s330_s28 }
  0x43   : > { %s8637_s3 = scalar_lea.hbm %s8913_s25, 256  ;;  %p8639_p5 = pneg %p8915_p11 }
  0x44   : > { %p8638_p2 = scmp.ne.s32.totalorder %s8913_s25, %s8637_s3  ;;  %s8642_s24 = scalar_lea.hbm %s10465_s0, 512 }
  0x45   : > { %p8643_p1 = scmp.lt.s32.totalorder %s8913_s25, %s10465_s0  ;;  %p8644_p12 = scmp.lt.s32.totalorder %s8642_s24, %s8637_s3 }
  0x46   : > { %p8640_p10 = pnand %p8639_p5, %p8638_p2 }
  0x47   : > { %p8645_p9 = por %p8644_p12, %p8643_p1 }
  0x48   : > { %p8641_p7 = pneg %p8640_p10 }
  0x4a   : > { %p8646_p13 = pnand %p8645_p9, %p8641_p7 }
  0x4c   : > { %8649 = shalt.err (!%p8646_p13)
}
  0x4d   : > { %s8650_s18 = scalar_lea.vmem %s8919_s28, 256  ;;  %s8744_s5 = smov [#allocation2]  }
  0x4e   : > { %p8651_p0 = scmp.ne.s32.totalorder %s8919_s28, %s8650_s18  ;;  %s8655_s7 = sshll.u32 %s8744_s5, 4  ;;  %s8656_s7 = int_to_ptr.vmem [resolvable:$false] %s8655_s7 }
  0x4f   : > { %s8657_s21 = scalar_lea.vmem %s8656_s7, 512  ;;  %p8658_p10 = scmp.lt.s32.totalorder %s8919_s28, %s8656_s7 }
  0x50   : > { %p8653_p6 = pnand %p8651_p0, %p8639_p5  ;;  %p8659_p3 = scmp.lt.s32.totalorder %s8657_s21, %s8650_s18 }
  0x52   : > { %p8654_p2 = pneg %p8653_p6  ;;  %p8660_p4 = por %p8659_p3, %p8658_p10 }
  0x54   : > { %p8661_p8 = pnand %p8660_p4, %p8654_p2 }
  0x56   : > { %8664 = shalt.err (!%p8661_p8)
}
  0x57   : > { %s10494_s3 = smov 8   ;;  %s10495_s19 = smov 128  }
  0x58   : > { %8468 = dma.hbm_to_vmem [thread:$0]  (!%p8915_p11), %s8913_s25, 256, %s8919_s28, %s8921_s27, %s10495_s19, %s10495_s19, %s10494_s3  }
  0x59   : > { %p10496_p6 = scmp.ne.s32.totalorder %s10487_s17, 0 }
  0x5b   : > { %342 = sbr.rel (%p10496_p6) target bundleno = 3371 (0xd2b), region = 56 }
  0x60   : > { %s8948_s5 = sand.u32 1, %s8729_s10   ;;  %p10497_p4 = scmp.ne.s32.totalorder %s10485_s15, 0 }
  0x61   : > { %s6940_s7 = sshll.u32 %s8948_s5, 4  ;;  %s345_s24 = scalar_lea.sflag [#allocation3], %s8948_s5 }
  0x62   : > { %s348_s26 = scalar_lea.vmem [#allocation2], %s6940_s7 }
  0x63   : > { %8708 = dma.done.wait (%p10497_p4), %s345_s24, 256  }
  0x64   : > { %8710 = vsyncadd (%p10497_p4), %s345_s24, 4294967040  ;;  %p10498_p8 = scmp.eq.s32.totalorder %s8822_s13, 0 }
  0x66   : > { %8712 = dma.done.wait (%p10498_p8), [#allocation6], 4096   ;;  %p10499_p3 = pmov %p10498_p8 }
  0x68   : > { %8714 = vsyncadd (%p10499_p3), [#allocation6], 4294963200  ;;  %p10500_p11 = pmov %p10499_p3 }
  0x69   : > { %p10501_p5 = pmov %p10499_p3 }
  0x6a   : > { %8716 = dma.done.wait (%p10500_p11), [#allocation9], 2048  }
  0x6b   : > { %8718 = vsyncadd (%p10501_p5), [#allocation9], 4294965248  ;;  %v395_v0 = vld [vmem:[%s348_s26] sm:$0xff]  ;;  %v396_v1 = vld [vmem:[%s348_s26 + $0x8] sm:$0xff]  ;;  %vm2561_vm0 = vcmask 261120   ;;  %vm3078_vm1 = vcmask 130048  }
  0x6c   : > { %399 = vadd.xlane.f32.xlu0 %v395_v0  ;;  %v453_v2 = vld [vmem:[#allocation5 + $0x78] sm:$0xff]  ;;  %v452_v3 = vld [vmem:[#allocation5 + $0x70] sm:$0xff]  ;;  %v451_v21 = vld [vmem:[#allocation5 + $0x68] sm:$0xff]  ;;  %s8745_s19 = smov 96   ;;  %s10169_s24 = scalar_lea.vmem [#allocation10], %s6940_s7  ;;  %vm4677_vm2 = vcmask 523520  }
  0x6d   : > { %v8966_v4 = vand.u32 4294901760, %v453_v2  ;;  %v8968_v5 = vand.u32 4294901760, %v452_v3  ;;  %v8996_v22 = vand.u32 4294901760, %v451_v21  ;;  %v450_v24 = vld [vmem:[#allocation5 + $0x60] sm:$0xff]  ;;  %v449_v27 = vld [vmem:[#allocation5 + $0x58] sm:$0xff]  ;;  %v448_v31 = vld [vmem:[#allocation5 + $0x50] sm:$0xff] }
  0x6e   : > { %v9003_v26 = vand.u32 4294901760, %v450_v24  ;;  %v9013_v30 = vand.u32 4294901760, %v449_v27  ;;  %v9025_v35 = vand.u32 4294901760, %v448_v31  ;;  %v447_v36 = vld [vmem:[#allocation5 + $0x48] sm:$0xff]  ;;  %v446_v42 = vld [vmem:[#allocation5 + $0x40] sm:$0xff]  ;;  %v445_v48 = vld [vmem:[#allocation5 + $0x38] sm:$0xff] }
  0x6f   : > { %v8971_v6 = vsub.f32 %v453_v2, %v8966_v4  ;;  %v8974_v7 = vsub.f32 %v452_v3, %v8968_v5  ;;  %7473 = vmatprep.subr.mxu0 %v8966_v4  ;;  %v9001_v25 = vsub.f32 %v451_v21, %v8996_v22  ;;  %v9038_v41 = vand.u32 4294901760, %v447_v36  ;;  %v444_v54 = vld [vmem:[#allocation5 + $0x30] sm:$0xff]  ;;  %v443_v60 = vld [vmem:[#allocation5 + $0x28] sm:$0xff]  ;;  %v442_v2 = vld [vmem:[#allocation5 + $0x20] sm:$0xff]  ;;  %s8746_s7 = smov 64   ;;  %s8747_s26 = smov 32  }
  0x70   : > { %401 = vadd.xlane.f32.xlu0 %v396_v1  ;;  %7474 = vmatpush3.msra.mxu0 %v8966_v4  ;;  %v9011_v29 = vsub.f32 %v450_v24, %v9003_v26  ;;  %v9023_v34 = vsub.f32 %v449_v27, %v9013_v30  ;;  %v9035_v40 = vsub.f32 %v448_v31, %v9025_v35  ;;  %v9046_v46 = vand.u32 4294901760, %v446_v42  ;;  %s6956_s15 = sshll.u32 %s8822_s13, 8  ;;  %s6828_s17 = sshll.u32 %s10169_s24, 4  ;;  %s10420_s17 = int_to_ptr.vmem [resolvable:$true] %s6828_s17 }
  0x71   : > { %v8979_v8 = vand.u32 4294901760, %v8971_v6  ;;  %v8982_v9 = vand.u32 4294901760, %v8974_v7  ;;  %7475 = vmatprep.subr.mxu0 %v8968_v5  ;;  %v9008_v28 = vand.u32 4294901760, %v9001_v25  ;;  %v9049_v47 = vsub.f32 %v447_v36, %v9038_v41  ;;  %s10418_s28 = scalar_lea.hbm %s10474_s9, %s6956_s15  ;;  %s6815_s23 = scalar_lea.sflag [#allocation4], %s8948_s5 }
  0x72   : > { %7476 = vmatpush3.msra.mxu0 %v8968_v5  ;;  %v9020_v33 = vand.u32 4294901760, %v9011_v29  ;;  %v9032_v39 = vand.u32 4294901760, %v9023_v34  ;;  %v9044_v45 = vand.u32 4294901760, %v9035_v40  ;;  %v9055_v51 = vsub.f32 %v446_v42, %v9046_v46  ;;  %s8665_s20 = scalar_lea.vmem %s10420_s17, 256  ;;  %p10504_p1 = scmp.ne.s32.totalorder %s10492_s14, 0 }
  0x73   : > { %v566_v10 = vsub.f32 %v8971_v6, %v8979_v8  ;;  %v573_v11 = vsub.f32 %v8974_v7, %v8982_v9  ;;  %7477 = vmatprep.subr.mxu0 %v8996_v22  ;;  %v580_v32 = vsub.f32 %v9001_v25, %v9008_v28  ;;  %v9057_v52 = vand.u32 4294901760, %v445_v48  ;;  %p8666_p7 = scmp.ne.s32.totalorder %s10420_s17, %s8665_s20  ;;  %s8748_s13 = smov [#allocation10]  }
  0x74   : > { %7478 = vmatpush3.msra.mxu0 %v8996_v22  ;;  %v587_v38 = vsub.f32 %v9011_v29, %v9020_v33  ;;  %v594_v44 = vsub.f32 %v9023_v34, %v9032_v39  ;;  %v601_v50 = vsub.f32 %v9035_v40, %v9044_v45  ;;  %v9061_v53 = vand.u32 4294901760, %v9049_v47  ;;  %s8669_s18 = sshll.u32 %s8748_s13, 4  ;;  %s8670_s18 = int_to_ptr.vmem [resolvable:$false] %s8669_s18 }
  0x75   : > { %v567_v12 = vand.u32 4294901760, %v566_v10  ;;  %v574_v13 = vand.u32 4294901760, %v573_v11  ;;  %7479 = vmatprep.subr.mxu0 %v9003_v26  ;;  %v581_v37 = vand.u32 4294901760, %v580_v32  ;;  %v9065_v56 = vand.u32 4294901760, %v9055_v51  ;;  %p8667_p12 = pnand %p8666_p7, %p10504_p1  ;;  %s8671_s21 = scalar_lea.vmem %s8670_s18, 512 }
  0x76   : > { %7480 = vmatpush3.msra.mxu0 %v9003_v26  ;;  %v588_v43 = vand.u32 4294901760, %v587_v38  ;;  %v595_v49 = vand.u32 4294901760, %v594_v44  ;;  %v602_v55 = vand.u32 4294901760, %v601_v50  ;;  %v9068_v57 = vsub.f32 %v445_v48, %v9057_v52  ;;  %p8672_p13 = scmp.lt.s32.totalorder %s10420_s17, %s8670_s18  ;;  %p8673_p0 = scmp.lt.s32.totalorder %s8671_s21, %s8665_s20 }
  0x77   : > { %7508 = vmatprep.subr.mxu1 %v567_v12  ;;  %7481 = vmatprep.subr.mxu0 %v9013_v30  ;;  %v9070_v58 = vand.u32 4294901760, %v444_v54  ;;  %v608_v59 = vsub.f32 %v9049_v47, %v9061_v53  ;;  %v615_v61 = vsub.f32 %v9055_v51, %v9065_v56  ;;  %vm5744_vm3 = vcmask 785920   ;;  %p8668_p9 = pneg %p8667_p12 }
  0x78   : > { %7509 = vmatpush3.msra.mxu1 %v567_v12  ;;  %7482 = vmatpush3.msra.mxu0 %v9013_v30  ;;  %v9079_v62 = vand.u32 4294901760, %v9068_v57  ;;  %vm6811_vm4 = vcmask 1048320   ;;  %p8674_p2 = por %p8673_p0, %p8672_p13 }
  0x79   : > { %7510 = vmatprep.subr.mxu1 %v574_v13  ;;  %7483 = vmatprep.subr.mxu0 %v9025_v35  ;;  %v9082_v63 = vsub.f32 %v444_v54, %v9070_v58  ;;  %v616_v3 = vand.u32 4294901760, %v615_v61 }
  0x7a   : > { %7511 = vmatpush3.msra.mxu1 %v574_v13  ;;  %7484 = vmatpush3.msra.mxu0 %v9025_v35  ;;  %v622_v10 = vsub.f32 %v9068_v57, %v9079_v62  ;;  %v9097_v13 = vand.u32 4294901760, %v442_v2  ;;  %p8675_p10 = pnand %p8674_p2, %p8668_p9 }
  0x7b   : > { %7512 = vmatprep.subr.mxu1 %v581_v37  ;;  %7485 = vmatprep.subr.mxu0 %v9038_v41  ;;  %v9091_v11 = vand.u32 4294901760, %v9082_v63 }
  0x7c   : > { %7513 = vmatpush3.msra.mxu1 %v581_v37  ;;  %7486 = vmatpush3.msra.mxu0 %v9038_v41  ;;  %v9109_v21 = vsub.f32 %v442_v2, %v9097_v13  ;;  %v439_v37 = vld [vmem:[#allocation5 + $0x8] sm:$0xff] }
  0x7d   : > { %7514 = vmatprep.subr.mxu1 %v588_v43  ;;  %7487 = vmatprep.subr.mxu0 %v9046_v46  ;;  %v9130_v44 = vand.u32 4294901760, %v439_v37 }
  0x7e   : > { %7515 = vmatpush3.msra.mxu1 %v588_v43  ;;  %7488 = vmatpush3.msra.mxu0 %v9046_v46  ;;  %v9121_v36 = vand.u32 4294901760, %v9109_v21 }
  0x7f   : > { %7516 = vmatprep.subr.mxu1 %v595_v49  ;;  %7489 = vmatprep.subr.mxu0 %v9057_v52 }
  0x80   : > { %7517 = vmatpush3.msra.mxu1 %v595_v49  ;;  %7490 = vmatpush3.msra.mxu0 %v9057_v52  ;;  %v643_v48 = vsub.f32 %v9109_v21, %v9121_v36  ;;  %v438_v49 = vld [vmem:[#allocation5] sm:$0xff] }
  0x81   : > { %7518 = vmatprep.subr.mxu1 %v602_v55  ;;  %7491 = vmatprep.subr.mxu0 %v9070_v58 }
  0x82   : > { %7519 = vmatpush3.msra.mxu1 %v602_v55  ;;  %7492 = vmatpush3.msra.mxu0 %v9070_v58  ;;  %v9142_v55 = vsub.f32 %v439_v37, %v9130_v44 }
  0x84   : > { %v9151_v2 = vand.u32 4294901760, %v9142_v55 }
  0xf5   : > { %v400_v14 = vpop.xlane.xlu0 %399 }
  0xf6   : > { %v404_v15 = vmul.f32 0.0078125, %v400_v14  ;;  %v441_v14 = vld [vmem:[#allocation5 + $0x18] sm:$0xff] }
  0xf8   : > { %v8990_v16 = vsub.f32 %v395_v0, %v404_v15  ;;  %v9084_v0 = vand.u32 4294901760, %v443_v60  ;;  %v623_v15 = vand.u32 4294901760, %v622_v10 }
  0xf9   : > { %v402_v17 = vpop.xlane.xlu0 %401 }
  0xfa   : > { %v405_v18 = vmul.f32 0.0078125, %v402_v17  ;;  %v408_v19 = vmul.f32 %v8990_v16, %v8990_v16  ;;  %v9094_v12 = vsub.f32 %v443_v60, %v9084_v0  ;;  %7493 = vmatprep.subr.mxu0 %v9084_v0  ;;  %v629_v17 = vsub.f32 %v9082_v63, %v9091_v11 }
  0xfb   : > { %7494 = vmatpush3.msra.mxu0 %v9084_v0  ;;  %v644_v60 = vand.u32 4294901760, %v643_v48 }
  0xfc   : > { %v8994_v20 = vsub.f32 %v396_v1, %v405_v18  ;;  %410 = vadd.xlane.f32.xlu1 %v408_v19  ;;  %v609_v1 = vand.u32 4294901760, %v608_v59  ;;  %v9103_v18 = vand.u32 4294901760, %v9094_v12  ;;  %v9105_v19 = vand.u32 4294901760, %v441_v14  ;;  %7495 = vmatprep.subr.mxu0 %v9097_v13 }
  0xfd   : > { %v630_v24 = vand.u32 4294901760, %v629_v17  ;;  %7496 = vmatpush3.msra.mxu0 %v9097_v13  ;;  %v9144_v59 = vand.u32 4294901760, %v438_v49 }
  0xfe   : > { %v409_v23 = vmul.f32 %v8994_v20, %v8994_v20  ;;  %7520 = vmatprep.subr.mxu1 %v609_v1  ;;  %v636_v27 = vsub.f32 %v9094_v12, %v9103_v18  ;;  %v9115_v31 = vsub.f32 %v441_v14, %v9105_v19  ;;  %7497 = vmatprep.subr.mxu0 %v9105_v19 }
  0xff   : > { %7521 = vmatpush3.msra.mxu1 %v609_v1  ;;  %7498 = vmatpush3.msra.mxu0 %v9105_v19  ;;  %v664_v14 = vsub.f32 %v9142_v55, %v9151_v2 }
 0x100   : > { %412 = vadd.xlane.f32.xlu1 %v409_v23  ;;  %7522 = vmatprep.subr.mxu1 %v616_v3  ;;  %v440_v23 = vld [vmem:[#allocation5 + $0x10] sm:$0xff]  ;;  %v637_v38 = vand.u32 4294901760, %v636_v27  ;;  %v9125_v42 = vand.u32 4294901760, %v9115_v31 }
 0x101   : > { %7523 = vmatpush3.msra.mxu1 %v616_v3  ;;  %v9117_v32 = vand.u32 4294901760, %v440_v23  ;;  %v9154_v3 = vsub.f32 %v438_v49, %v9144_v59  ;;  %v665_v17 = vand.u32 4294901760, %v664_v14 }
 0x102   : > { %7524 = vmatprep.subr.mxu1 %v623_v15  ;;  %v650_v50 = vsub.f32 %v9115_v31, %v9125_v42 }
 0x103   : > { %7525 = vmatpush3.msra.mxu1 %v623_v15  ;;  %v9128_v43 = vsub.f32 %v440_v23, %v9117_v32  ;;  %7499 = vmatprep.subr.mxu0 %v9117_v32  ;;  %v9161_v15 = vand.u32 4294901760, %v9154_v3 }
 0x104   : > { %7526 = vmatprep.subr.mxu1 %v630_v24  ;;  %7500 = vmatpush3.msra.mxu0 %v9117_v32  ;;  %v651_v61 = vand.u32 4294901760, %v650_v50 }
 0x105   : > { %7527 = vmatpush3.msra.mxu1 %v630_v24  ;;  %v9139_v54 = vand.u32 4294901760, %v9128_v43  ;;  %7501 = vmatprep.subr.mxu0 %v9130_v44  ;;  %v671_v23 = vsub.f32 %v9154_v3, %v9161_v15 }
 0x106   : > { %7528 = vmatprep.subr.mxu1 %v637_v38  ;;  %7502 = vmatpush3.msra.mxu0 %v9130_v44 }
 0x107   : > { %7529 = vmatpush3.msra.mxu1 %v637_v38  ;;  %v657_v1 = vsub.f32 %v9128_v43, %v9139_v54  ;;  %7503 = vmatprep.subr.mxu0 %v9144_v59  ;;  %v672_v24 = vand.u32 4294901760, %v671_v23 }
 0x108   : > { %7530 = vmatprep.subr.mxu1 %v644_v60  ;;  %7504 = vmatpush3.msra.mxu0 %v9144_v59 }
 0x109   : > { %7531 = vmatpush3.msra.mxu1 %v644_v60  ;;  %v658_v10 = vand.u32 4294901760, %v657_v1  ;;  %7543 = vmatprep.subr.mxu0 %v8971_v6 }
 0x10a   : > { %7532 = vmatprep.subr.mxu1 %v651_v61 }
 0x10b   : > { %7533 = vmatpush3.msra.mxu1 %v651_v61  ;;  %v6945_v61 = vld [vmem:[%s10466_s1] ss:$0 sm:$0xff] }
 0x10c   : > { %7534 = vmatprep.subr.mxu1 %v658_v10 }
 0x10d   : > { %7535 = vmatpush3.msra.mxu1 %v658_v10  ;;  %v6946_v10 = vld [vmem:[%s10467_s2] ss:$0 sm:$0xff] }
 0x10e   : > { %7536 = vmatprep.subr.mxu1 %v665_v17 }
 0x10f   : > { %7537 = vmatpush3.msra.mxu1 %v665_v17 }
 0x110   : > { %7538 = vmatprep.subr.mxu1 %v672_v24 }
 0x111   : > { %7539 = vmatpush3.msra.mxu1 %v672_v24 }
 0x112   : > { %7578 = vmatprep.subr.mxu1 %v8966_v4 }
 0x185   : > { %v411_v27 = vpop.xlane.xlu1 %410 }
 0x186   : > { %v414_v37 = vmul.f32 0.0078125, %v411_v27 }
 0x188   : > { %v416_v38 = vadd.f32 1e-06, %v414_v37 }
 0x189   : > { %v413_v48 = vpop.xlane.xlu1 %412 }
 0x18a   : > { %8523 = vrsqrt.f32 %v416_v38  ;;  %v415_v49 = vmul.f32 0.0078125, %v413_v48 }
 0x18c   : > { %v417_v50 = vadd.f32 1e-06, %v415_v49 }
 0x18e   : > { %8525 = vrsqrt.f32 %v417_v50 }
 0x197   : > { %v8524_v60 = vpop.eup %8523 }
 0x198   : > { %v420_v1 = vmul.f32 %v8524_v60, %v8990_v16 }
 0x19a   : > { %v428_v14 = vmul.f32 %v6945_v61, %v420_v1 }
 0x19b   : > { %v8526_v17 = vpop.eup %8525 }
 0x19c   : > { %v436_v23 = vadd.f32 %v6946_v10, %v428_v14  ;;  %v421_v24 = vmul.f32 %v8526_v17, %v8994_v20  ;;  %v1149_v14 = vld [vmem:[#allocation7 + $0x20] sm:$0xff] }
 0x19e   : > { %v9176_v27 = vand.u32 4294901760, %v436_v23  ;;  %v429_v37 = vmul.f32 %v6945_v61, %v421_v24 }
 0x1a0   : > { %v437_v38 = vadd.f32 %v6946_v10, %v429_v37  ;;  %7540 = vmatprep.mubr.f32.mxu1 %v9176_v27  ;;  %v9180_v48 = vsub.f32 %v436_v23, %v9176_v27  ;;  %v1148_v37 = vld [vmem:[#allocation7 + $0x18] sm:$0xff] }
 0x1a2   : > { %v9182_v49 = vand.u32 4294901760, %v437_v38  ;;  %v9185_v16 = vand.u32 4294901760, %v9180_v48 }
 0x1a4   : > { %7541 = vmatmul.mubr.f32.vlgmr.msra.gmra.mxu1 %v9182_v49  ;;  %v545_v50 = vsub.f32 %v9180_v48, %v9185_v16  ;;  %v9191_v20 = vsub.f32 %v437_v38, %v9182_v49 }
 0x1a5   : > { %7579 = vmatpush3.msra.mxu1 %v8966_v4  ;;  %7610 = vmatprep.mubr.f32.mxu1 %v9185_v16 }
 0x1a6   : > { %7580 = vmatprep.subr.mxu1 %v8968_v5  ;;  %v9196_v60 = vand.u32 4294901760, %v545_v50  ;;  %v9199_v61 = vand.u32 4294901760, %v9191_v20 }
 0x1a7   : > { %7581 = vmatpush3.msra.mxu1 %v8968_v5 }
 0x1a8   : > { %10502 = vst [vmem:[#allocation15_spill] sm:$0xff] %v9196_v60  ;;  %7582 = vmatprep.subr.mxu1 %v8996_v22  ;;  %7505 = vmatprep.mubr.f32.mxu0 %v9196_v60  ;;  %v555_v1 = vsub.f32 %v9191_v20, %v9199_v61 }
 0x1a9   : > { %7583 = vmatpush3.msra.mxu1 %v8996_v22 }
 0x1aa   : > { %7584 = vmatprep.subr.mxu1 %v9003_v26  ;;  %v9208_v10 = vand.u32 4294901760, %v555_v1  ;;  %v9423_v1 = vand.u32 4294901760, %v1149_v14 }
 0x1ab   : > { %7585 = vmatpush3.msra.mxu1 %v9003_v26 }
 0x1ac   : > { %7586 = vmatprep.subr.mxu1 %v9013_v30  ;;  %7506 = vmatmul.mubr.f32.vlgmr.msra.gmra.mxu0 %v9208_v10 }
 0x1ad   : > { %7544 = vmatpush3.msra.mxu0 %v8971_v6  ;;  %7587 = vmatpush3.msra.mxu1 %v9013_v30  ;;  %v1159_v6 = vld [vmem:[#allocation7 + $0x70] sm:$0xff] }
 0x1ae   : > { %7545 = vmatprep.subr.mxu0 %v8974_v7  ;;  %7575 = vmatprep.mubr.f32.mxu0 %v9180_v48 }
 0x1af   : > { %7588 = vmatprep.subr.mxu1 %v9025_v35  ;;  %7546 = vmatpush3.msra.mxu0 %v8974_v7  ;;  %v1158_v7 = vld [vmem:[#allocation7 + $0x68] sm:$0xff] }
 0x1b0   : > { %7589 = vmatpush3.msra.mxu1 %v9025_v35  ;;  %7547 = vmatprep.subr.mxu0 %v9001_v25 }
 0x1b1   : > { %7590 = vmatprep.subr.mxu1 %v9038_v41  ;;  %7548 = vmatpush3.msra.mxu0 %v9001_v25  ;;  %v9308_v25 = vand.u32 4294901760, %v1158_v7 }
 0x1b2   : > { %7591 = vmatpush3.msra.mxu1 %v9038_v41  ;;  %7549 = vmatprep.subr.mxu0 %v9011_v29 }
 0x1b3   : > { %7592 = vmatprep.subr.mxu1 %v9046_v46  ;;  %7550 = vmatpush3.msra.mxu0 %v9011_v29 }
 0x1b4   : > { %7593 = vmatpush3.msra.mxu1 %v9046_v46  ;;  %7551 = vmatprep.subr.mxu0 %v9023_v34 }
 0x1b5   : > { %7594 = vmatprep.subr.mxu1 %v9057_v52  ;;  %7552 = vmatpush3.msra.mxu0 %v9023_v34 }
 0x1b6   : > { %7595 = vmatpush3.msra.mxu1 %v9057_v52  ;;  %7553 = vmatprep.subr.mxu0 %v9035_v40 }
 0x1b7   : > { %7596 = vmatprep.subr.mxu1 %v9070_v58  ;;  %7554 = vmatpush3.msra.mxu0 %v9035_v40 }
 0x1b8   : > { %7597 = vmatpush3.msra.mxu1 %v9070_v58  ;;  %7555 = vmatprep.subr.mxu0 %v9049_v47 }
 0x1b9   : > { %7598 = vmatprep.subr.mxu1 %v9084_v0  ;;  %7556 = vmatpush3.msra.mxu0 %v9049_v47  ;;  %v1153_v47 = vld [vmem:[#allocation7 + $0x40] sm:$0xff] }
 0x1ba   : > { %7599 = vmatpush3.msra.mxu1 %v9084_v0  ;;  %7557 = vmatprep.subr.mxu0 %v9055_v51 }
 0x1bb   : > { %7600 = vmatprep.subr.mxu1 %v9097_v13  ;;  %7558 = vmatpush3.msra.mxu0 %v9055_v51 }
 0x1bc   : > { %7601 = vmatpush3.msra.mxu1 %v9097_v13  ;;  %7559 = vmatprep.subr.mxu0 %v9068_v57 }
 0x1bd   : > { %7602 = vmatprep.subr.mxu1 %v9105_v19  ;;  %7560 = vmatpush3.msra.mxu0 %v9068_v57 }
 0x1be   : > { %7603 = vmatpush3.msra.mxu1 %v9105_v19  ;;  %7561 = vmatprep.subr.mxu0 %v9082_v63 }
 0x1bf   : > { %7604 = vmatprep.subr.mxu1 %v9117_v32  ;;  %7562 = vmatpush3.msra.mxu0 %v9082_v63 }
 0x1c0   : > { %7605 = vmatpush3.msra.mxu1 %v9117_v32  ;;  %7563 = vmatprep.subr.mxu0 %v9094_v12 }
 0x1c1   : > { %7606 = vmatprep.subr.mxu1 %v9130_v44  ;;  %7564 = vmatpush3.msra.mxu0 %v9094_v12 }
 0x1c2   : > { %7607 = vmatpush3.msra.mxu1 %v9130_v44  ;;  %7565 = vmatprep.subr.mxu0 %v9109_v21 }
 0x1c3   : > { %7608 = vmatprep.subr.mxu1 %v9144_v59  ;;  %7566 = vmatpush3.msra.mxu0 %v9109_v21 }
 0x1c4   : > { %7609 = vmatpush3.msra.mxu1 %v9144_v59  ;;  %7567 = vmatprep.subr.mxu0 %v9115_v31 }
 0x1c5   : > { %7611 = vmatmul.mubr.f32.vlgmr.msra.gmra.mxu1 %v9199_v61  ;;  %7648 = vmatprep.subr.mxu1 %v8966_v4 }
 0x1c6   : > { %7568 = vmatpush3.msra.mxu0 %v9115_v31  ;;  %7649 = vmatpush3.msra.mxu1 %v8966_v4  ;;  %v1160_v4 = vld [vmem:[#allocation7 + $0x78] sm:$0xff] }
 0x1c7   : > { %7680 = vmatprep.mubr.f32.mxu1 %v9176_v27  ;;  %7569 = vmatprep.subr.mxu0 %v9128_v43 }
 0x1c8   : > { %7650 = vmatprep.subr.mxu1 %v8968_v5  ;;  %7570 = vmatpush3.msra.mxu0 %v9128_v43  ;;  %v1150_v43 = vld [vmem:[#allocation7 + $0x28] sm:$0xff] }
 0x1c9   : > { %7651 = vmatpush3.msra.mxu1 %v8968_v5  ;;  %7571 = vmatprep.subr.mxu0 %v9142_v55  ;;  %v9291_v5 = vand.u32 4294901760, %v1160_v4  ;;  %v9411_v23 = vand.u32 4294901760, %v1150_v43 }
 0x1ca   : > { %7652 = vmatprep.subr.mxu1 %v8996_v22  ;;  %7572 = vmatpush3.msra.mxu0 %v9142_v55 }
 0x1cb   : > { %7653 = vmatpush3.msra.mxu1 %v8996_v22  ;;  %7573 = vmatprep.subr.mxu0 %v9154_v3  ;;  %v1157_v22 = vld [vmem:[#allocation7 + $0x60] sm:$0xff] }
 0x1cc   : > { %7654 = vmatprep.subr.mxu1 %v9003_v26  ;;  %7574 = vmatpush3.msra.mxu0 %v9154_v3  ;;  %v9317_v29 = vand.u32 4294901760, %v1157_v22 }
 0x1cd   : > { %7655 = vmatpush3.msra.mxu1 %v9003_v26  ;;  %7576 = vmatmul.mubr.f32.vlgmr.msra.gmra.mxu0 %v9191_v20  ;;  %v1156_v26 = vld [vmem:[#allocation7 + $0x58] sm:$0xff] }
 0x1ce   : > { %7613 = vmatprep.subr.mxu0 %v8979_v8  ;;  %7656 = vmatprep.subr.mxu1 %v9013_v30  ;;  %v9329_v34 = vand.u32 4294901760, %v1156_v26 }
 0x1cf   : > { %7614 = vmatpush3.msra.mxu0 %v8979_v8  ;;  %7645 = vmatprep.mubr.f32.mxu0 %v9176_v27  ;;  %v9299_v8 = vand.u32 4294901760, %v1159_v6 }
 0x1d0   : > { %7657 = vmatpush3.msra.mxu1 %v9013_v30  ;;  %7615 = vmatprep.subr.mxu0 %v8982_v9 }
 0x1d1   : > { %7658 = vmatprep.subr.mxu1 %v9025_v35  ;;  %7616 = vmatpush3.msra.mxu0 %v8982_v9  ;;  %v9304_v9 = vsub.f32 %v1160_v4, %v9291_v5 }
 0x1d2   : > { %7659 = vmatpush3.msra.mxu1 %v9025_v35  ;;  %7617 = vmatprep.subr.mxu0 %v9008_v28  ;;  %v1155_v35 = vld [vmem:[#allocation7 + $0x50] sm:$0xff] }
 0x1d3   : > { %7660 = vmatprep.subr.mxu1 %v9038_v41  ;;  %7618 = vmatpush3.msra.mxu0 %v9008_v28  ;;  %v9315_v28 = vsub.f32 %v1159_v6, %v9299_v8  ;;  %v9322_v30 = vand.u32 4294901760, %v9304_v9  ;;  %v1147_v6 = vld [vmem:[#allocation7 + $0x10] sm:$0xff] }
 0x1d4   : > { %7661 = vmatpush3.msra.mxu1 %v9038_v41  ;;  %7619 = vmatprep.subr.mxu0 %v9020_v33  ;;  %v9339_v41 = vsub.f32 %v1157_v22, %v9317_v29  ;;  %v9433_v22 = vsub.f32 %v1150_v43, %v9411_v23 }
 0x1d5   : > { %7662 = vmatprep.subr.mxu1 %v9046_v46  ;;  %7620 = vmatpush3.msra.mxu0 %v9020_v33  ;;  %v9327_v33 = vsub.f32 %v1158_v7, %v9308_v25  ;;  %v9336_v40 = vand.u32 4294901760, %v9315_v28 }
 0x1d6   : > { %7663 = vmatpush3.msra.mxu1 %v9046_v46  ;;  %7621 = vmatprep.subr.mxu0 %v9032_v39  ;;  %v9345_v46 = vand.u32 4294901760, %v1155_v35  ;;  %v9364_v57 = vand.u32 4294901760, %v9339_v41 }
 0x1d7   : > { %7664 = vmatprep.subr.mxu1 %v9057_v52  ;;  %7622 = vmatpush3.msra.mxu0 %v9032_v39  ;;  %v1154_v39 = vld [vmem:[#allocation7 + $0x48] sm:$0xff]  ;;  %v9350_v51 = vand.u32 4294901760, %v9327_v33 }
 0x1d8   : > { %7665 = vmatpush3.msra.mxu1 %v9057_v52  ;;  %7623 = vmatprep.subr.mxu0 %v9044_v45  ;;  %v9353_v52 = vsub.f32 %v1156_v26, %v9329_v34  ;;  %v1294_v31 = vsub.f32 %v9339_v41, %v9364_v57  ;;  %v9435_v26 = vand.u32 4294901760, %v1148_v37 }
 0x1d9   : > { %7666 = vmatprep.subr.mxu1 %v9070_v58  ;;  %7624 = vmatpush3.msra.mxu0 %v9044_v45  ;;  %v1273_v45 = vsub.f32 %v9304_v9, %v9322_v30 }
 0x1da   : > { %7667 = vmatpush3.msra.mxu1 %v9070_v58  ;;  %7625 = vmatprep.subr.mxu0 %v9061_v53  ;;  %v9366_v58 = vand.u32 4294901760, %v1153_v47  ;;  %v9378_v12 = vand.u32 4294901760, %v9353_v52 }
 0x1db   : > { %7668 = vmatprep.subr.mxu1 %v9084_v0  ;;  %7626 = vmatpush3.msra.mxu0 %v9061_v53  ;;  %v9355_v53 = vand.u32 4294901760, %v1154_v39  ;;  %v1274_v63 = vand.u32 4294901760, %v1273_v45 }
 0x1dc   : > { %7669 = vmatpush3.msra.mxu1 %v9084_v0  ;;  %7627 = vmatprep.subr.mxu0 %v9065_v56  ;;  %v9371_v0 = vsub.f32 %v1155_v35, %v9345_v46  ;;  %v1146_v35 = vld [vmem:[#allocation7 + $0x8] sm:$0xff] }
 0x1dd   : > { %7670 = vmatprep.subr.mxu1 %v9097_v13  ;;  %7628 = vmatpush3.msra.mxu0 %v9065_v56  ;;  %v1280_v56 = vsub.f32 %v9315_v28, %v9336_v40 }
 0x1de   : > { %7671 = vmatpush3.msra.mxu1 %v9097_v13  ;;  %7629 = vmatprep.subr.mxu0 %v9079_v62  ;;  %v9381_v13 = vsub.f32 %v1154_v39, %v9355_v53 }
 0x1df   : > { %7672 = vmatprep.subr.mxu1 %v9105_v19  ;;  %7630 = vmatpush3.msra.mxu0 %v9079_v62  ;;  %v1152_v62 = vld [vmem:[#allocation7 + $0x38] sm:$0xff]  ;;  %v1281_v21 = vand.u32 4294901760, %v1280_v56  ;;  %v9447_v56 = vand.u32 4294901760, %v1147_v6 }
 0x1e0   : > { %7673 = vmatpush3.msra.mxu1 %v9105_v19  ;;  %7631 = vmatprep.subr.mxu0 %v9091_v11  ;;  %v1151_v19 = vld [vmem:[#allocation7 + $0x30] sm:$0xff]  ;;  %v9404_v3 = vand.u32 4294901760, %v9381_v13 }
 0x1e1   : > { %7674 = vmatprep.subr.mxu1 %v9117_v32  ;;  %7632 = vmatpush3.msra.mxu0 %v9091_v11  ;;  %v1287_v11 = vsub.f32 %v9327_v33, %v9350_v51 }
 0x1e2   : > { %7675 = vmatpush3.msra.mxu1 %v9117_v32  ;;  %7633 = vmatprep.subr.mxu0 %v9103_v18  ;;  %v9392_v32 = vsub.f32 %v1153_v47, %v9366_v58  ;;  %v1315_v4 = vsub.f32 %v9381_v13, %v9404_v3  ;;  %v9445_v47 = vsub.f32 %v1149_v14, %v9423_v1 }
 0x1e3   : > { %7676 = vmatprep.subr.mxu1 %v9130_v44  ;;  %7634 = vmatpush3.msra.mxu0 %v9103_v18  ;;  %v9385_v18 = vand.u32 4294901760, %v1152_v62  ;;  %v1288_v55 = vand.u32 4294901760, %v1287_v11  ;;  %v9455_v11 = vand.u32 4294901760, %v9433_v22 }
 0x1e4   : > { %7677 = vmatpush3.msra.mxu1 %v9130_v44  ;;  %7635 = vmatprep.subr.mxu0 %v9121_v36  ;;  %v9396_v44 = vand.u32 4294901760, %v9371_v0  ;;  %v9415_v24 = vand.u32 4294901760, %v9392_v32 }
 0x1e5   : > { %7678 = vmatprep.subr.mxu1 %v9144_v59  ;;  %7636 = vmatpush3.msra.mxu0 %v9121_v36  ;;  %v9398_v36 = vand.u32 4294901760, %v1151_v19  ;;  %v9409_v17 = vsub.f32 %v1152_v62, %v9385_v18  ;;  %v1145_v62 = vld [vmem:[#allocation7] sm:$0xff] }
 0x1e6   : > { %7679 = vmatpush3.msra.mxu1 %v9144_v59  ;;  %7637 = vmatprep.subr.mxu0 %v9125_v42  ;;  %v1301_v59 = vsub.f32 %v9353_v52, %v9378_v12  ;;  %v1308_v38 = vsub.f32 %v9371_v0, %v9396_v44  ;;  %v9472_v14 = vand.u32 4294901760, %v1145_v62 }
 0x1e7   : > { %7681 = vmatmul.mubr.f32.vlgmr.msra.gmra.mxu1 %v9182_v49  ;;  %7718 = vmatprep.subr.mxu1 %v1274_v63  ;;  %v9421_v50 = vsub.f32 %v1151_v19, %v9398_v36  ;;  %v9430_v7 = vand.u32 4294901760, %v9409_v17  ;;  %v9458_v19 = vsub.f32 %v1148_v37, %v9435_v26  ;;  %v1343_v37 = vsub.f32 %v9433_v22, %v9455_v11 }
 0x1e8   : > { %7638 = vmatpush3.msra.mxu0 %v9125_v42  ;;  %7719 = vmatpush3.msra.mxu1 %v1274_v63  ;;  %v1295_v42 = vand.u32 4294901760, %v1294_v31  ;;  %v1309_v39 = vand.u32 4294901760, %v1308_v38 }
 0x1e9   : > { %7750 = vmatprep.mubr.f32.mxu1 %v9176_v27  ;;  %7639 = vmatprep.subr.mxu0 %v9139_v54  ;;  %v9442_v45 = vand.u32 4294901760, %v9421_v50  ;;  %v1329_v63 = vsub.f32 %v9409_v17, %v9430_v7  ;;  %v9479_v38 = vand.u32 4294901760, %v9458_v19 }
 0x1ea   : > { %7720 = vmatprep.subr.mxu1 %v1281_v21  ;;  %7640 = vmatpush3.msra.mxu0 %v9139_v54  ;;  %v1302_v54 = vand.u32 4294901760, %v1301_v59  ;;  %v9470_v59 = vsub.f32 %v1147_v6, %v9447_v56 }
 0x1eb   : > { %7721 = vmatpush3.msra.mxu1 %v1281_v21  ;;  %7641 = vmatprep.subr.mxu0 %v9151_v2  ;;  %v9460_v21 = vand.u32 4294901760, %v1146_v35  ;;  %v1336_v43 = vsub.f32 %v9421_v50, %v9442_v45 }
 0x1ec   : > { %7722 = vmatprep.subr.mxu1 %v1288_v55  ;;  %7642 = vmatpush3.msra.mxu0 %v9151_v2  ;;  %v1322_v2 = vsub.f32 %v9392_v32, %v9415_v24 }
 0x1ed   : > { %7723 = vmatpush3.msra.mxu1 %v1288_v55  ;;  %7643 = vmatprep.subr.mxu0 %v9161_v15  ;;  %v9467_v55 = vand.u32 4294901760, %v9445_v47 }
 0x1ee   : > { %7724 = vmatprep.subr.mxu1 %v1295_v42  ;;  %7644 = vmatpush3.msra.mxu0 %v9161_v15  ;;  %v1316_v15 = vand.u32 4294901760, %v1315_v4  ;;  %v1323_v31 = vand.u32 4294901760, %v1322_v2  ;;  %v1337_v4 = vand.u32 4294901760, %v1336_v43  ;;  %v9489_v2 = vand.u32 4294901760, %v9470_v59 }
 0x1ef   : > { %7725 = vmatpush3.msra.mxu1 %v1295_v42  ;;  %7646 = vmatmul.mubr.f32.vlgmr.msra.gmra.mxu0 %v9182_v49  ;;  %v1330_v42 = vand.u32 4294901760, %v1329_v63  ;;  %v1350_v6 = vsub.f32 %v9445_v47, %v9467_v55 }
 0x1f0   : > { %7683 = vmatprep.subr.mxu0 %v9291_v5  ;;  %7726 = vmatprep.subr.mxu1 %v1302_v54 }
 0x1f1   : > { %7684 = vmatpush3.msra.mxu0 %v9291_v5  ;;  %7715 = vmatprep.mubr.f32.mxu0 %v9196_v60 }
 0x1f2   : > { %7727 = vmatpush3.msra.mxu1 %v1302_v54  ;;  %7685 = vmatprep.subr.mxu0 %v9299_v8  ;;  %v9482_v54 = vsub.f32 %v1146_v35, %v9460_v21  ;;  %v1344_v35 = vand.u32 4294901760, %v1343_v37 }
 0x1f3   : > { %7728 = vmatprep.subr.mxu1 %v1309_v39  ;;  %7686 = vmatpush3.msra.mxu0 %v9299_v8 }
 0x1f4   : > { %7729 = vmatpush3.msra.mxu1 %v1309_v39  ;;  %7687 = vmatprep.subr.mxu0 %v9308_v25  ;;  %v9492_v39 = vsub.f32 %v1145_v62, %v9472_v14  ;;  %v9499_v63 = vand.u32 4294901760, %v9482_v54  ;;  %v1351_v62 = vand.u32 4294901760, %v1350_v6 }
 0x1f5   : > { %7730 = vmatprep.subr.mxu1 %v1316_v15  ;;  %7688 = vmatpush3.msra.mxu0 %v9308_v25 }
 0x1f6   : > { %7731 = vmatpush3.msra.mxu1 %v1316_v15  ;;  %7689 = vmatprep.subr.mxu0 %v9317_v29  ;;  %v1357_v15 = vsub.f32 %v9458_v19, %v9479_v38  ;;  %v9506_v43 = vand.u32 4294901760, %v9492_v39 }
 0x1f7   : > { %7732 = vmatprep.subr.mxu1 %v1323_v31  ;;  %7690 = vmatpush3.msra.mxu0 %v9317_v29 }
 0x1f8   : > { %7733 = vmatpush3.msra.mxu1 %v1323_v31  ;;  %7691 = vmatprep.subr.mxu0 %v9329_v34  ;;  %v1364_v31 = vsub.f32 %v9470_v59, %v9489_v2  ;;  %v1358_v37 = vand.u32 4294901760, %v1357_v15  ;;  %v1378_v60 = vsub.f32 %v9492_v39, %v9506_v43 }
 0x1f9   : > { %7734 = vmatprep.subr.mxu1 %v1330_v42  ;;  %7692 = vmatpush3.msra.mxu0 %v9329_v34 }
 0x1fa   : > { %7735 = vmatpush3.msra.mxu1 %v1330_v42  ;;  %7693 = vmatprep.subr.mxu0 %v9345_v46  ;;  %v1371_v42 = vsub.f32 %v9482_v54, %v9499_v63  ;;  %v1365_v6 = vand.u32 4294901760, %v1364_v31 }
 0x1fb   : > { %7736 = vmatprep.subr.mxu1 %v1337_v4  ;;  %7694 = vmatpush3.msra.mxu0 %v9345_v46 }
 0x1fc   : > { %7737 = vmatpush3.msra.mxu1 %v1337_v4  ;;  %7695 = vmatprep.subr.mxu0 %v9355_v53  ;;  %v1372_v4 = vand.u32 4294901760, %v1371_v42 }
 0x1fd   : > { %7738 = vmatprep.subr.mxu1 %v1344_v35  ;;  %7696 = vmatpush3.msra.mxu0 %v9355_v53 }
 0x1fe   : > { %7739 = vmatpush3.msra.mxu1 %v1344_v35  ;;  %7697 = vmatprep.subr.mxu0 %v9366_v58  ;;  %v1379_v35 = vand.u32 4294901760, %v1378_v60  ;;  %v1867_v60 = vld [vmem:[#allocation8 + $0x78] sm:$0xff] }
 0x1ff   : > { %7740 = vmatprep.subr.mxu1 %v1351_v62  ;;  %7698 = vmatpush3.msra.mxu0 %v9366_v58 }
 0x200   : > { %7741 = vmatpush3.msra.mxu1 %v1351_v62  ;;  %7699 = vmatprep.subr.mxu0 %v9385_v18 }
 0x201   : > { %7742 = vmatprep.subr.mxu1 %v1358_v37  ;;  %7700 = vmatpush3.msra.mxu0 %v9385_v18 }
 0x202   : > { %7743 = vmatpush3.msra.mxu1 %v1358_v37  ;;  %7701 = vmatprep.subr.mxu0 %v9398_v36  ;;  %v1855_v37 = vld [vmem:[#allocation8 + $0x18] sm:$0xff] }
 0x203   : > { %7744 = vmatprep.subr.mxu1 %v1365_v6  ;;  %7702 = vmatpush3.msra.mxu0 %v9398_v36 }
 0x204   : > { %7745 = vmatpush3.msra.mxu1 %v1365_v6  ;;  %7703 = vmatprep.subr.mxu0 %v9411_v23 }
 0x205   : > { %7746 = vmatprep.subr.mxu1 %v1372_v4  ;;  %7704 = vmatpush3.msra.mxu0 %v9411_v23 }
 0x206   : > { %7747 = vmatpush3.msra.mxu1 %v1372_v4  ;;  %7705 = vmatprep.subr.mxu0 %v9423_v1 }
 0x207   : > { %7748 = vmatprep.subr.mxu1 %v1379_v35  ;;  %7706 = vmatpush3.msra.mxu0 %v9423_v1 }
 0x208   : > { %7749 = vmatpush3.msra.mxu1 %v1379_v35  ;;  %7707 = vmatprep.subr.mxu0 %v9435_v26 }
 0x209   : > { %7751 = vmatmul.mubr.f32.vlgmr.msra.gmra.mxu1 %v9182_v49  ;;  %7788 = vmatprep.subr.mxu1 %v9291_v5 }
 0x20a   : > { %7708 = vmatpush3.msra.mxu0 %v9435_v26  ;;  %7789 = vmatpush3.msra.mxu1 %v9291_v5 }
 0x20b   : > { %7820 = vmatprep.mubr.f32.mxu1 %v9185_v16  ;;  %7709 = vmatprep.subr.mxu0 %v9447_v56 }
 0x20c   : > { %7790 = vmatprep.subr.mxu1 %v9299_v8  ;;  %7710 = vmatpush3.msra.mxu0 %v9447_v56 }
 0x20d   : > { %7791 = vmatpush3.msra.mxu1 %v9299_v8  ;;  %7711 = vmatprep.subr.mxu0 %v9460_v21 }
 0x20e   : > { %7792 = vmatprep.subr.mxu1 %v9308_v25  ;;  %7712 = vmatpush3.msra.mxu0 %v9460_v21 }
 0x20f   : > { %7793 = vmatpush3.msra.mxu1 %v9308_v25  ;;  %7713 = vmatprep.subr.mxu0 %v9472_v14 }
 0x210   : > { %7794 = vmatprep.subr.mxu1 %v9317_v29  ;;  %7714 = vmatpush3.msra.mxu0 %v9472_v14 }
 0x211   : > { %7795 = vmatpush3.msra.mxu1 %v9317_v29  ;;  %7716 = vmatmul.mubr.f32.vlgmr.msra.gmra.mxu0 %v9208_v10 }
 0x212   : > { %7753 = vmatprep.subr.mxu0 %v9304_v9  ;;  %7796 = vmatprep.subr.mxu1 %v9329_v34 }
 0x213   : > { %7754 = vmatpush3.msra.mxu0 %v9304_v9  ;;  %7785 = vmatprep.mubr.f32.mxu0 %v9180_v48  ;;  %v1865_v9 = vld [vmem:[#allocation8 + $0x68] sm:$0xff] }
 0x214   : > { %7797 = vmatpush3.msra.mxu1 %v9329_v34  ;;  %7755 = vmatprep.subr.mxu0 %v9315_v28 }
 0x215   : > { %7798 = vmatprep.subr.mxu1 %v9345_v46  ;;  %7756 = vmatpush3.msra.mxu0 %v9315_v28 }
 0x216   : > { %7799 = vmatpush3.msra.mxu1 %v9345_v46  ;;  %7757 = vmatprep.subr.mxu0 %v9327_v33 }
 0x217   : > { %7800 = vmatprep.subr.mxu1 %v9355_v53  ;;  %7758 = vmatpush3.msra.mxu0 %v9327_v33  ;;  %v1863_v33 = vld [vmem:[#allocation8 + $0x58] sm:$0xff] }
 0x218   : > { %7801 = vmatpush3.msra.mxu1 %v9355_v53  ;;  %7759 = vmatprep.subr.mxu0 %v9339_v41 }
 0x219   : > { %7802 = vmatprep.subr.mxu1 %v9366_v58  ;;  %7760 = vmatpush3.msra.mxu0 %v9339_v41 }
 0x21a   : > { %7803 = vmatpush3.msra.mxu1 %v9366_v58  ;;  %7761 = vmatprep.subr.mxu0 %v9353_v52 }
 0x21b   : > { %7804 = vmatprep.subr.mxu1 %v9385_v18  ;;  %7762 = vmatpush3.msra.mxu0 %v9353_v52  ;;  %v1862_v52 = vld [vmem:[#allocation8 + $0x50] sm:$0xff] }
 0x21c   : > { %7805 = vmatpush3.msra.mxu1 %v9385_v18  ;;  %7763 = vmatprep.subr.mxu0 %v9371_v0 }
 0x21d   : > { %7806 = vmatprep.subr.mxu1 %v9398_v36  ;;  %7764 = vmatpush3.msra.mxu0 %v9371_v0 }
 0x21e   : > { %7807 = vmatpush3.msra.mxu1 %v9398_v36  ;;  %7765 = vmatprep.subr.mxu0 %v9381_v13 }
 0x21f   : > { %7808 = vmatprep.subr.mxu1 %v9411_v23  ;;  %7766 = vmatpush3.msra.mxu0 %v9381_v13  ;;  %v1860_v13 = vld [vmem:[#allocation8 + $0x40] sm:$0xff] }
 0x220   : > { %7809 = vmatpush3.msra.mxu1 %v9411_v23  ;;  %7767 = vmatprep.subr.mxu0 %v9392_v32 }
 0x221   : > { %7810 = vmatprep.subr.mxu1 %v9423_v1  ;;  %7768 = vmatpush3.msra.mxu0 %v9392_v32 }
 0x222   : > { %7811 = vmatpush3.msra.mxu1 %v9423_v1  ;;  %7769 = vmatprep.subr.mxu0 %v9409_v17 }
 0x223   : > { %7812 = vmatprep.subr.mxu1 %v9435_v26  ;;  %7770 = vmatpush3.msra.mxu0 %v9409_v17  ;;  %v9698_v17 = vand.u32 4294901760, %v1860_v13 }
 0x224   : > { %7813 = vmatpush3.msra.mxu1 %v9435_v26  ;;  %7771 = vmatprep.subr.mxu0 %v9421_v50 }
 0x225   : > { %7814 = vmatprep.subr.mxu1 %v9447_v56  ;;  %7772 = vmatpush3.msra.mxu0 %v9421_v50 }
 0x226   : > { %7815 = vmatpush3.msra.mxu1 %v9447_v56  ;;  %7773 = vmatprep.subr.mxu0 %v9433_v22 }
 0x227   : > { %7816 = vmatprep.subr.mxu1 %v9460_v21  ;;  %7774 = vmatpush3.msra.mxu0 %v9433_v22 }
 0x228   : > { %7817 = vmatpush3.msra.mxu1 %v9460_v21  ;;  %7775 = vmatprep.subr.mxu0 %v9445_v47 }
 0x229   : > { %7818 = vmatprep.subr.mxu1 %v9472_v14  ;;  %7776 = vmatpush3.msra.mxu0 %v9445_v47 }
 0x22a   : > { %7819 = vmatpush3.msra.mxu1 %v9472_v14  ;;  %7777 = vmatprep.subr.mxu0 %v9458_v19 }
 0x22b   : > { %7821 = vmatmul.mubr.f32.vlgmr.msra.gmra.mxu1 %v9199_v61  ;;  %7858 = vmatprep.subr.mxu1 %v9291_v5 }
 0x22c   : > { %7778 = vmatpush3.msra.mxu0 %v9458_v19  ;;  %7859 = vmatpush3.msra.mxu1 %v9291_v5  ;;  %v9623_v5 = vand.u32 4294901760, %v1867_v60  ;;  %v1857_v19 = vld [vmem:[#allocation8 + $0x28] sm:$0xff] }
 0x22d   : > { %7890 = vmatprep.mubr.f32.mxu1 %v9176_v27  ;;  %7779 = vmatprep.subr.mxu0 %v9470_v59  ;;  %v9743_v62 = vand.u32 4294901760, %v1857_v19 }
 0x22e   : > { %7860 = vmatprep.subr.mxu1 %v9299_v8  ;;  %7780 = vmatpush3.msra.mxu0 %v9470_v59  ;;  %v9636_v28 = vsub.f32 %v1867_v60, %v9623_v5  ;;  %v1854_v60 = vld [vmem:[#allocation8 + $0x10] sm:$0xff] }
 0x22f   : > { %7861 = vmatpush3.msra.mxu1 %v9299_v8  ;;  %7781 = vmatprep.subr.mxu0 %v9482_v54  ;;  %v1866_v8 = vld [vmem:[#allocation8 + $0x70] sm:$0xff] }
 0x230   : > { %7862 = vmatprep.subr.mxu1 %v9308_v25  ;;  %7782 = vmatpush3.msra.mxu0 %v9482_v54  ;;  %v9654_v41 = vand.u32 4294901760, %v9636_v28 }
 0x231   : > { %7863 = vmatpush3.msra.mxu1 %v9308_v25  ;;  %7783 = vmatprep.subr.mxu0 %v9492_v39  ;;  %v9631_v25 = vand.u32 4294901760, %v1866_v8 }
 0x232   : > { %7864 = vmatprep.subr.mxu1 %v9317_v29  ;;  %7784 = vmatpush3.msra.mxu0 %v9492_v39  ;;  %v1980_v0 = vsub.f32 %v9636_v28, %v9654_v41  ;;  %v1856_v39 = vld [vmem:[#allocation8 + $0x20] sm:$0xff] }
 0x233   : > { %7865 = vmatpush3.msra.mxu1 %v9317_v29  ;;  %7786 = vmatmul.mubr.f32.vlgmr.msra.gmra.mxu0 %v9191_v20  ;;  %v1864_v29 = vld [vmem:[#allocation8 + $0x60] sm:$0xff]  ;;  %v9755_v4 = vand.u32 4294901760, %v1856_v39 }
 0x234   : > { %7823 = vmatprep.subr.mxu0 %v9322_v30  ;;  %7866 = vmatprep.subr.mxu1 %v9329_v34 }
 0x235   : > { %7824 = vmatpush3.msra.mxu0 %v9322_v30  ;;  %7855 = vmatprep.mubr.f32.mxu0 %v9176_v27  ;;  %v9640_v30 = vand.u32 4294901760, %v1865_v9 }
 0x236   : > { %7867 = vmatpush3.msra.mxu1 %v9329_v34  ;;  %7825 = vmatprep.subr.mxu0 %v9336_v40  ;;  %v9647_v34 = vsub.f32 %v1866_v8, %v9631_v25 }
 0x237   : > { %7868 = vmatprep.subr.mxu1 %v9345_v46  ;;  %7826 = vmatpush3.msra.mxu0 %v9336_v40  ;;  %v9649_v40 = vand.u32 4294901760, %v1864_v29 }
 0x238   : > { %7869 = vmatpush3.msra.mxu1 %v9345_v46  ;;  %7827 = vmatprep.subr.mxu0 %v9350_v51  ;;  %v9659_v46 = vsub.f32 %v1865_v9, %v9640_v30  ;;  %v9765_v9 = vsub.f32 %v1857_v19, %v9743_v62 }
 0x239   : > { %7870 = vmatprep.subr.mxu1 %v9355_v53  ;;  %7828 = vmatpush3.msra.mxu0 %v9350_v51  ;;  %v9661_v51 = vand.u32 4294901760, %v1863_v33 }
 0x23a   : > { %7871 = vmatpush3.msra.mxu1 %v9355_v53  ;;  %7829 = vmatprep.subr.mxu0 %v9364_v57  ;;  %v1861_v53 = vld [vmem:[#allocation8 + $0x48] sm:$0xff] }
 0x23b   : > { %7872 = vmatprep.subr.mxu1 %v9366_v58  ;;  %7830 = vmatpush3.msra.mxu0 %v9364_v57  ;;  %v9668_v57 = vand.u32 4294901760, %v9647_v34  ;;  %v9685_v32 = vsub.f32 %v1863_v33, %v9661_v51  ;;  %v1853_v33 = vld [vmem:[#allocation8 + $0x8] sm:$0xff] }
 0x23c   : > { %7873 = vmatpush3.msra.mxu1 %v9366_v58  ;;  %7831 = vmatprep.subr.mxu0 %v9378_v12  ;;  %v9671_v58 = vsub.f32 %v1864_v29, %v9649_v40  ;;  %v9767_v29 = vand.u32 4294901760, %v1855_v37 }
 0x23d   : > { %7874 = vmatprep.subr.mxu1 %v9385_v18  ;;  %7832 = vmatpush3.msra.mxu0 %v9378_v12  ;;  %v9677_v12 = vand.u32 4294901760, %v1862_v52 }
 0x23e   : > { %7875 = vmatpush3.msra.mxu1 %v9385_v18  ;;  %7833 = vmatprep.subr.mxu0 %v9396_v44  ;;  %v9682_v18 = vand.u32 4294901760, %v9659_v46 }
 0x23f   : > { %7876 = vmatprep.subr.mxu1 %v9398_v36  ;;  %7834 = vmatpush3.msra.mxu0 %v9396_v44  ;;  %v9687_v44 = vand.u32 4294901760, %v1861_v53  ;;  %v9703_v50 = vsub.f32 %v1862_v52, %v9677_v12 }
 0x240   : > { %7877 = vmatpush3.msra.mxu1 %v9398_v36  ;;  %7835 = vmatprep.subr.mxu0 %v9404_v3  ;;  %v1987_v36 = vsub.f32 %v9647_v34, %v9668_v57 }
 0x241   : > { %7878 = vmatprep.subr.mxu1 %v9411_v23  ;;  %7836 = vmatpush3.msra.mxu0 %v9404_v3  ;;  %v9696_v3 = vand.u32 4294901760, %v9671_v58  ;;  %v9713_v22 = vsub.f32 %v1861_v53, %v9687_v44 }
 0x242   : > { %7879 = vmatpush3.msra.mxu1 %v9411_v23  ;;  %7837 = vmatprep.subr.mxu0 %v9415_v24  ;;  %v1859_v23 = vld [vmem:[#allocation8 + $0x38] sm:$0xff]  ;;  %v1988_v47 = vand.u32 4294901760, %v1987_v36  ;;  %v1852_v36 = vld [vmem:[#allocation8] sm:$0xff] }
 0x243   : > { %7880 = vmatprep.subr.mxu1 %v9423_v1  ;;  %7838 = vmatpush3.msra.mxu0 %v9415_v24  ;;  %v1981_v24 = vand.u32 4294901760, %v1980_v0  ;;  %v9736_v54 = vand.u32 4294901760, %v9713_v22  ;;  %v9777_v0 = vsub.f32 %v1856_v39, %v9755_v4  ;;  %v9804_v39 = vand.u32 4294901760, %v1852_v36 }
 0x244   : > { %7881 = vmatpush3.msra.mxu1 %v9423_v1  ;;  %7839 = vmatprep.subr.mxu0 %v9430_v7  ;;  %v1994_v1 = vsub.f32 %v9659_v46, %v9682_v18 }
 0x245   : > { %7882 = vmatprep.subr.mxu1 %v9435_v26  ;;  %7840 = vmatpush3.msra.mxu0 %v9430_v7  ;;  %v9710_v7 = vand.u32 4294901760, %v9685_v32  ;;  %v2022_v35 = vsub.f32 %v9713_v22, %v9736_v54 }
 0x246   : > { %7883 = vmatpush3.msra.mxu1 %v9435_v26  ;;  %7841 = vmatprep.subr.mxu0 %v9442_v45  ;;  %v1858_v26 = vld [vmem:[#allocation8 + $0x30] sm:$0xff]  ;;  %v1995_v59 = vand.u32 4294901760, %v1994_v1  ;;  %v9787_v1 = vand.u32 4294901760, %v9765_v9 }
 0x247   : > { %7884 = vmatprep.subr.mxu1 %v9447_v56  ;;  %7842 = vmatpush3.msra.mxu0 %v9442_v45  ;;  %v9717_v45 = vand.u32 4294901760, %v1859_v23 }
 0x248   : > { %7885 = vmatpush3.msra.mxu1 %v9447_v56  ;;  %7843 = vmatprep.subr.mxu0 %v9455_v11  ;;  %v2001_v56 = vsub.f32 %v9671_v58, %v9696_v3 }
 0x249   : > { %7886 = vmatprep.subr.mxu1 %v9460_v21  ;;  %7844 = vmatpush3.msra.mxu0 %v9455_v11  ;;  %v9724_v11 = vsub.f32 %v1860_v13, %v9698_v17  ;;  %v9741_v15 = vsub.f32 %v1859_v23, %v9717_v45  ;;  %v9779_v13 = vand.u32 4294901760, %v1854_v60  ;;  %v10503_v23 = vld [vmem:[#allocation15_spill] sm:$0xff] }
 0x24a   : > { %7887 = vmatpush3.msra.mxu1 %v9460_v21  ;;  %7845 = vmatprep.subr.mxu0 %v9467_v55  ;;  %v9728_v21 = vand.u32 4294901760, %v9703_v50 }
 0x24b   : > { %7888 = vmatprep.subr.mxu1 %v9472_v14  ;;  %7846 = vmatpush3.msra.mxu0 %v9467_v55  ;;  %v9730_v55 = vand.u32 4294901760, %v1858_v26  ;;  %v9747_v31 = vand.u32 4294901760, %v9724_v11  ;;  %v9762_v8 = vand.u32 4294901760, %v9741_v15 }
 0x24c   : > { %7889 = vmatpush3.msra.mxu1 %v9472_v14  ;;  %7847 = vmatprep.subr.mxu0 %v9479_v38  ;;  %v2008_v14 = vsub.f32 %v9685_v32, %v9710_v7  ;;  %v2015_v42 = vsub.f32 %v9703_v50, %v9728_v21 }
 0x24d   : > { %7891 = vmatmul.mubr.f32.vlgmr.msra.gmra.mxu1 %v9182_v49  ;;  %7928 = vmatprep.subr.mxu1 %v1981_v24  ;;  %v9753_v6 = vsub.f32 %v1858_v26, %v9730_v55  ;;  %v9790_v26 = vsub.f32 %v1855_v37, %v9767_v29  ;;  %v2050_v37 = vsub.f32 %v9765_v9, %v9787_v1 }
 0x24e   : > { %7848 = vmatpush3.msra.mxu0 %v9479_v38  ;;  %7929 = vmatpush3.msra.mxu1 %v1981_v24  ;;  %v2002_v38 = vand.u32 4294901760, %v2001_v56  ;;  %v2016_v52 = vand.u32 4294901760, %v2015_v42  ;;  %v2036_v24 = vsub.f32 %v9741_v15, %v9762_v8 }
 0x24f   : > { %7960 = vmatprep.mubr.f32.mxu1 %v9176_v27  ;;  %7849 = vmatprep.subr.mxu0 %v9489_v2  ;;  %v9774_v53 = vand.u32 4294901760, %v9753_v6  ;;  %v9811_v42 = vand.u32 4294901760, %v9790_v26 }
 0x250   : > { %7930 = vmatprep.subr.mxu1 %v1988_v47  ;;  %7850 = vmatpush3.msra.mxu0 %v9489_v2  ;;  %v2009_v2 = vand.u32 4294901760, %v2008_v14  ;;  %v9802_v14 = vsub.f32 %v1854_v60, %v9779_v13 }
 0x251   : > { %7931 = vmatpush3.msra.mxu1 %v1988_v47  ;;  %7851 = vmatprep.subr.mxu0 %v9499_v63  ;;  %v9792_v47 = vand.u32 4294901760, %v1853_v33  ;;  %v2043_v19 = vsub.f32 %v9753_v6, %v9774_v53 }
 0x252   : > { %7932 = vmatprep.subr.mxu1 %v1995_v59  ;;  %7852 = vmatpush3.msra.mxu0 %v9499_v63  ;;  %v2029_v63 = vsub.f32 %v9724_v11, %v9747_v31 }
 0x253   : > { %7933 = vmatpush3.msra.mxu1 %v1995_v59  ;;  %7853 = vmatprep.subr.mxu0 %v9506_v43  ;;  %v9799_v59 = vand.u32 4294901760, %v9777_v0 }
 0x254   : > { %7934 = vmatprep.subr.mxu1 %v2002_v38  ;;  %7854 = vmatpush3.msra.mxu0 %v9506_v43  ;;  %v2023_v43 = vand.u32 4294901760, %v2022_v35  ;;  %v2030_v56 = vand.u32 4294901760, %v2029_v63  ;;  %v2044_v35 = vand.u32 4294901760, %v2043_v19  ;;  %v9821_v63 = vand.u32 4294901760, %v9802_v14 }
 0x255   : > { %7935 = vmatpush3.msra.mxu1 %v2002_v38  ;;  %7856 = vmatmul.mubr.f32.vlgmr.msra.gmra.mxu0 %v9182_v49  ;;  %v2037_v38 = vand.u32 4294901760, %v2036_v24  ;;  %v2057_v60 = vsub.f32 %v9777_v0, %v9799_v59 }
 0x256   : > { %7893 = vmatprep.subr.mxu0 %v9623_v5  ;;  %7936 = vmatprep.subr.mxu1 %v2009_v2  ;;  %v2071_v24 = vsub.f32 %v9802_v14, %v9821_v63 }
 0x257   : > { %7894 = vmatpush3.msra.mxu0 %v9623_v5  ;;  %7925 = vmatprep.mubr.f32.mxu0 %v10503_v23 }
 0x258   : > { %7937 = vmatpush3.msra.mxu1 %v2009_v2  ;;  %7895 = vmatprep.subr.mxu0 %v9631_v25  ;;  %v9814_v2 = vsub.f32 %v1853_v33, %v9792_v47  ;;  %v2051_v33 = vand.u32 4294901760, %v2050_v37  ;;  %v2072_v37 = vand.u32 4294901760, %v2071_v24 }
 0x259   : > { %7938 = vmatprep.subr.mxu1 %v2016_v52  ;;  %7896 = vmatpush3.msra.mxu0 %v9631_v25 }
 0x25a   : > { %7939 = vmatpush3.msra.mxu1 %v2016_v52  ;;  %7897 = vmatprep.subr.mxu0 %v9640_v30  ;;  %v9824_v52 = vsub.f32 %v1852_v36, %v9804_v39  ;;  %v9831_v23 = vand.u32 4294901760, %v9814_v2  ;;  %v2058_v36 = vand.u32 4294901760, %v2057_v60 }
 0x25b   : > { %7940 = vmatprep.subr.mxu1 %v2023_v43  ;;  %7898 = vmatpush3.msra.mxu0 %v9640_v30 }
 0x25c   : > { %7941 = vmatpush3.msra.mxu1 %v2023_v43  ;;  %7899 = vmatprep.subr.mxu0 %v9649_v40  ;;  %v2064_v43 = vsub.f32 %v9790_v26, %v9811_v42 }
 0x25d   : > { %7942 = vmatprep.subr.mxu1 %v2030_v56  ;;  %7900 = vmatpush3.msra.mxu0 %v9649_v40 }
 0x25e   : > { %7943 = vmatpush3.msra.mxu1 %v2030_v56  ;;  %7901 = vmatprep.subr.mxu0 %v9661_v51  ;;  %v9838_v56 = vand.u32 4294901760, %v9824_v52  ;;  %v2065_v19 = vand.u32 4294901760, %v2064_v43  ;;  %v9856_v43 = vld [vmem:[%s10469_s4] ss:$0 sm:$0xff] }
 0x25f   : > { %7944 = vmatprep.subr.mxu1 %v2037_v38  ;;  %7902 = vmatpush3.msra.mxu0 %v9661_v51 }
 0x260   : > { %7945 = vmatpush3.msra.mxu1 %v2037_v38  ;;  %7903 = vmatprep.subr.mxu0 %v9677_v12  ;;  %v2078_v38 = vsub.f32 %v9814_v2, %v9831_v23  ;;  %v2085_v60 = vsub.f32 %v9824_v52, %v9838_v56 }
 0x261   : > { %7946 = vmatprep.subr.mxu1 %v2044_v35  ;;  %7904 = vmatpush3.msra.mxu0 %v9677_v12 }
 0x262   : > { %7947 = vmatpush3.msra.mxu1 %v2044_v35  ;;  %7905 = vmatprep.subr.mxu0 %v9687_v44  ;;  %v2079_v35 = vand.u32 4294901760, %v2078_v38 }
 0x263   : > { %7948 = vmatprep.subr.mxu1 %v2051_v33  ;;  %7906 = vmatpush3.msra.mxu0 %v9687_v44 }
 0x264   : > { %7949 = vmatpush3.msra.mxu1 %v2051_v33  ;;  %7907 = vmatprep.subr.mxu0 %v9698_v17  ;;  %v2086_v33 = vand.u32 4294901760, %v2085_v60 }
 0x265   : > { %7950 = vmatprep.subr.mxu1 %v2058_v36  ;;  %7908 = vmatpush3.msra.mxu0 %v9698_v17 }
 0x266   : > { %7951 = vmatpush3.msra.mxu1 %v2058_v36  ;;  %7909 = vmatprep.subr.mxu0 %v9717_v45 }
 0x267   : > { %7952 = vmatprep.subr.mxu1 %v2065_v19  ;;  %7910 = vmatpush3.msra.mxu0 %v9717_v45 }
 0x268   : > { %7953 = vmatpush3.msra.mxu1 %v2065_v19  ;;  %7911 = vmatprep.subr.mxu0 %v9730_v55  ;;  %v7542_v19 = vpop.f32.mrf.mxu1 }
 0x269   : > { %7954 = vmatprep.subr.mxu1 %v2072_v37  ;;  %7912 = vmatpush3.msra.mxu0 %v9730_v55 }
 0x26a   : > { %7955 = vmatpush3.msra.mxu1 %v2072_v37  ;;  %7913 = vmatprep.subr.mxu0 %v9743_v62 }
 0x26b   : > { %7956 = vmatprep.subr.mxu1 %v2079_v35  ;;  %7914 = vmatpush3.msra.mxu0 %v9743_v62 }
 0x26c   : > { %7957 = vmatpush3.msra.mxu1 %v2079_v35  ;;  %7915 = vmatprep.subr.mxu0 %v9755_v4  ;;  %v7507_v36 = vpop.f32.mrf.mxu0 }
 0x26d   : > { %7958 = vmatprep.subr.mxu1 %v2086_v33  ;;  %7916 = vmatpush3.msra.mxu0 %v9755_v4  ;;  %v559_v24 = vadd.f32 %v7507_v36, %v9856_v43 }
 0x26e   : > { %7959 = vmatpush3.msra.mxu1 %v2086_v33  ;;  %7917 = vmatprep.subr.mxu0 %v9767_v29 }
 0x26f   : > { %7961 = vmatmul.mubr.f32.vlgmr.msra.gmra.mxu1 %v9182_v49  ;;  %7998 = vmatprep.subr.mxu1 %v9623_v5  ;;  %v9865_v38 = vadd.f32 %v7542_v19, %v559_v24 }
 0x270   : > { %7918 = vmatpush3.msra.mxu0 %v9767_v29  ;;  %7999 = vmatpush3.msra.mxu1 %v9623_v5 }
 0x271   : > { %8030 = vmatprep.mubr.f32.mxu1 %v9185_v16  ;;  %7919 = vmatprep.subr.mxu0 %v9779_v13  ;;  %v9925_v16 = vpop.f32.mrf.mxu1 }
 0x272   : > { %8000 = vmatprep.subr.mxu1 %v9631_v25  ;;  %7920 = vmatpush3.msra.mxu0 %v9779_v13 }
 0x273   : > { %8001 = vmatpush3.msra.mxu1 %v9631_v25  ;;  %7921 = vmatprep.subr.mxu0 %v9792_v47 }
 0x274   : > { %8002 = vmatprep.subr.mxu1 %v9640_v30  ;;  %7922 = vmatpush3.msra.mxu0 %v9792_v47 }
 0x275   : > { %8003 = vmatpush3.msra.mxu1 %v9640_v30  ;;  %7923 = vmatprep.subr.mxu0 %v9804_v39 }
 0x276   : > { %8004 = vmatprep.subr.mxu1 %v9649_v40  ;;  %7924 = vmatpush3.msra.mxu0 %v9804_v39 }
 0x277   : > { %8005 = vmatpush3.msra.mxu1 %v9649_v40  ;;  %7926 = vmatmul.mubr.f32.vlgmr.msra.gmra.mxu0 %v9208_v10 }
 0x278   : > { %7963 = vmatprep.subr.mxu0 %v9636_v28  ;;  %8006 = vmatprep.subr.mxu1 %v9661_v51 }
 0x279   : > { %7964 = vmatpush3.msra.mxu0 %v9636_v28  ;;  %7995 = vmatprep.mubr.f32.mxu0 %v9180_v48  ;;  %v548_v48 = vpop.f32.mrf.mxu0 }
 0x27a   : > { %8007 = vmatpush3.msra.mxu1 %v9661_v51  ;;  %7965 = vmatprep.subr.mxu0 %v9647_v34 }
 0x27b   : > { %8008 = vmatprep.subr.mxu1 %v9677_v12  ;;  %7966 = vmatpush3.msra.mxu0 %v9647_v34 }
 0x27c   : > { %8009 = vmatpush3.msra.mxu1 %v9677_v12  ;;  %7967 = vmatprep.subr.mxu0 %v9659_v46 }
 0x27d   : > { %8010 = vmatprep.subr.mxu1 %v9687_v44  ;;  %7968 = vmatpush3.msra.mxu0 %v9659_v46 }
 0x27e   : > { %8011 = vmatpush3.msra.mxu1 %v9687_v44  ;;  %7969 = vmatprep.subr.mxu0 %v9671_v58 }
 0x27f   : > { %8012 = vmatprep.subr.mxu1 %v9698_v17  ;;  %7970 = vmatpush3.msra.mxu0 %v9671_v58 }
 0x280   : > { %8013 = vmatpush3.msra.mxu1 %v9698_v17  ;;  %7971 = vmatprep.subr.mxu0 %v9685_v32 }
 0x281   : > { %8014 = vmatprep.subr.mxu1 %v9717_v45  ;;  %7972 = vmatpush3.msra.mxu0 %v9685_v32 }
 0x282   : > { %8015 = vmatpush3.msra.mxu1 %v9717_v45  ;;  %7973 = vmatprep.subr.mxu0 %v9703_v50 }
 0x283   : > { %8016 = vmatprep.subr.mxu1 %v9730_v55  ;;  %7974 = vmatpush3.msra.mxu0 %v9703_v50 }
 0x284   : > { %8017 = vmatpush3.msra.mxu1 %v9730_v55  ;;  %7975 = vmatprep.subr.mxu0 %v9713_v22 }
 0x285   : > { %8018 = vmatprep.subr.mxu1 %v9743_v62  ;;  %7976 = vmatpush3.msra.mxu0 %v9713_v22  ;;  %v7612_v34 = vpop.f32.mrf.mxu1 }
 0x286   : > { %8019 = vmatpush3.msra.mxu1 %v9743_v62  ;;  %7977 = vmatprep.subr.mxu0 %v9724_v11 }
 0x287   : > { %8020 = vmatprep.subr.mxu1 %v9755_v4  ;;  %7978 = vmatpush3.msra.mxu0 %v9724_v11  ;;  %v6948_v11 = vld [vmem:[%s10471_s6] ss:$0 sm:$0xff] }
 0x288   : > { %8021 = vmatpush3.msra.mxu1 %v9755_v4  ;;  %7979 = vmatprep.subr.mxu0 %v9741_v15 }
 0x289   : > { %8022 = vmatprep.subr.mxu1 %v9767_v29  ;;  %7980 = vmatpush3.msra.mxu0 %v9741_v15 }
 0x28a   : > { %8023 = vmatpush3.msra.mxu1 %v9767_v29  ;;  %7981 = vmatprep.subr.mxu0 %v9753_v6 }
 0x28b   : > { %8024 = vmatprep.subr.mxu1 %v9779_v13  ;;  %7982 = vmatpush3.msra.mxu0 %v9753_v6 }
 0x28c   : > { %8025 = vmatpush3.msra.mxu1 %v9779_v13  ;;  %7983 = vmatprep.subr.mxu0 %v9765_v9 }
 0x28d   : > { %8026 = vmatprep.subr.mxu1 %v9792_v47  ;;  %7984 = vmatpush3.msra.mxu0 %v9765_v9  ;;  %v7577_v10 = vpop.f32.mrf.mxu0 }
 0x28e   : > { %8027 = vmatpush3.msra.mxu1 %v9792_v47  ;;  %7985 = vmatprep.subr.mxu0 %v9777_v0  ;;  %v827_v28 = vadd.f32 %v7577_v10, %v9865_v38 }
 0x28f   : > { %8028 = vmatprep.subr.mxu1 %v9804_v39  ;;  %7986 = vmatpush3.msra.mxu0 %v9777_v0 }
 0x290   : > { %8029 = vmatpush3.msra.mxu1 %v9804_v39  ;;  %7987 = vmatprep.subr.mxu0 %v9790_v26  ;;  %v9936_v46 = vadd.f32 %v7612_v34, %v827_v28 }
 0x291   : > { %8031 = vmatmul.mubr.f32.vlgmr.msra.gmra.mxu1 %v9199_v61  ;;  %8068 = vmatprep.subr.mxu1 %v9623_v5 }
 0x292   : > { %7988 = vmatpush3.msra.mxu0 %v9790_v26  ;;  %8069 = vmatpush3.msra.mxu1 %v9623_v5 }
 0x293   : > { %8100 = vmatprep.mubr.f32.mxu1 %v9176_v27  ;;  %7989 = vmatprep.subr.mxu0 %v9802_v14 }
 0x294   : > { %8070 = vmatprep.subr.mxu1 %v9631_v25  ;;  %7990 = vmatpush3.msra.mxu0 %v9802_v14 }
 0x295   : > { %8071 = vmatpush3.msra.mxu1 %v9631_v25  ;;  %7991 = vmatprep.subr.mxu0 %v9814_v2  ;;  %v915_v25 = vpop.f32.mrf.mxu1 }
 0x296   : > { %8072 = vmatprep.subr.mxu1 %v9640_v30  ;;  %7992 = vmatpush3.msra.mxu0 %v9814_v2 }
 0x297   : > { %8073 = vmatpush3.msra.mxu1 %v9640_v30  ;;  %7993 = vmatprep.subr.mxu0 %v9824_v52 }
 0x298   : > { %8074 = vmatprep.subr.mxu1 %v9649_v40  ;;  %7994 = vmatpush3.msra.mxu0 %v9824_v52 }
 0x299   : > { %8075 = vmatpush3.msra.mxu1 %v9649_v40  ;;  %7996 = vmatmul.mubr.f32.vlgmr.msra.gmra.mxu0 %v9191_v20  ;;  %v819_v20 = vpop.f32.mrf.mxu0 }
 0x29a   : > { %8033 = vmatprep.subr.mxu0 %v9654_v41  ;;  %8076 = vmatprep.subr.mxu1 %v9661_v51 }
 0x29b   : > { %8034 = vmatpush3.msra.mxu0 %v9654_v41  ;;  %8065 = vmatprep.mubr.f32.mxu0 %v9176_v27  ;;  %v549_v27 = vadd.f32 %v9856_v43, %v548_v48 }
 0x29c   : > { %8077 = vmatpush3.msra.mxu1 %v9661_v51  ;;  %8035 = vmatprep.subr.mxu0 %v9668_v57 }
 0x29d   : > { %8078 = vmatprep.subr.mxu1 %v9677_v12  ;;  %8036 = vmatpush3.msra.mxu0 %v9668_v57  ;;  %v710_v61 = vadd.f32 %v9925_v16, %v549_v27  ;;  %v6949_v27 = vld [vmem:[%s10473_s8] ss:$0 sm:$0xff] }
 0x29e   : > { %8079 = vmatpush3.msra.mxu1 %v9677_v12  ;;  %8037 = vmatprep.subr.mxu0 %v9682_v18 }
 0x29f   : > { %8080 = vmatprep.subr.mxu1 %v9687_v44  ;;  %8038 = vmatpush3.msra.mxu0 %v9682_v18  ;;  %v820_v5 = vadd.f32 %v819_v20, %v710_v61 }
 0x2a0   : > { %8081 = vmatpush3.msra.mxu1 %v9687_v44  ;;  %8039 = vmatprep.subr.mxu0 %v9696_v3 }
 0x2a1   : > { %8082 = vmatprep.subr.mxu1 %v9698_v17  ;;  %8040 = vmatpush3.msra.mxu0 %v9696_v3  ;;  %v916_v51 = vadd.f32 %v915_v25, %v820_v5 }
 0x2a2   : > { %8083 = vmatpush3.msra.mxu1 %v9698_v17  ;;  %8041 = vmatprep.subr.mxu0 %v9710_v7 }
 0x2a3   : > { %8084 = vmatprep.subr.mxu1 %v9717_v45  ;;  %8042 = vmatpush3.msra.mxu0 %v9710_v7 }
 0x2a4   : > { %8085 = vmatpush3.msra.mxu1 %v9717_v45  ;;  %8043 = vmatprep.subr.mxu0 %v9728_v21 }
 0x2a5   : > { %8086 = vmatprep.subr.mxu1 %v9730_v55  ;;  %8044 = vmatpush3.msra.mxu0 %v9728_v21 }
 0x2a6   : > { %8087 = vmatpush3.msra.mxu1 %v9730_v55  ;;  %8045 = vmatprep.subr.mxu0 %v9736_v54 }
 0x2a7   : > { %8088 = vmatprep.subr.mxu1 %v9743_v62  ;;  %8046 = vmatpush3.msra.mxu0 %v9736_v54  ;;  %v7682_v30 = vpop.f32.mrf.mxu1 }
 0x2a8   : > { %8089 = vmatpush3.msra.mxu1 %v9743_v62  ;;  %8047 = vmatprep.subr.mxu0 %v9747_v31 }
 0x2a9   : > { %8090 = vmatprep.subr.mxu1 %v9755_v4  ;;  %8048 = vmatpush3.msra.mxu0 %v9747_v31  ;;  %v1135_v18 = vpop.f32.mrf.mxu1 }
 0x2aa   : > { %8091 = vmatpush3.msra.mxu1 %v9755_v4  ;;  %8049 = vmatprep.subr.mxu0 %v9762_v8 }
 0x2ab   : > { %8092 = vmatprep.subr.mxu1 %v9767_v29  ;;  %8050 = vmatpush3.msra.mxu0 %v9762_v8 }
 0x2ac   : > { %8093 = vmatpush3.msra.mxu1 %v9767_v29  ;;  %8051 = vmatprep.subr.mxu0 %v9774_v53 }
 0x2ad   : > { %8094 = vmatprep.subr.mxu1 %v9779_v13  ;;  %8052 = vmatpush3.msra.mxu0 %v9774_v53 }
 0x2ae   : > { %8095 = vmatpush3.msra.mxu1 %v9779_v13  ;;  %8053 = vmatprep.subr.mxu0 %v9787_v1 }
 0x2af   : > { %8096 = vmatprep.subr.mxu1 %v9792_v47  ;;  %8054 = vmatpush3.msra.mxu0 %v9787_v1  ;;  %v7647_v40 = vpop.f32.mrf.mxu0 }
 0x2b0   : > { %8097 = vmatpush3.msra.mxu1 %v9792_v47  ;;  %8055 = vmatprep.subr.mxu0 %v9799_v59  ;;  %v1049_v41 = vadd.f32 %v7647_v40, %v9936_v46 }
 0x2b1   : > { %8098 = vmatprep.subr.mxu1 %v9804_v39  ;;  %8056 = vmatpush3.msra.mxu0 %v9799_v59  ;;  %v1042_v57 = vpop.f32.mrf.mxu0 }
 0x2b2   : > { %8099 = vmatpush3.msra.mxu1 %v9804_v39  ;;  %8057 = vmatprep.subr.mxu0 %v9811_v42  ;;  %v10009_v58 = vadd.f32 %v7682_v30, %v1049_v41  ;;  %v1043_v12 = vadd.f32 %v1042_v57, %v916_v51 }
 0x2b3   : > { %8101 = vmatmul.mubr.f32.vlgmr.msra.gmra.mxu1 %v9182_v49  ;;  %8058 = vmatpush3.msra.mxu0 %v9811_v42 }
 0x2b4   : > { %8059 = vmatprep.subr.mxu0 %v9821_v63  ;;  %v10014_v32 = vadd.f32 %v1135_v18, %v1043_v12  ;;  %v2566_v8 = vsel %vm2561_vm0, %v10009_v58, 0 }
 0x2b5   : > { %8060 = vmatpush3.msra.mxu0 %v9821_v63  ;;  %v2651_v0 = vand.u32 4294901760, %v2566_v8 }
 0x2b6   : > { %8061 = vmatprep.subr.mxu0 %v9831_v23  ;;  %v2563_v44 = vsel %vm2561_vm0, %v10014_v32, 0 }
 0x2b7   : > { %8062 = vmatpush3.msra.mxu0 %v9831_v23  ;;  %v10021_v3 = vand.u32 4294901760, %v2563_v44  ;;  %v2652_v39 = vsub.f32 %v2566_v8, %v2651_v0 }
 0x2b8   : > { %8063 = vmatprep.subr.mxu0 %v9838_v56 }
 0x2b9   : > { %8064 = vmatpush3.msra.mxu0 %v9838_v56  ;;  %8114 = vmatprep.mubr.f32.mxu1 %v10021_v3  ;;  %v10027_v17 = vsub.f32 %v2563_v44, %v10021_v3  ;;  %v2653_v60 = vand.u32 4294901760, %v2652_v39 }
 0x2ba   : > { %8066 = vmatmul.mubr.f32.vlgmr.msra.gmra.mxu0 %v9182_v49 }
 0x2bb   : > { %v2643_v50 = vand.u32 4294901760, %v10027_v17  ;;  %v2654_v24 = vsub.f32 %v2652_v39, %v2653_v60 }
 0x2bd   : > { %v2644_v7 = vsub.f32 %v10027_v17, %v2643_v50  ;;  %v2655_v16 = vand.u32 4294901760, %v2654_v24 }
 0x2bf   : > { %v2645_v22 = vand.u32 4294901760, %v2644_v7 }
 0x2c1   : > { %8107 = vmatprep.mubr.f32.mxu0 %v2645_v22 }
 0x2c9   : > { %v7752_v21 = vpop.f32.mrf.mxu1 }
 0x2cb   : > { %v1416_v31 = vpop.f32.mrf.mxu1 }
 0x2d1   : > { %v7717_v45 = vpop.f32.mrf.mxu0 }
 0x2d2   : > { %v1266_v54 = vadd.f32 %v7717_v45, %v6948_v11 }
 0x2d3   : > { %v1255_v55 = vpop.f32.mrf.mxu0 }
 0x2d4   : > { %v1256_v62 = vadd.f32 %v6948_v11, %v1255_v55  ;;  %v1423_v49 = vadd.f32 %v7752_v21, %v1266_v54 }
 0x2d6   : > { %v1417_v29 = vadd.f32 %v1416_v31, %v1256_v62 }
 0x2eb   : > { %v7822_v6 = vpop.f32.mrf.mxu1 }
 0x2ed   : > { %v1622_v13 = vpop.f32.mrf.mxu1 }
 0x2f3   : > { %v7787_v15 = vpop.f32.mrf.mxu0 }
 0x2f4   : > { %v1534_v9 = vadd.f32 %v7787_v15, %v1423_v49 }
 0x2f5   : > { %v1526_v4 = vpop.f32.mrf.mxu0 }
 0x2f6   : > { %v1527_v53 = vadd.f32 %v1526_v4, %v1417_v29  ;;  %v1631_v1 = vadd.f32 %v7822_v6, %v1534_v9 }
 0x2f8   : > { %v1623_v14 = vadd.f32 %v1622_v13, %v1527_v53 }
 0x30d   : > { %v7892_v26 = vpop.f32.mrf.mxu1 }
 0x30f   : > { %v1842_v52 = vpop.f32.mrf.mxu1 }
 0x315   : > { %v7857_v47 = vpop.f32.mrf.mxu0 }
 0x316   : > { %v1756_v59 = vadd.f32 %v7857_v47, %v1631_v1 }
 0x317   : > { %v1749_v42 = vpop.f32.mrf.mxu0 }
 0x318   : > { %v10039_v2 = vadd.f32 %v7892_v26, %v1756_v59  ;;  %v1750_v63 = vadd.f32 %v1749_v42, %v1623_v14 }
 0x31a   : > { %v2572_v23 = vsel %vm2561_vm0, %v10039_v2, 0  ;;  %v10043_v56 = vadd.f32 %v1842_v52, %v1750_v63 }
 0x31b   : > { %v2603_v37 = vand.u32 4294901760, %v2572_v23 }
 0x31c   : > { %v2569_v35 = vsel %vm2561_vm0, %v10043_v56, 0 }
 0x31d   : > { %v2606_v33 = vand.u32 4294901760, %v2569_v35  ;;  %8103 = vmatprep.subr.mxu0 %v2603_v37  ;;  %v2691_v43 = vsub.f32 %v2572_v23, %v2603_v37 }
 0x31e   : > { %8104 = vmatpush3.xpose.msra.mxu0 %v2603_v37 }
 0x31f   : > { %v2698_v36 = vsub.f32 %v2569_v35, %v2606_v33  ;;  %8105 = vmatprep.subr.mxu0 %v2606_v33  ;;  %v2692_v19 = vand.u32 4294901760, %v2691_v43 }
 0x321   : > { %v2693_v38 = vsub.f32 %v2691_v43, %v2692_v19  ;;  %v2699_v48 = vand.u32 4294901760, %v2698_v36 }
 0x322   : > { %8106 = vmatpush3.xpose.msra.mxu0 %v2606_v33 }
 0x323   : > { %8117 = vmatprep.subr.mxu0 %v2691_v43  ;;  %v2694_v10 = vand.u32 4294901760, %v2693_v38  ;;  %v2700_v28 = vsub.f32 %v2698_v36, %v2699_v48 }
 0x325   : > { %8108 = vmatmul.mubr.f32.vlgmr.msra.gmra.mxu0 %v2655_v16  ;;  %8110 = vmatprep.subr.mxu1 %v2694_v10  ;;  %v2701_v34 = vand.u32 4294901760, %v2700_v28 }
 0x326   : > { %8111 = vmatpush3.xpose.msra.mxu1 %v2694_v10  ;;  %8118 = vmatpush3.xpose.msra.mxu0 %v2691_v43 }
 0x327   : > { %8121 = vmatprep.mubr.f32.mxu0 %v10027_v17  ;;  %8112 = vmatprep.subr.mxu1 %v2701_v34 }
 0x328   : > { %8119 = vmatprep.subr.mxu0 %v2698_v36 }
 0x32a   : > { %8113 = vmatpush3.xpose.msra.mxu1 %v2701_v34  ;;  %8120 = vmatpush3.xpose.msra.mxu0 %v2698_v36 }
 0x32b   : > { %8124 = vmatprep.subr.mxu1 %v2603_v37  ;;  %8131 = vmatprep.subr.mxu0 %v2692_v19 }
 0x32d   : > { %8115 = vmatmul.mubr.f32.vlgmr.msra.gmra.mxu1 %v2651_v0  ;;  %8122 = vmatmul.mubr.f32.vlgmr.msra.gmra.mxu0 %v2652_v39 }
 0x32e   : > { %8125 = vmatpush3.xpose.msra.mxu1 %v2603_v37  ;;  %8128 = vmatprep.mubr.f32.mxu1 %v2643_v50 }
 0x32f   : > { %8132 = vmatpush3.xpose.msra.mxu0 %v2692_v19  ;;  %8135 = vmatprep.mubr.f32.mxu0 %v10021_v3  ;;  %v7962_v20 = vpop.f32.mrf.mxu1 }
 0x330   : > { %8126 = vmatprep.subr.mxu1 %v2606_v33  ;;  %8133 = vmatprep.subr.mxu0 %v2699_v48 }
 0x331   : > { %v2123_v40 = vpop.f32.mrf.mxu1 }
 0x332   : > { %8127 = vmatpush3.xpose.msra.mxu1 %v2606_v33 }
 0x333   : > { %8134 = vmatpush3.xpose.msra.mxu0 %v2699_v48  ;;  %8138 = vmatprep.subr.mxu1 %v2603_v37 }
 0x335   : > { %8129 = vmatmul.mubr.f32.vlgmr.msra.gmra.mxu1 %v2653_v60 }
 0x336   : > { %8136 = vmatmul.mubr.f32.vlgmr.msra.gmra.mxu0 %v2651_v0  ;;  %8139 = vmatpush3.xpose.msra.mxu1 %v2603_v37 }
 0x337   : > { %8142 = vmatprep.mubr.f32.mxu1 %v10021_v3  ;;  %8140 = vmatprep.subr.mxu1 %v2606_v33  ;;  %v7927_v46 = vpop.f32.mrf.mxu0 }
 0x338   : > { %v1973_v5 = vadd.f32 %v7927_v46, %v6949_v27 }
 0x339   : > { %v1962_v61 = vpop.f32.mrf.mxu0 }
 0x33a   : > { %8141 = vmatpush3.xpose.msra.mxu1 %v2606_v33  ;;  %v1963_v30 = vadd.f32 %v6949_v27, %v1962_v61  ;;  %v2130_v41 = vadd.f32 %v7962_v20, %v1973_v5 }
 0x33c   : > { %v2124_v18 = vadd.f32 %v2123_v40, %v1963_v30 }
 0x33d   : > { %8143 = vmatmul.mubr.f32.vlgmr.msra.gmra.mxu1 %v2651_v0 }
 0x351   : > { %v8032_v51 = vpop.f32.mrf.mxu1 }
 0x353   : > { %v2329_v3 = vpop.f32.mrf.mxu1 }
 0x359   : > { %v7997_v25 = vpop.f32.mrf.mxu0 }
 0x35a   : > { %v2241_v12 = vadd.f32 %v7997_v25, %v2130_v41 }
 0x35b   : > { %v2233_v57 = vpop.f32.mrf.mxu0 }
 0x35c   : > { %v2234_v44 = vadd.f32 %v2233_v57, %v2124_v18  ;;  %v2338_v17 = vadd.f32 %v8032_v51, %v2241_v12 }
 0x35e   : > { %v2330_v45 = vadd.f32 %v2329_v3, %v2234_v44 }
 0x373   : > { %v8102_v50 = vpop.f32.mrf.mxu1 }
 0x375   : > { %v2549_v54 = vpop.f32.mrf.mxu1 }
 0x37a   : > { %v8067_v7 = vpop.f32.mrf.mxu0 }
 0x37b   : > { %v2463_v22 = vadd.f32 %v8067_v7, %v2338_v17 }
 0x37c   : > { %v2456_v11 = vpop.f32.mrf.mxu0 }
 0x37d   : > { %v2556_v21 = vadd.f32 %v8102_v50, %v2463_v22  ;;  %v2457_v55 = vadd.f32 %v2456_v11, %v2330_v45 }
 0x37f   : > { %v10055_v15 = vmax.f32 %v2556_v21, 0.0  ;;  %v2550_v62 = vadd.f32 %v2549_v54, %v2457_v55 }
 0x381   : > { %v10058_v31 = vand.u32 4294901760, %v10055_v15  ;;  %v10060_v49 = vmax.f32 %v2550_v62, 0.0 }
 0x383   : > { %v10063_v6 = vand.u32 4294901760, %v10060_v49  ;;  %8145 = vmatprep.subr.mxu0 %v10058_v31  ;;  %v10068_v4 = vsub.f32 %v10055_v15, %v10058_v31 }
 0x384   : > { %8146 = vmatpush3.msra.mxu0 %v10058_v31 }
 0x385   : > { %8147 = vmatprep.subr.mxu0 %v10063_v6  ;;  %v10073_v8 = vand.u32 4294901760, %v10068_v4  ;;  %v10077_v9 = vsub.f32 %v10060_v49, %v10063_v6 }
 0x386   : > { %8148 = vmatpush3.msra.mxu0 %v10063_v6 }
 0x387   : > { %8159 = vmatprep.subr.mxu0 %v10068_v4  ;;  %v3226_v29 = vsub.f32 %v10068_v4, %v10073_v8  ;;  %v10084_v53 = vand.u32 4294901760, %v10077_v9 }
 0x389   : > { %v3227_v0 = vand.u32 4294901760, %v3226_v29  ;;  %v3233_v13 = vsub.f32 %v10077_v9, %v10084_v53 }
 0x38b   : > { %8152 = vmatprep.subr.mxu1 %v3227_v0  ;;  %v3234_v1 = vand.u32 4294901760, %v3233_v13 }
 0x38c   : > { %8153 = vmatpush3.msra.mxu1 %v3227_v0 }
 0x38d   : > { %8154 = vmatprep.subr.mxu1 %v3234_v1 }
 0x38e   : > { %8155 = vmatpush3.msra.mxu1 %v3234_v1 }
 0x38f   : > { %8166 = vmatprep.subr.mxu1 %v10058_v31 }
 0x3e5   : > { %v8109_v26 = vpop.f32.mrf.mxu0 }
 0x3e7   : > { %v2647_v59 = vpop.f32.mrf.mxu0 }
 0x3ed   : > { %v8116_v47 = vpop.f32.mrf.mxu1  ;;  %v8123_v42 = vpop.f32.mrf.mxu0 }
 0x3ee   : > { %v2745_v39 = vadd.f32 %v8116_v47, %v8109_v26 }
 0x3ef   : > { %v2738_v14 = vpop.f32.mrf.mxu1  ;;  %v2820_v37 = vpop.f32.mrf.mxu0 }
 0x3f0   : > { %v2739_v63 = vadd.f32 %v2738_v14, %v2647_v59  ;;  %v2828_v23 = vadd.f32 %v8123_v42, %v2745_v39 }
 0x3f2   : > { %v2821_v35 = vadd.f32 %v2820_v37, %v2739_v63 }
 0x3f5   : > { %v8130_v52 = vpop.f32.mrf.mxu1 }
 0x3f6   : > { %v2911_v33 = vadd.f32 %v8130_v52, %v2828_v23  ;;  %v8137_v43 = vpop.f32.mrf.mxu0 }
 0x3f7   : > { %v2902_v60 = vpop.f32.mrf.mxu1 }
 0x3f8   : > { %v2903_v36 = vadd.f32 %v2902_v60, %v2821_v35  ;;  %v2994_v24 = vadd.f32 %v8137_v43, %v2911_v33  ;;  %v2987_v19 = vpop.f32.mrf.mxu0 }
 0x3fa   : > { %v2988_v48 = vadd.f32 %v2987_v19, %v2903_v36 }
 0x3fd   : > { %v8144_v38 = vpop.f32.mrf.mxu1 }
 0x3fe   : > { %v3073_v16 = vadd.f32 %v8144_v38, %v2994_v24 }
 0x3ff   : > { %v3066_v10 = vpop.f32.mrf.mxu1 }
 0x400   : > { %v3077_v28 = vmul.f32 0.17677669, %v3073_v16  ;;  %v3067_v34 = vadd.f32 %v3066_v10, %v2988_v48 }
 0x402   : > { %v3076_v46 = vmul.f32 0.17677669, %v3067_v34  ;;  %v3082_v27 = vsel %vm3078_vm1, %v3077_v28, -inf }
 0x403   : > { %3083 = vmax.xlane.f32.xlu1 %v3082_v27 }
 0x404   : > { %v3079_v20 = vsel %vm3078_vm1, %v3076_v46, -inf }
 0x405   : > { %3080 = vmax.xlane.f32.xlu0 %v3079_v20 }
 0x48c   : > { %v3084_v61 = vpop.xlane.xlu1 %3083 }
 0x48d   : > { %v3086_v5 = vsub.f32 %v3077_v28, %v3084_v61 }
 0x48e   : > { %v3081_v25 = vpop.xlane.xlu0 %3080 }
 0x48f   : > { %v3089_v30 = vmul.f32 1.442695, %v3086_v5  ;;  %v3085_v40 = vsub.f32 %v3076_v46, %v3081_v25 }
 0x491   : > { %8527 = vpow2.f32 %v3089_v30  ;;  %v3087_v41 = vmul.f32 1.442695, %v3085_v40 }
 0x493   : > { %8529 = vpow2.f32 %v3087_v41 }
 0x49e   : > { %v8528_v51 = vpop.eup %8527 }
 0x49f   : > { %v3094_v57 = vsel %vm3078_vm1, %v8528_v51, 0.0 }
 0x4a0   : > { %v8530_v12 = vpop.eup %8529  ;;  %3095 = vadd.xlane.f32.xlu1 %v3094_v57 }
 0x4a1   : > { %v3091_v18 = vsel %vm3078_vm1, %v8530_v12, 0.0 }
 0x4a2   : > { %3092 = vadd.xlane.f32.xlu0 %v3091_v18 }
 0x4b1   : > { %3615 = vrot.lane.b32.xlu1 %v10043_v56, %s8745_s19 }
 0x4b5   : > { %3611 = vrot.lane.b32.xlu1 %v10014_v32, %s8745_s19 }
 0x4b8   : > { %3617 = vrot.lane.b32.xlu0 %v10039_v2, %s8745_s19 }
 0x4b9   : > { %3613 = vrot.lane.b32.xlu1 %v10009_v58, %s8745_s19 }
 0x529   : > { %v3096_v44 = vpop.xlane.xlu1 %3095 }
 0x52a   : > { %8531 = vrcp.f32 %v3096_v44 }
 0x52b   : > { %v3093_v3 = vpop.xlane.xlu0 %3092 }
 0x52c   : > { %8533 = vrcp.f32 %v3093_v3 }
 0x52d   : > { %v3616_v50 = vpop.permute.xlu1 %3615 }
 0x52e   : > { %v3623_v22 = vsel %vm2561_vm0, %v3616_v50, 0 }
 0x52f   : > { %v3618_v17 = vpop.permute.xlu0 %3617  ;;  %v10105_v54 = vand.u32 4294901760, %v3623_v22 }
 0x530   : > { %v3625_v7 = vsel %vm2561_vm0, %v3618_v17, 0 }
 0x531   : > { %v10103_v45 = vand.u32 4294901760, %v3625_v7  ;;  %v3612_v1 = vpop.permute.xlu1 %3611  ;;  %v10113_v47 = vsub.f32 %v3623_v22, %v10105_v54 }
 0x532   : > { %v3619_v42 = vsel %vm2561_vm0, %v3612_v1, 0 }
 0x533   : > { %v10108_v62 = vsub.f32 %v3625_v7, %v10103_v45  ;;  %v10121_v37 = vand.u32 4294901760, %v10113_v47  ;;  %v10123_v60 = vand.u32 4294901760, %v3619_v42 }
 0x535   : > { %v10116_v39 = vand.u32 4294901760, %v10108_v62  ;;  %v3614_v35 = vpop.permute.xlu1 %3613  ;;  %v3753_v38 = vsub.f32 %v10113_v47, %v10121_v37  ;;  %v3695_v48 = vsub.f32 %v3619_v42, %v10123_v60 }
 0x536   : > { %v3621_v24 = vsel %vm2561_vm0, %v3614_v35, 0 }
 0x537   : > { %v8532_v11 = vpop.eup %8531  ;;  %v3746_v33 = vsub.f32 %v10108_v62, %v10116_v39  ;;  %v3704_v28 = vand.u32 4294901760, %v3621_v24  ;;  %v3696_v34 = vand.u32 4294901760, %v3695_v48 }
 0x538   : > { %v3100_v21 = vmul.f32 %v8532_v11, %v8528_v51 }
 0x539   : > { %v8534_v55 = vpop.eup %8533  ;;  %v3747_v16 = vand.u32 4294901760, %v3746_v33  ;;  %v3705_v46 = vsub.f32 %v3621_v24, %v3704_v28 }
 0x53a   : > { %v3098_v29 = vmul.f32 %v8534_v55, %v8530_v12  ;;  %v3105_v0 = vsel %vm3078_vm1, %v3100_v21, 0 }
 0x53b   : > { %v3184_v13 = vand.u32 4294901760, %v3105_v0 }
 0x53c   : > { %v3102_v26 = vsel %vm3078_vm1, %v3098_v29, 0 }
 0x53d   : > { %v3174_v59 = vand.u32 4294901760, %v3102_v26  ;;  %v3185_v14 = vsub.f32 %v3105_v0, %v3184_v13 }
 0x53f   : > { %8156 = vmatprep.mubr.f32.mxu1 %v3174_v59  ;;  %v3175_v63 = vsub.f32 %v3102_v26, %v3174_v59  ;;  %v3186_v52 = vand.u32 4294901760, %v3185_v14 }
 0x540   : > { %8157 = vmatmul.mubr.f32.vlgmr.msra.gmra.mxu1 %v3184_v13 }
 0x541   : > { %8167 = vmatpush3.msra.mxu1 %v10058_v31  ;;  %v3176_v23 = vand.u32 4294901760, %v3175_v63  ;;  %v3187_v43 = vsub.f32 %v3185_v14, %v3186_v52 }
 0x542   : > { %8168 = vmatprep.subr.mxu1 %v10063_v6 }
 0x543   : > { %8169 = vmatpush3.msra.mxu1 %v10063_v6  ;;  %8170 = vmatprep.mubr.f32.mxu1 %v3176_v23  ;;  %v3177_v36 = vsub.f32 %v3175_v63, %v3176_v23  ;;  %v3188_v10 = vand.u32 4294901760, %v3187_v43 }
 0x544   : > { %8180 = vmatprep.subr.mxu1 %v10058_v31  ;;  %8171 = vmatmul.mubr.f32.vlgmr.msra.gmra.mxu1 %v3186_v52 }
 0x545   : > { %8181 = vmatpush3.msra.mxu1 %v10058_v31  ;;  %8184 = vmatprep.mubr.f32.mxu1 %v3174_v59  ;;  %v3178_v19 = vand.u32 4294901760, %v3177_v36  ;;  %v3754_v31 = vand.u32 4294901760, %v3753_v38 }
 0x546   : > { %8182 = vmatprep.subr.mxu1 %v10063_v6 }
 0x547   : > { %8183 = vmatpush3.msra.mxu1 %v10063_v6  ;;  %8149 = vmatprep.mubr.f32.mxu0 %v3178_v19  ;;  %v3697_v6 = vsub.f32 %v3695_v48, %v3696_v34 }
 0x548   : > { %8194 = vmatprep.subr.mxu1 %v3747_v16  ;;  %8150 = vmatmul.mubr.f32.vlgmr.msra.gmra.mxu0 %v3188_v10 }
 0x549   : > { %8160 = vmatpush3.msra.mxu0 %v10068_v4  ;;  %8185 = vmatmul.mubr.f32.vlgmr.msra.gmra.mxu1 %v3184_v13  ;;  %v3706_v4 = vand.u32 4294901760, %v3705_v46 }
 0x54a   : > { %8195 = vmatpush3.xpose.msra.mxu1 %v3747_v16  ;;  %8161 = vmatprep.subr.mxu0 %v10077_v9 }
 0x54b   : > { %8163 = vmatprep.mubr.f32.mxu0 %v3175_v63  ;;  %8196 = vmatprep.subr.mxu1 %v3754_v31 }
 0x54c   : > { %8198 = vmatprep.mubr.f32.mxu1 %v10123_v60  ;;  %8162 = vmatpush3.msra.mxu0 %v10077_v9  ;;  %v3698_v9 = vand.u32 4294901760, %v3697_v6 }
 0x54d   : > { %8173 = vmatprep.subr.mxu0 %v10073_v8  ;;  %8164 = vmatmul.mubr.f32.vlgmr.msra.gmra.mxu0 %v3185_v14 }
 0x54e   : > { %8174 = vmatpush3.msra.mxu0 %v10073_v8  ;;  %8197 = vmatpush3.xpose.msra.mxu1 %v3754_v31  ;;  %v3707_v8 = vsub.f32 %v3705_v46, %v3706_v4 }
 0x54f   : > { %8175 = vmatprep.subr.mxu0 %v10084_v53  ;;  %8177 = vmatprep.mubr.f32.mxu0 %v3174_v59 }
 0x550   : > { %8208 = vmatprep.subr.mxu1 %v10103_v45  ;;  %8176 = vmatpush3.msra.mxu0 %v10084_v53  ;;  %v3708_v53 = vand.u32 4294901760, %v3707_v8 }
 0x551   : > { %8187 = vmatprep.subr.mxu0 %v10103_v45  ;;  %8199 = vmatmul.mubr.f32.vlgmr.msra.gmra.mxu1 %v3704_v28 }
 0x552   : > { %8178 = vmatmul.mubr.f32.vlgmr.msra.gmra.mxu0 %v3184_v13  ;;  %8209 = vmatpush3.xpose.msra.mxu1 %v10103_v45 }
 0x553   : > { %8188 = vmatpush3.xpose.msra.mxu0 %v10103_v45  ;;  %8212 = vmatprep.mubr.f32.mxu1 %v3696_v34 }
 0x554   : > { %8189 = vmatprep.subr.mxu0 %v10105_v54  ;;  %8191 = vmatprep.mubr.f32.mxu0 %v3698_v9 }
 0x555   : > { %8210 = vmatprep.subr.mxu1 %v10105_v54 }
 0x556   : > { %8211 = vmatpush3.xpose.msra.mxu1 %v10105_v54 }
 0x557   : > { %8190 = vmatpush3.xpose.msra.mxu0 %v10105_v54  ;;  %8222 = vmatprep.subr.mxu1 %v10103_v45 }
 0x558   : > { %8201 = vmatprep.subr.mxu0 %v10108_v62 }
 0x559   : > { %8213 = vmatmul.mubr.f32.vlgmr.msra.gmra.mxu1 %v3706_v4 }
 0x55a   : > { %8192 = vmatmul.mubr.f32.vlgmr.msra.gmra.mxu0 %v3708_v53  ;;  %8223 = vmatpush3.xpose.msra.mxu1 %v10103_v45 }
 0x55b   : > { %8202 = vmatpush3.xpose.msra.mxu0 %v10108_v62  ;;  %8205 = vmatprep.mubr.f32.mxu0 %v3695_v48 }
 0x55c   : > { %8226 = vmatprep.mubr.f32.mxu1 %v10123_v60  ;;  %8203 = vmatprep.subr.mxu0 %v10113_v47 }
 0x55d   : > { %8224 = vmatprep.subr.mxu1 %v10105_v54 }
 0x55e   : > { %8225 = vmatpush3.xpose.msra.mxu1 %v10105_v54 }
 0x55f   : > { %8204 = vmatpush3.xpose.msra.mxu0 %v10113_v47 }
 0x560   : > { %8215 = vmatprep.subr.mxu0 %v10116_v39 }
 0x561   : > { %8227 = vmatmul.mubr.f32.vlgmr.msra.gmra.mxu1 %v3704_v28 }
 0x562   : > { %8206 = vmatmul.mubr.f32.vlgmr.msra.gmra.mxu0 %v3705_v46 }
 0x563   : > { %8216 = vmatpush3.xpose.msra.mxu0 %v10116_v39  ;;  %8219 = vmatprep.mubr.f32.mxu0 %v10123_v60 }
 0x564   : > { %8217 = vmatprep.subr.mxu0 %v10121_v37 }
 0x567   : > { %8218 = vmatpush3.xpose.msra.mxu0 %v10121_v37 }
 0x56a   : > { %8220 = vmatmul.mubr.f32.vlgmr.msra.gmra.mxu0 %v3704_v28 }
 0x600   : > { %v8158_v27 = vpop.f32.mrf.mxu1 }
 0x602   : > { %v3271_v20 = vpop.f32.mrf.mxu1 }
 0x604   : > { %v8172_v5 = vpop.f32.mrf.mxu1 }
 0x606   : > { %v3435_v41 = vpop.f32.mrf.mxu1 }
 0x608   : > { %v8151_v61 = vpop.f32.mrf.mxu0 }
 0x609   : > { %v3278_v30 = vadd.f32 %v8158_v27, %v8151_v61  ;;  %v8186_v3 = vpop.f32.mrf.mxu1 }
 0x60a   : > { %v3180_v25 = vpop.f32.mrf.mxu0 }
 0x60b   : > { %v3272_v51 = vadd.f32 %v3271_v20, %v3180_v25  ;;  %v3599_v21 = vpop.f32.mrf.mxu1 }
 0x60d   : > { %v8165_v40 = vpop.f32.mrf.mxu0 }
 0x60e   : > { %v3361_v57 = vadd.f32 %v8165_v40, %v3278_v30 }
 0x60f   : > { %v3353_v12 = vpop.f32.mrf.mxu0 }
 0x610   : > { %v3354_v18 = vadd.f32 %v3353_v12, %v3272_v51  ;;  %v3444_v44 = vadd.f32 %v8172_v5, %v3361_v57 }
 0x611   : > { %v8200_v62 = vpop.f32.mrf.mxu1 }
 0x612   : > { %v8179_v17 = vpop.f32.mrf.mxu0  ;;  %v3436_v50 = vadd.f32 %v3435_v41, %v3354_v18 }
 0x613   : > { %v3527_v7 = vadd.f32 %v8179_v17, %v3444_v44  ;;  %v3791_v0 = vpop.f32.mrf.mxu1 }
 0x614   : > { %v3520_v22 = vpop.f32.mrf.mxu0 }
 0x615   : > { %v3606_v45 = vadd.f32 %v8186_v3, %v3527_v7  ;;  %v3521_v11 = vadd.f32 %v3520_v22, %v3436_v50 }
 0x617   : > { %3610 = vst.msk [vmem:[%s10169_s24 + $0x8] sm:$0xff] %vm2561_vm0, %v3606_v45  ;;  %v3600_v55 = vadd.f32 %v3599_v21, %v3521_v11 }
 0x619   : > { %3609 = vst.msk [vmem:[%s10169_s24] sm:$0xff] %vm2561_vm0, %v3600_v55  ;;  %v8214_v26 = vpop.f32.mrf.mxu1 }
 0x61a   : > { %v8193_v54 = vpop.f32.mrf.mxu0 }
 0x61b   : > { %v3798_v1 = vadd.f32 %v8200_v62, %v8193_v54  ;;  %v3955_v42 = vpop.f32.mrf.mxu1 }
 0x61c   : > { %v3700_v29 = vpop.f32.mrf.mxu0 }
 0x61d   : > { %v3792_v59 = vadd.f32 %v3791_v0, %v3700_v29 }
 0x621   : > { %v8228_v52 = vpop.f32.mrf.mxu1 }
 0x622   : > { %v8207_v13 = vpop.f32.mrf.mxu0 }
 0x623   : > { %v3881_v14 = vadd.f32 %v8207_v13, %v3798_v1  ;;  %v4119_v36 = vpop.f32.mrf.mxu1 }
 0x624   : > { %v3873_v47 = vpop.f32.mrf.mxu0 }
 0x625   : > { %v3874_v39 = vadd.f32 %v3873_v47, %v3792_v59  ;;  %v3964_v63 = vadd.f32 %v8214_v26, %v3881_v14 }
 0x627   : > { %v3956_v60 = vadd.f32 %v3955_v42, %v3874_v39 }
 0x62a   : > { %v8221_v23 = vpop.f32.mrf.mxu0 }
 0x62b   : > { %v4047_v37 = vadd.f32 %v8221_v23, %v3964_v63 }
 0x62c   : > { %v4040_v35 = vpop.f32.mrf.mxu0 }
 0x62d   : > { %v4126_v33 = vadd.f32 %v8228_v52, %v4047_v37  ;;  %v4041_v43 = vadd.f32 %v4040_v35, %v3956_v60 }
 0x62f   : > { %v4120_v24 = vadd.f32 %v4119_v36, %v4041_v43  ;;  %v4130_v19 = vmul.f32 0.17677669, %v4126_v33 }
 0x631   : > { %v4134_v38 = vsel %vm3078_vm1, %v4130_v19, -inf  ;;  %v4129_v48 = vmul.f32 0.17677669, %v4120_v24 }
 0x632   : > { %4135 = vmax.xlane.f32.xlu1 %v4134_v38 }
 0x633   : > { %v4131_v16 = vsel %vm3078_vm1, %v4129_v48, -inf }
 0x634   : > { %4132 = vmax.xlane.f32.xlu0 %v4131_v16 }
 0x643   : > { %4155 = vrot.lane.b32.xlu1 %v10060_v49, %s8745_s19 }
 0x647   : > { %4686 = vrot.lane.b32.xlu1 %v10039_v2, %s8746_s7 }
 0x64b   : > { %4684 = vrot.lane.b32.xlu1 %v10043_v56, %s8746_s7 }
 0x64f   : > { %4682 = vrot.lane.b32.xlu1 %v10009_v58, %s8746_s7 }
 0x6bb   : > { %v4136_v10 = vpop.xlane.xlu1 %4135 }
 0x6bc   : > { %v4138_v28 = vsub.f32 %v4130_v19, %v4136_v10 }
 0x6bd   : > { %v4133_v31 = vpop.xlane.xlu0 %4132 }
 0x6be   : > { %v4141_v34 = vmul.f32 1.442695, %v4138_v28  ;;  %v4137_v46 = vsub.f32 %v4129_v48, %v4133_v31 }
 0x6bf   : > { %v4156_v27 = vpop.permute.xlu1 %4155 }
 0x6c0   : > { %8535 = vpow2.f32 %v4141_v34  ;;  %v4139_v6 = vmul.f32 1.442695, %v4137_v46  ;;  %v10191_v61 = vand.u32 4294901760, %v4156_v27 }
 0x6c2   : > { %8537 = vpow2.f32 %v4139_v6  ;;  %v10194_v30 = vsub.f32 %v4156_v27, %v10191_v61 }
 0x6c3   : > { %v4687_v25 = vpop.permute.xlu1 %4686 }
 0x6c4   : > { %v4694_v51 = vsel %vm2561_vm0, %v4687_v25, 0  ;;  %v10200_v12 = vand.u32 4294901760, %v10194_v30 }
 0x6c5   : > { %v10206_v17 = vand.u32 4294901760, %v4694_v51 }
 0x6c6   : > { %v4293_v22 = vsub.f32 %v10194_v30, %v10200_v12 }
 0x6c7   : > { %v4685_v18 = vpop.permute.xlu1 %4684  ;;  %v10221_v29 = vsub.f32 %v4694_v51, %v10206_v17 }
 0x6c8   : > { %v4692_v50 = vsel %vm2561_vm0, %v4685_v18, 0  ;;  %v4294_v0 = vand.u32 4294901760, %v4293_v22 }
 0x6c9   : > { %v10216_v54 = vand.u32 4294901760, %v4692_v50  ;;  %v10229_v42 = vand.u32 4294901760, %v10221_v29 }
 0x6cb   : > { %v10226_v59 = vsub.f32 %v4692_v50, %v10216_v54  ;;  %v4683_v60 = vpop.permute.xlu1 %4682  ;;  %v4815_v33 = vsub.f32 %v10221_v29, %v10229_v42 }
 0x6cc   : > { %v4690_v24 = vsel %vm2561_vm0, %v4683_v60, 0 }
 0x6cd   : > { %v8536_v4 = vpop.eup %8535  ;;  %v10234_v37 = vand.u32 4294901760, %v10226_v59  ;;  %v4816_v16 = vand.u32 4294901760, %v4815_v33  ;;  %v4773_v28 = vand.u32 4294901760, %v4690_v24 }
 0x6ce   : > { %v4146_v9 = vsel %vm3078_vm1, %v8536_v4, 0.0 }
 0x6cf   : > { %v8538_v8 = vpop.eup %8537  ;;  %4147 = vadd.xlane.f32.xlu0 %v4146_v9  ;;  %v4822_v38 = vsub.f32 %v10226_v59, %v10234_v37  ;;  %v4774_v46 = vsub.f32 %v4690_v24, %v4773_v28 }
 0x6d0   : > { %v4143_v53 = vsel %vm3078_vm1, %v8538_v8, 0.0 }
 0x6d1   : > { %v4823_v31 = vand.u32 4294901760, %v4822_v38 }
 0x6d3   : > { %4144 = vadd.xlane.f32.xlu0 %v4143_v53 }
 0x6e9   : > { %4157 = vrot.lane.b32.xlu0 %v10055_v15, %s8745_s19 }
 0x6ed   : > { %4680 = vrot.lane.b32.xlu0 %v10014_v32, %s8746_s7 }
 0x758   : > { %v4148_v20 = vpop.xlane.xlu0 %4147 }
 0x759   : > { %8539 = vrcp.f32 %v4148_v20 }
 0x75c   : > { %v4145_v5 = vpop.xlane.xlu0 %4144 }
 0x75d   : > { %8541 = vrcp.f32 %v4145_v5 }
 0x760   : > { %v4158_v40 = vpop.permute.xlu0 %4157 }
 0x761   : > { %v4196_v41 = vand.u32 4294901760, %v4158_v40 }
 0x763   : > { %v10197_v57 = vsub.f32 %v4158_v40, %v4196_v41  ;;  %8229 = vmatprep.subr.mxu0 %v4196_v41 }
 0x764   : > { %8230 = vmatpush3.msra.mxu0 %v4196_v41  ;;  %v4681_v26 = vpop.permute.xlu0 %4680 }
 0x765   : > { %8231 = vmatprep.subr.mxu0 %v10191_v61  ;;  %v10204_v44 = vand.u32 4294901760, %v10197_v57  ;;  %v4688_v63 = vsel %vm2561_vm0, %v4681_v26, 0 }
 0x766   : > { %v8540_v3 = vpop.eup %8539  ;;  %8232 = vmatpush3.msra.mxu0 %v10191_v61  ;;  %v10236_v35 = vand.u32 4294901760, %v4688_v63 }
 0x767   : > { %8243 = vmatprep.subr.mxu0 %v10197_v57  ;;  %v4286_v7 = vsub.f32 %v10197_v57, %v10204_v44  ;;  %v4152_v45 = vmul.f32 %v8540_v3, %v8536_v4  ;;  %v4775_v4 = vand.u32 4294901760, %v4774_v46 }
 0x768   : > { %v4764_v48 = vsub.f32 %v4688_v63, %v10236_v35 }
 0x769   : > { %v4287_v11 = vand.u32 4294901760, %v4286_v7  ;;  %v4165_v21 = vsel %vm3078_vm1, %v4152_v45, 0 }
 0x76a   : > { %v8542_v55 = vpop.eup %8541  ;;  %v10218_v62 = vand.u32 4294901760, %v4165_v21  ;;  %v4765_v34 = vand.u32 4294901760, %v4764_v48 }
 0x76b   : > { %8236 = vmatprep.subr.mxu1 %v4287_v11  ;;  %v4150_v13 = vmul.f32 %v8542_v55, %v8538_v8  ;;  %v4776_v8 = vsub.f32 %v4774_v46, %v4775_v4 }
 0x76c   : > { %8237 = vmatpush3.msra.mxu1 %v4287_v11  ;;  %v4245_v1 = vsub.f32 %v4165_v21, %v10218_v62  ;;  %v4766_v6 = vsub.f32 %v4764_v48, %v4765_v34 }
 0x76d   : > { %8238 = vmatprep.subr.mxu1 %v4294_v0  ;;  %v4162_v47 = vsel %vm3078_vm1, %v4150_v13, 0  ;;  %v4777_v53 = vand.u32 4294901760, %v4776_v8 }
 0x76e   : > { %8239 = vmatpush3.msra.mxu1 %v4294_v0  ;;  %v4234_v14 = vand.u32 4294901760, %v4162_v47  ;;  %v4246_v39 = vand.u32 4294901760, %v4245_v1  ;;  %v4767_v9 = vand.u32 4294901760, %v4766_v6 }
 0x76f   : > { %8250 = vmatprep.subr.mxu1 %v4196_v41 }
 0x770   : > { %8240 = vmatprep.mubr.f32.mxu1 %v4234_v14  ;;  %v4235_v52 = vsub.f32 %v4162_v47, %v4234_v14  ;;  %v4247_v43 = vsub.f32 %v4245_v1, %v4246_v39 }
 0x771   : > { %8241 = vmatmul.mubr.f32.vlgmr.msra.gmra.mxu1 %v10218_v62 }
 0x772   : > { %8251 = vmatpush3.msra.mxu1 %v4196_v41  ;;  %v4236_v23 = vand.u32 4294901760, %v4235_v52  ;;  %v4248_v10 = vand.u32 4294901760, %v4247_v43 }
 0x773   : > { %8252 = vmatprep.subr.mxu1 %v10191_v61 }
 0x774   : > { %8253 = vmatpush3.msra.mxu1 %v10191_v61  ;;  %8254 = vmatprep.mubr.f32.mxu1 %v4236_v23  ;;  %v4237_v36 = vsub.f32 %v4235_v52, %v4236_v23 }
 0x775   : > { %8264 = vmatprep.subr.mxu1 %v4196_v41  ;;  %8255 = vmatmul.mubr.f32.vlgmr.msra.gmra.mxu1 %v4246_v39 }
 0x776   : > { %8265 = vmatpush3.msra.mxu1 %v4196_v41  ;;  %8268 = vmatprep.mubr.f32.mxu1 %v4234_v14  ;;  %v4238_v19 = vand.u32 4294901760, %v4237_v36 }
 0x777   : > { %8266 = vmatprep.subr.mxu1 %v10191_v61 }
 0x778   : > { %8267 = vmatpush3.msra.mxu1 %v10191_v61  ;;  %8233 = vmatprep.mubr.f32.mxu0 %v4238_v19 }
 0x779   : > { %8278 = vmatprep.subr.mxu1 %v4816_v16  ;;  %8234 = vmatmul.mubr.f32.vlgmr.msra.gmra.mxu0 %v4248_v10 }
 0x77a   : > { %8244 = vmatpush3.msra.mxu0 %v10197_v57  ;;  %8269 = vmatmul.mubr.f32.vlgmr.msra.gmra.mxu1 %v10218_v62 }
 0x77b   : > { %8279 = vmatpush3.xpose.msra.mxu1 %v4816_v16  ;;  %8245 = vmatprep.subr.mxu0 %v10194_v30 }
 0x77c   : > { %8247 = vmatprep.mubr.f32.mxu0 %v4235_v52  ;;  %8280 = vmatprep.subr.mxu1 %v4823_v31 }
 0x77d   : > { %8282 = vmatprep.mubr.f32.mxu1 %v10236_v35  ;;  %8246 = vmatpush3.msra.mxu0 %v10194_v30 }
 0x77e   : > { %8257 = vmatprep.subr.mxu0 %v10204_v44  ;;  %8248 = vmatmul.mubr.f32.vlgmr.msra.gmra.mxu0 %v4245_v1 }
 0x77f   : > { %8258 = vmatpush3.msra.mxu0 %v10204_v44  ;;  %8281 = vmatpush3.xpose.msra.mxu1 %v4823_v31 }
 0x780   : > { %8259 = vmatprep.subr.mxu0 %v10200_v12  ;;  %8261 = vmatprep.mubr.f32.mxu0 %v4234_v14 }
 0x781   : > { %8292 = vmatprep.subr.mxu1 %v10206_v17  ;;  %8260 = vmatpush3.msra.mxu0 %v10200_v12 }
 0x782   : > { %8271 = vmatprep.subr.mxu0 %v10206_v17  ;;  %8283 = vmatmul.mubr.f32.vlgmr.msra.gmra.mxu1 %v4773_v28 }
 0x783   : > { %8262 = vmatmul.mubr.f32.vlgmr.msra.gmra.mxu0 %v10218_v62  ;;  %8293 = vmatpush3.xpose.msra.mxu1 %v10206_v17 }
 0x784   : > { %8272 = vmatpush3.xpose.msra.mxu0 %v10206_v17  ;;  %8296 = vmatprep.mubr.f32.mxu1 %v4765_v34 }
 0x785   : > { %8273 = vmatprep.subr.mxu0 %v10216_v54  ;;  %8275 = vmatprep.mubr.f32.mxu0 %v4767_v9 }
 0x786   : > { %8294 = vmatprep.subr.mxu1 %v10216_v54 }
 0x787   : > { %8295 = vmatpush3.xpose.msra.mxu1 %v10216_v54 }
 0x788   : > { %8274 = vmatpush3.xpose.msra.mxu0 %v10216_v54  ;;  %8306 = vmatprep.subr.mxu1 %v10206_v17 }
 0x789   : > { %8285 = vmatprep.subr.mxu0 %v10221_v29 }
 0x78a   : > { %8297 = vmatmul.mubr.f32.vlgmr.msra.gmra.mxu1 %v4775_v4 }
 0x78b   : > { %8276 = vmatmul.mubr.f32.vlgmr.msra.gmra.mxu0 %v4777_v53  ;;  %8307 = vmatpush3.xpose.msra.mxu1 %v10206_v17 }
 0x78c   : > { %8286 = vmatpush3.xpose.msra.mxu0 %v10221_v29  ;;  %8289 = vmatprep.mubr.f32.mxu0 %v4764_v48 }
 0x78d   : > { %8310 = vmatprep.mubr.f32.mxu1 %v10236_v35  ;;  %8287 = vmatprep.subr.mxu0 %v10226_v59 }
 0x78e   : > { %8308 = vmatprep.subr.mxu1 %v10216_v54 }
 0x78f   : > { %8309 = vmatpush3.xpose.msra.mxu1 %v10216_v54 }
 0x790   : > { %8288 = vmatpush3.xpose.msra.mxu0 %v10226_v59 }
 0x791   : > { %8299 = vmatprep.subr.mxu0 %v10229_v42 }
 0x792   : > { %8311 = vmatmul.mubr.f32.vlgmr.msra.gmra.mxu1 %v4773_v28 }
 0x793   : > { %8290 = vmatmul.mubr.f32.vlgmr.msra.gmra.mxu0 %v4774_v46 }
 0x794   : > { %8300 = vmatpush3.xpose.msra.mxu0 %v10229_v42  ;;  %8303 = vmatprep.mubr.f32.mxu0 %v10236_v35 }
 0x795   : > { %8301 = vmatprep.subr.mxu0 %v10234_v37 }
 0x798   : > { %8302 = vmatpush3.xpose.msra.mxu0 %v10234_v37 }
 0x79b   : > { %8304 = vmatmul.mubr.f32.vlgmr.msra.gmra.mxu0 %v4773_v28 }
 0x831   : > { %v8242_v27 = vpop.f32.mrf.mxu1 }
 0x833   : > { %v4331_v20 = vpop.f32.mrf.mxu1 }
 0x835   : > { %v8256_v25 = vpop.f32.mrf.mxu1 }
 0x837   : > { %v4495_v51 = vpop.f32.mrf.mxu1 }
 0x839   : > { %v8235_v61 = vpop.f32.mrf.mxu0 }
 0x83a   : > { %v4338_v5 = vadd.f32 %v8242_v27, %v8235_v61  ;;  %v8270_v3 = vpop.f32.mrf.mxu1 }
 0x83b   : > { %v4240_v30 = vpop.f32.mrf.mxu0 }
 0x83c   : > { %v4332_v40 = vadd.f32 %v4331_v20, %v4240_v30  ;;  %v4659_v21 = vpop.f32.mrf.mxu1 }
 0x83e   : > { %v8249_v41 = vpop.f32.mrf.mxu0 }
 0x83f   : > { %v4421_v57 = vadd.f32 %v8249_v41, %v4338_v5 }
 0x840   : > { %v4413_v12 = vpop.f32.mrf.mxu0 }
 0x841   : > { %v4414_v18 = vadd.f32 %v4413_v12, %v4332_v40  ;;  %v4504_v44 = vadd.f32 %v8256_v25, %v4421_v57 }
 0x842   : > { %v8284_v62 = vpop.f32.mrf.mxu1 }
 0x843   : > { %v8263_v17 = vpop.f32.mrf.mxu0  ;;  %v4496_v50 = vadd.f32 %v4495_v51, %v4414_v18 }
 0x844   : > { %v4587_v7 = vadd.f32 %v8263_v17, %v4504_v44  ;;  %v4860_v0 = vpop.f32.mrf.mxu1 }
 0x845   : > { %v4580_v22 = vpop.f32.mrf.mxu0 }
 0x846   : > { %v10280_v45 = vadd.f32 %v8270_v3, %v4587_v7  ;;  %v4581_v11 = vadd.f32 %v4580_v22, %v4496_v50 }
 0x848   : > { %v10282_v55 = vadd.f32 %v4659_v21, %v4581_v11 }
 0x84a   : > { %v8298_v26 = vpop.f32.mrf.mxu1 }
 0x84b   : > { %v8277_v54 = vpop.f32.mrf.mxu0 }
 0x84c   : > { %v4867_v1 = vadd.f32 %v8284_v62, %v8277_v54  ;;  %v5024_v42 = vpop.f32.mrf.mxu1 }
 0x84d   : > { %v4769_v29 = vpop.f32.mrf.mxu0 }
 0x84e   : > { %v4861_v59 = vadd.f32 %v4860_v0, %v4769_v29 }
 0x852   : > { %v8312_v52 = vpop.f32.mrf.mxu1 }
 0x853   : > { %v8291_v13 = vpop.f32.mrf.mxu0 }
 0x854   : > { %v4950_v14 = vadd.f32 %v8291_v13, %v4867_v1  ;;  %v5188_v36 = vpop.f32.mrf.mxu1 }
 0x855   : > { %v4942_v47 = vpop.f32.mrf.mxu0 }
 0x856   : > { %v4943_v39 = vadd.f32 %v4942_v47, %v4861_v59  ;;  %v5033_v63 = vadd.f32 %v8298_v26, %v4950_v14 }
 0x858   : > { %v5025_v60 = vadd.f32 %v5024_v42, %v4943_v39 }
 0x85b   : > { %v8305_v23 = vpop.f32.mrf.mxu0 }
 0x85c   : > { %v5116_v37 = vadd.f32 %v8305_v23, %v5033_v63 }
 0x85d   : > { %v5109_v35 = vpop.f32.mrf.mxu0 }
 0x85e   : > { %v5195_v33 = vadd.f32 %v8312_v52, %v5116_v37  ;;  %v5110_v43 = vadd.f32 %v5109_v35, %v5025_v60 }
 0x860   : > { %v5189_v24 = vadd.f32 %v5188_v36, %v5110_v43  ;;  %v5199_v19 = vmul.f32 0.17677669, %v5195_v33 }
 0x862   : > { %v5203_v38 = vsel %vm3078_vm1, %v5199_v19, -inf  ;;  %v5198_v48 = vmul.f32 0.17677669, %v5189_v24 }
 0x863   : > { %5204 = vmax.xlane.f32.xlu1 %v5203_v38 }
 0x864   : > { %v5200_v16 = vsel %vm3078_vm1, %v5198_v48, -inf }
 0x865   : > { %5201 = vmax.xlane.f32.xlu0 %v5200_v16 }
 0x874   : > { %5222 = vrot.lane.b32.xlu1 %v10060_v49, %s8746_s7 }
 0x878   : > { %5753 = vrot.lane.b32.xlu1 %v10039_v2, %s8747_s26 }
 0x87c   : > { %5751 = vrot.lane.b32.xlu1 %v10043_v56, %s8747_s26 }
 0x880   : > { %5749 = vrot.lane.b32.xlu1 %v10009_v58, %s8747_s26 }
 0x8ec   : > { %v5205_v10 = vpop.xlane.xlu1 %5204 }
 0x8ed   : > { %v5207_v28 = vsub.f32 %v5199_v19, %v5205_v10 }
 0x8ee   : > { %v5202_v31 = vpop.xlane.xlu0 %5201 }
 0x8ef   : > { %v5210_v34 = vmul.f32 1.442695, %v5207_v28  ;;  %v5206_v46 = vsub.f32 %v5198_v48, %v5202_v31 }
 0x8f0   : > { %v5223_v58 = vpop.permute.xlu1 %5222 }
 0x8f1   : > { %8543 = vpow2.f32 %v5210_v34  ;;  %v5208_v6 = vmul.f32 1.442695, %v5206_v46  ;;  %v10300_v53 = vand.u32 4294901760, %v5223_v58 }
 0x8f3   : > { %8545 = vpow2.f32 %v5208_v6  ;;  %v10303_v61 = vsub.f32 %v5223_v58, %v10300_v53 }
 0x8f4   : > { %v5754_v20 = vpop.permute.xlu1 %5753 }
 0x8f5   : > { %v5761_v30 = vsel %vm2561_vm0, %v5754_v20, 0 }
 0x8f6   : > { %v10315_v12 = vand.u32 4294901760, %v5761_v30 }
 0x8f8   : > { %v5752_v41 = vpop.permute.xlu1 %5751  ;;  %v10330_v54 = vsub.f32 %v5761_v30, %v10315_v12 }
 0x8f9   : > { %v5759_v18 = vsel %vm2561_vm0, %v5752_v41, 0 }
 0x8fa   : > { %v10325_v11 = vand.u32 4294901760, %v5759_v18  ;;  %v10338_v14 = vand.u32 4294901760, %v10330_v54 }
 0x8fc   : > { %v10335_v26 = vsub.f32 %v5759_v18, %v10325_v11  ;;  %v5750_v23 = vpop.permute.xlu1 %5749  ;;  %v5882_v60 = vsub.f32 %v10330_v54, %v10338_v14 }
 0x8fd   : > { %v5757_v43 = vsel %vm2561_vm0, %v5750_v23, 0 }
 0x8fe   : > { %v8544_v4 = vpop.eup %8543  ;;  %v10343_v52 = vand.u32 4294901760, %v10335_v26  ;;  %v5883_v38 = vand.u32 4294901760, %v5882_v60  ;;  %v5840_v16 = vand.u32 4294901760, %v5757_v43 }
 0x8ff   : > { %v5215_v9 = vsel %vm3078_vm1, %v8544_v4, 0.0 }
 0x900   : > { %v8546_v8 = vpop.eup %8545  ;;  %5216 = vadd.xlane.f32.xlu0 %v5215_v9  ;;  %v5889_v24 = vsub.f32 %v10335_v26, %v10343_v52  ;;  %v5841_v31 = vsub.f32 %v5757_v43, %v5840_v16 }
 0x901   : > { %v5212_v2 = vsel %vm3078_vm1, %v8546_v8, 0.0 }
 0x902   : > { %v5890_v10 = vand.u32 4294901760, %v5889_v24  ;;  %v5842_v46 = vand.u32 4294901760, %v5841_v31 }
 0x904   : > { %5213 = vadd.xlane.f32.xlu0 %v5212_v2 }
 0x91a   : > { %5224 = vrot.lane.b32.xlu0 %v10055_v15, %s8746_s7 }
 0x91e   : > { %5747 = vrot.lane.b32.xlu0 %v10014_v32, %s8747_s26  ;;  %v10309_v32 = vand.u32 4294901760, %v10303_v61 }
 0x920   : > { %v5360_v3 = vsub.f32 %v10303_v61, %v10309_v32 }
 0x922   : > { %v5361_v62 = vand.u32 4294901760, %v5360_v3 }
 0x989   : > { %v5217_v56 = vpop.xlane.xlu0 %5216 }
 0x98a   : > { %8547 = vrcp.f32 %v5217_v56 }
 0x98d   : > { %v5214_v27 = vpop.xlane.xlu0 %5213 }
 0x98e   : > { %8549 = vrcp.f32 %v5214_v27 }
 0x991   : > { %v5225_v5 = vpop.permute.xlu0 %5224 }
 0x992   : > { %v5263_v25 = vand.u32 4294901760, %v5225_v5 }
 0x994   : > { %v10306_v40 = vsub.f32 %v5225_v5, %v5263_v25  ;;  %8313 = vmatprep.subr.mxu0 %v5263_v25 }
 0x995   : > { %8314 = vmatpush3.msra.mxu0 %v5263_v25  ;;  %v5748_v13 = vpop.permute.xlu0 %5747 }
 0x996   : > { %8315 = vmatprep.subr.mxu0 %v10300_v53  ;;  %v10313_v51 = vand.u32 4294901760, %v10306_v40  ;;  %v5755_v39 = vsel %vm2561_vm0, %v5748_v13, 0 }
 0x997   : > { %v8548_v57 = vpop.eup %8547  ;;  %8316 = vmatpush3.msra.mxu0 %v10300_v53  ;;  %v10345_v37 = vand.u32 4294901760, %v5755_v39 }
 0x998   : > { %8327 = vmatprep.subr.mxu0 %v10306_v40  ;;  %v5353_v44 = vsub.f32 %v10306_v40, %v10313_v51  ;;  %v5221_v17 = vmul.f32 %v8548_v57, %v8544_v4  ;;  %v5843_v4 = vsub.f32 %v5841_v31, %v5842_v46 }
 0x999   : > { %v5831_v19 = vsub.f32 %v5755_v39, %v10345_v37 }
 0x99a   : > { %v5354_v50 = vand.u32 4294901760, %v5353_v44  ;;  %v5232_v7 = vsel %vm3078_vm1, %v5221_v17, 0  ;;  %v5844_v9 = vand.u32 4294901760, %v5843_v4 }
 0x99b   : > { %v8550_v22 = vpop.eup %8549  ;;  %v10327_v21 = vand.u32 4294901760, %v5232_v7  ;;  %v5832_v28 = vand.u32 4294901760, %v5831_v19 }
 0x99c   : > { %8320 = vmatprep.subr.mxu1 %v5354_v50  ;;  %v5219_v29 = vmul.f32 %v8550_v22, %v8546_v8 }
 0x99d   : > { %8321 = vmatpush3.msra.mxu1 %v5354_v50  ;;  %v5312_v0 = vsub.f32 %v5232_v7, %v10327_v21  ;;  %v5833_v34 = vsub.f32 %v5831_v19, %v5832_v28 }
 0x99e   : > { %8322 = vmatprep.subr.mxu1 %v5361_v62  ;;  %v5229_v1 = vsel %vm3078_vm1, %v5219_v29, 0 }
 0x99f   : > { %8323 = vmatpush3.msra.mxu1 %v5361_v62  ;;  %v5301_v47 = vand.u32 4294901760, %v5229_v1  ;;  %v5313_v59 = vand.u32 4294901760, %v5312_v0  ;;  %v5834_v6 = vand.u32 4294901760, %v5833_v34 }
 0x9a0   : > { %8334 = vmatprep.subr.mxu1 %v5263_v25 }
 0x9a1   : > { %8324 = vmatprep.mubr.f32.mxu1 %v5301_v47  ;;  %v5302_v42 = vsub.f32 %v5229_v1, %v5301_v47  ;;  %v5314_v35 = vsub.f32 %v5312_v0, %v5313_v59 }
 0x9a2   : > { %8325 = vmatmul.mubr.f32.vlgmr.msra.gmra.mxu1 %v10327_v21 }
 0x9a3   : > { %8335 = vmatpush3.msra.mxu1 %v5263_v25  ;;  %v5303_v63 = vand.u32 4294901760, %v5302_v42  ;;  %v5315_v48 = vand.u32 4294901760, %v5314_v35 }
 0x9a4   : > { %8336 = vmatprep.subr.mxu1 %v10300_v53 }
 0x9a5   : > { %8337 = vmatpush3.msra.mxu1 %v10300_v53  ;;  %8338 = vmatprep.mubr.f32.mxu1 %v5303_v63  ;;  %v5304_v33 = vsub.f32 %v5302_v42, %v5303_v63 }
 0x9a6   : > { %8348 = vmatprep.subr.mxu1 %v5263_v25  ;;  %8339 = vmatmul.mubr.f32.vlgmr.msra.gmra.mxu1 %v5313_v59 }
 0x9a7   : > { %8349 = vmatpush3.msra.mxu1 %v5263_v25  ;;  %8352 = vmatprep.mubr.f32.mxu1 %v5301_v47  ;;  %v5305_v36 = vand.u32 4294901760, %v5304_v33 }
 0x9a8   : > { %8350 = vmatprep.subr.mxu1 %v10300_v53 }
 0x9a9   : > { %8351 = vmatpush3.msra.mxu1 %v10300_v53  ;;  %8317 = vmatprep.mubr.f32.mxu0 %v5305_v36 }
 0x9aa   : > { %8362 = vmatprep.subr.mxu1 %v5883_v38  ;;  %8318 = vmatmul.mubr.f32.vlgmr.msra.gmra.mxu0 %v5315_v48 }
 0x9ab   : > { %8328 = vmatpush3.msra.mxu0 %v10306_v40  ;;  %8353 = vmatmul.mubr.f32.vlgmr.msra.gmra.mxu1 %v10327_v21 }
 0x9ac   : > { %8363 = vmatpush3.xpose.msra.mxu1 %v5883_v38  ;;  %8329 = vmatprep.subr.mxu0 %v10303_v61 }
 0x9ad   : > { %8331 = vmatprep.mubr.f32.mxu0 %v5302_v42  ;;  %8364 = vmatprep.subr.mxu1 %v5890_v10 }
 0x9ae   : > { %8366 = vmatprep.mubr.f32.mxu1 %v10345_v37  ;;  %8330 = vmatpush3.msra.mxu0 %v10303_v61 }
 0x9af   : > { %8341 = vmatprep.subr.mxu0 %v10313_v51  ;;  %8332 = vmatmul.mubr.f32.vlgmr.msra.gmra.mxu0 %v5312_v0 }
 0x9b0   : > { %8342 = vmatpush3.msra.mxu0 %v10313_v51  ;;  %8365 = vmatpush3.xpose.msra.mxu1 %v5890_v10 }
 0x9b1   : > { %8343 = vmatprep.subr.mxu0 %v10309_v32  ;;  %8345 = vmatprep.mubr.f32.mxu0 %v5301_v47 }
 0x9b2   : > { %8376 = vmatprep.subr.mxu1 %v10315_v12  ;;  %8344 = vmatpush3.msra.mxu0 %v10309_v32 }
 0x9b3   : > { %8355 = vmatprep.subr.mxu0 %v10315_v12  ;;  %8367 = vmatmul.mubr.f32.vlgmr.msra.gmra.mxu1 %v5840_v16 }
 0x9b4   : > { %8346 = vmatmul.mubr.f32.vlgmr.msra.gmra.mxu0 %v10327_v21  ;;  %8377 = vmatpush3.xpose.msra.mxu1 %v10315_v12 }
 0x9b5   : > { %8356 = vmatpush3.xpose.msra.mxu0 %v10315_v12  ;;  %8380 = vmatprep.mubr.f32.mxu1 %v5832_v28 }
 0x9b6   : > { %8357 = vmatprep.subr.mxu0 %v10325_v11  ;;  %8359 = vmatprep.mubr.f32.mxu0 %v5834_v6 }
 0x9b7   : > { %8378 = vmatprep.subr.mxu1 %v10325_v11 }
 0x9b8   : > { %8379 = vmatpush3.xpose.msra.mxu1 %v10325_v11 }
 0x9b9   : > { %8358 = vmatpush3.xpose.msra.mxu0 %v10325_v11  ;;  %8390 = vmatprep.subr.mxu1 %v10315_v12 }
 0x9ba   : > { %8369 = vmatprep.subr.mxu0 %v10330_v54 }
 0x9bb   : > { %8381 = vmatmul.mubr.f32.vlgmr.msra.gmra.mxu1 %v5842_v46 }
 0x9bc   : > { %8360 = vmatmul.mubr.f32.vlgmr.msra.gmra.mxu0 %v5844_v9  ;;  %8391 = vmatpush3.xpose.msra.mxu1 %v10315_v12 }
 0x9bd   : > { %8370 = vmatpush3.xpose.msra.mxu0 %v10330_v54  ;;  %8373 = vmatprep.mubr.f32.mxu0 %v5831_v19 }
 0x9be   : > { %8394 = vmatprep.mubr.f32.mxu1 %v10345_v37  ;;  %8371 = vmatprep.subr.mxu0 %v10335_v26 }
 0x9bf   : > { %8392 = vmatprep.subr.mxu1 %v10325_v11 }
 0x9c0   : > { %8393 = vmatpush3.xpose.msra.mxu1 %v10325_v11 }
 0x9c1   : > { %8372 = vmatpush3.xpose.msra.mxu0 %v10335_v26 }
 0x9c2   : > { %8383 = vmatprep.subr.mxu0 %v10338_v14 }
 0x9c3   : > { %8395 = vmatmul.mubr.f32.vlgmr.msra.gmra.mxu1 %v5840_v16 }
 0x9c4   : > { %8374 = vmatmul.mubr.f32.vlgmr.msra.gmra.mxu0 %v5841_v31 }
 0x9c5   : > { %8384 = vmatpush3.xpose.msra.mxu0 %v10338_v14  ;;  %8387 = vmatprep.mubr.f32.mxu0 %v10345_v37 }
 0x9c6   : > { %8385 = vmatprep.subr.mxu0 %v10343_v52 }
 0x9c9   : > { %8386 = vmatpush3.xpose.msra.mxu0 %v10343_v52 }
 0x9cc   : > { %8388 = vmatmul.mubr.f32.vlgmr.msra.gmra.mxu0 %v5840_v16 }
 0xa62   : > { %v8326_v8 = vpop.f32.mrf.mxu1 }
 0xa64   : > { %v5398_v2 = vpop.f32.mrf.mxu1 }
 0xa66   : > { %v8340_v56 = vpop.f32.mrf.mxu1 }
 0xa68   : > { %v5562_v61 = vpop.f32.mrf.mxu1 }
 0xa6a   : > { %v8319_v58 = vpop.f32.mrf.mxu0 }
 0xa6b   : > { %v8354_v30 = vpop.f32.mrf.mxu1  ;;  %v5405_v35 = vadd.f32 %v8326_v8, %v8319_v58 }
 0xa6c   : > { %v5307_v53 = vpop.f32.mrf.mxu0 }
 0xa6d   : > { %v5399_v27 = vadd.f32 %v5398_v2, %v5307_v53  ;;  %v5726_v57 = vpop.f32.mrf.mxu1 }
 0xa6f   : > { %v8333_v20 = vpop.f32.mrf.mxu0 }
 0xa70   : > { %v5488_v33 = vadd.f32 %v8333_v20, %v5405_v35 }
 0xa71   : > { %v5480_v5 = vpop.f32.mrf.mxu0 }
 0xa72   : > { %v5481_v25 = vadd.f32 %v5480_v5, %v5399_v27  ;;  %v5571_v43 = vadd.f32 %v8340_v56, %v5488_v33 }
 0xa73   : > { %v8368_v44 = vpop.f32.mrf.mxu1 }
 0xa74   : > { %v8347_v40 = vpop.f32.mrf.mxu0  ;;  %v5563_v32 = vadd.f32 %v5562_v61, %v5481_v25 }
 0xa75   : > { %v5927_v17 = vpop.f32.mrf.mxu1  ;;  %v5654_v36 = vadd.f32 %v8347_v40, %v5571_v43 }
 0xa76   : > { %v5647_v41 = vpop.f32.mrf.mxu0 }
 0xa77   : > { %v5648_v51 = vadd.f32 %v5647_v41, %v5563_v32  ;;  %v5733_v24 = vadd.f32 %v8354_v30, %v5654_v36 }
 0xa79   : > { %v5727_v12 = vadd.f32 %v5726_v57, %v5648_v51 }
 0xa7b   : > { %v8382_v22 = vpop.f32.mrf.mxu1 }
 0xa7c   : > { %v8361_v18 = vpop.f32.mrf.mxu0 }
 0xa7d   : > { %v5934_v7 = vadd.f32 %v8368_v44, %v8361_v18  ;;  %v6091_v29 = vpop.f32.mrf.mxu1 }
 0xa7e   : > { %v5836_v3 = vpop.f32.mrf.mxu0 }
 0xa7f   : > { %v5928_v21 = vadd.f32 %v5927_v17, %v5836_v3 }
 0xa83   : > { %v8396_v13 = vpop.f32.mrf.mxu1 }
 0xa84   : > { %v8375_v50 = vpop.f32.mrf.mxu0 }
 0xa85   : > { %v6017_v54 = vadd.f32 %v8375_v50, %v5934_v7  ;;  %v6255_v42 = vpop.f32.mrf.mxu1 }
 0xa86   : > { %v6009_v11 = vpop.f32.mrf.mxu0 }
 0xa87   : > { %v6010_v62 = vadd.f32 %v6009_v11, %v5928_v21  ;;  %v6100_v0 = vadd.f32 %v8382_v22, %v6017_v54 }
 0xa89   : > { %v6092_v47 = vadd.f32 %v6091_v29, %v6010_v62 }
 0xa8c   : > { %v8389_v1 = vpop.f32.mrf.mxu0 }
 0xa8d   : > { %v6183_v26 = vadd.f32 %v8389_v1, %v6100_v0 }
 0xa8e   : > { %v6176_v59 = vpop.f32.mrf.mxu0 }
 0xa8f   : > { %v6262_v14 = vadd.f32 %v8396_v13, %v6183_v26  ;;  %v6177_v39 = vadd.f32 %v6176_v59, %v6092_v47 }
 0xa91   : > { %v6256_v63 = vadd.f32 %v6255_v42, %v6177_v39  ;;  %v6266_v52 = vmul.f32 0.17677669, %v6262_v14 }
 0xa93   : > { %v6270_v23 = vsel %vm3078_vm1, %v6266_v52, -inf  ;;  %v6265_v37 = vmul.f32 0.17677669, %v6256_v63 }
 0xa94   : > { %6271 = vmax.xlane.f32.xlu1 %v6270_v23 }
 0xa95   : > { %v6267_v60 = vsel %vm3078_vm1, %v6265_v37, -inf }
 0xa96   : > { %6268 = vmax.xlane.f32.xlu0 %v6267_v60 }
 0xaa5   : > { %6289 = vrot.lane.b32.xlu1 %v10060_v49, %s8747_s26 }
 0xaa9   : > { %4671 = vrot.lane.b32.xlu1 %v10282_v55, %s8747_s26 }
 0xaad   : > { %4673 = vrot.lane.b32.xlu1 %v10280_v45, %s8747_s26 }
 0xab1   : > { %5740 = vrot.lane.b32.xlu1 %v5733_v24, %s8746_s7 }
 0xb1d   : > { %v6272_v19 = vpop.xlane.xlu1 %6271 }
 0xb1e   : > { %v6274_v38 = vsub.f32 %v6266_v52, %v6272_v19 }
 0xb1f   : > { %v6269_v48 = vpop.xlane.xlu0 %6268 }
 0xb20   : > { %v6277_v16 = vmul.f32 1.442695, %v6274_v38  ;;  %v6273_v10 = vsub.f32 %v6265_v37, %v6269_v48 }
 0xb21   : > { %v6290_v49 = vpop.permute.xlu1 %6289 }
 0xb22   : > { %8551 = vpow2.f32 %v6277_v16  ;;  %v6275_v28 = vmul.f32 1.442695, %v6273_v10  ;;  %v6333_v8 = vand.u32 4294901760, %v6290_v49 }
 0xb24   : > { %8553 = vpow2.f32 %v6275_v28  ;;  %v6425_v58 = vsub.f32 %v6290_v49, %v6333_v8 }
 0xb25   : > { %v4672_v55 = vpop.permute.xlu1 %4671 }
 0xb26   : > { %4678 = vst.msk [vmem:[%s10169_s24] sm:$0xff] %vm4677_vm2, %v4672_v55  ;;  %v6426_v20 = vand.u32 4294901760, %v6425_v58 }
 0xb28   : > { %v6427_v30 = vsub.f32 %v6425_v58, %v6426_v20 }
 0xb29   : > { %v4674_v31 = vpop.permute.xlu1 %4673 }
 0xb2a   : > { %4679 = vst.msk [vmem:[%s10169_s24 + $0x8] sm:$0xff] %vm4677_vm2, %v4674_v31 }
 0xb2d   : > { %v5741_v45 = vpop.permute.xlu1 %5740 }
 0xb2e   : > { %5746 = vst.msk [vmem:[%s10169_s24 + $0x8] sm:$0xff] %vm5744_vm3, %v5741_v45 }
 0xb2f   : > { %v8552_v34 = vpop.eup %8551 }
 0xb30   : > { %v6282_v46 = vsel %vm3078_vm1, %v8552_v34, 0.0 }
 0xb31   : > { %v8554_v6 = vpop.eup %8553  ;;  %6283 = vadd.xlane.f32.xlu0 %v6282_v46 }
 0xb32   : > { %v6279_v4 = vsel %vm3078_vm1, %v8554_v6, 0.0 }
 0xb35   : > { %6280 = vadd.xlane.f32.xlu0 %v6279_v4 }
 0xb4b   : > { %6291 = vrot.lane.b32.xlu0 %v10055_v15, %s8747_s26 }
 0xb4f   : > { %5738 = vrot.lane.b32.xlu0 %v5727_v12, %s8746_s7  ;;  %v6428_v12 = vand.u32 4294901760, %v6427_v30 }
 0xbba   : > { %v6284_v9 = vpop.xlane.xlu0 %6283 }
 0xbbb   : > { %8555 = vrcp.f32 %v6284_v9 }
 0xbbe   : > { %v6281_v2 = vpop.xlane.xlu0 %6280 }
 0xbbf   : > { %8557 = vrcp.f32 %v6281_v2 }
 0xbc2   : > { %v6292_v56 = vpop.permute.xlu0 %6291 }
 0xbc3   : > { %v6330_v53 = vand.u32 4294901760, %v6292_v56 }
 0xbc5   : > { %v6418_v27 = vsub.f32 %v6292_v56, %v6330_v53  ;;  %8397 = vmatprep.subr.mxu0 %v6330_v53 }
 0xbc6   : > { %8398 = vmatpush3.msra.mxu0 %v6330_v53  ;;  %v5739_v61 = vpop.permute.xlu0 %5738 }
 0xbc7   : > { %5745 = vst.msk [vmem:[%s10169_s24] sm:$0xff] %vm5744_vm3, %v5739_v61  ;;  %8399 = vmatprep.subr.mxu0 %v6333_v8  ;;  %v6419_v5 = vand.u32 4294901760, %v6418_v27 }
 0xbc8   : > { %v8556_v15 = vpop.eup %8555  ;;  %8400 = vmatpush3.msra.mxu0 %v6333_v8 }
 0xbc9   : > { %8411 = vmatprep.subr.mxu0 %v6418_v27  ;;  %v6420_v25 = vsub.f32 %v6418_v27, %v6419_v5  ;;  %v6288_v40 = vmul.f32 %v8556_v15, %v8552_v34 }
 0xbcb   : > { %v6421_v32 = vand.u32 4294901760, %v6420_v25  ;;  %v6299_v41 = vsel %vm3078_vm1, %v6288_v40, 0 }
 0xbcc   : > { %v8558_v51 = vpop.eup %8557  ;;  %v6378_v57 = vand.u32 4294901760, %v6299_v41 }
 0xbcd   : > { %8404 = vmatprep.subr.mxu1 %v6421_v32  ;;  %v6286_v18 = vmul.f32 %v8558_v51, %v8554_v6 }
 0xbce   : > { %8405 = vmatpush3.msra.mxu1 %v6421_v32  ;;  %v6379_v44 = vsub.f32 %v6299_v41, %v6378_v57 }
 0xbcf   : > { %8406 = vmatprep.subr.mxu1 %v6428_v12  ;;  %v6296_v3 = vsel %vm3078_vm1, %v6286_v18, 0 }
 0xbd0   : > { %8407 = vmatpush3.msra.mxu1 %v6428_v12  ;;  %v6368_v17 = vand.u32 4294901760, %v6296_v3  ;;  %v6380_v50 = vand.u32 4294901760, %v6379_v44 }
 0xbd1   : > { %8418 = vmatprep.subr.mxu1 %v6330_v53 }
 0xbd2   : > { %8408 = vmatprep.mubr.f32.mxu1 %v6368_v17  ;;  %v6369_v7 = vsub.f32 %v6296_v3, %v6368_v17  ;;  %v6381_v11 = vsub.f32 %v6379_v44, %v6380_v50 }
 0xbd3   : > { %8409 = vmatmul.mubr.f32.vlgmr.msra.gmra.mxu1 %v6378_v57 }
 0xbd4   : > { %8419 = vmatpush3.msra.mxu1 %v6330_v53  ;;  %v6370_v22 = vand.u32 4294901760, %v6369_v7  ;;  %v6382_v62 = vand.u32 4294901760, %v6381_v11 }
 0xbd5   : > { %8420 = vmatprep.subr.mxu1 %v6333_v8 }
 0xbd6   : > { %8421 = vmatpush3.msra.mxu1 %v6333_v8  ;;  %8422 = vmatprep.mubr.f32.mxu1 %v6370_v22  ;;  %v6371_v21 = vsub.f32 %v6369_v7, %v6370_v22 }
 0xbd7   : > { %8432 = vmatprep.subr.mxu1 %v6330_v53  ;;  %8423 = vmatmul.mubr.f32.vlgmr.msra.gmra.mxu1 %v6380_v50 }
 0xbd8   : > { %8433 = vmatpush3.msra.mxu1 %v6330_v53  ;;  %8436 = vmatprep.mubr.f32.mxu1 %v6368_v17  ;;  %v6372_v54 = vand.u32 4294901760, %v6371_v21 }
 0xbd9   : > { %8434 = vmatprep.subr.mxu1 %v6333_v8 }
 0xbda   : > { %8435 = vmatpush3.msra.mxu1 %v6333_v8  ;;  %8401 = vmatprep.mubr.f32.mxu0 %v6372_v54 }
 0xbdb   : > { %8402 = vmatmul.mubr.f32.vlgmr.msra.gmra.mxu0 %v6382_v62  ;;  %8437 = vmatmul.mubr.f32.vlgmr.msra.gmra.mxu1 %v6378_v57 }
 0xbdc   : > { %8412 = vmatpush3.msra.mxu0 %v6418_v27  ;;  %8415 = vmatprep.mubr.f32.mxu0 %v6369_v7 }
 0xbdd   : > { %8413 = vmatprep.subr.mxu0 %v6425_v58 }
 0xbde   : > { %8414 = vmatpush3.msra.mxu0 %v6425_v58 }
 0xbdf   : > { %8425 = vmatprep.subr.mxu0 %v6419_v5  ;;  %8416 = vmatmul.mubr.f32.vlgmr.msra.gmra.mxu0 %v6379_v44 }
 0xbe0   : > { %8426 = vmatpush3.msra.mxu0 %v6419_v5  ;;  %8429 = vmatprep.mubr.f32.mxu0 %v6368_v17 }
 0xbe1   : > { %8427 = vmatprep.subr.mxu0 %v6426_v20 }
 0xbe2   : > { %8428 = vmatpush3.msra.mxu0 %v6426_v20 }
 0xbe3   : > { %8430 = vmatmul.mubr.f32.vlgmr.msra.gmra.mxu0 %v6378_v57 }
 0xc93   : > { %v8410_v29 = vpop.f32.mrf.mxu1 }
 0xc95   : > { %v6465_v0 = vpop.f32.mrf.mxu1 }
 0xc97   : > { %v8424_v13 = vpop.f32.mrf.mxu1 }
 0xc99   : > { %v6629_v59 = vpop.f32.mrf.mxu1 }
 0xc9b   : > { %v8403_v1 = vpop.f32.mrf.mxu0  ;;  %v8438_v37 = vpop.f32.mrf.mxu1 }
 0xc9c   : > { %v6472_v47 = vadd.f32 %v8410_v29, %v8403_v1 }
 0xc9d   : > { %v6374_v26 = vpop.f32.mrf.mxu0  ;;  %v6793_v19 = vpop.f32.mrf.mxu1 }
 0xc9e   : > { %v6466_v39 = vadd.f32 %v6465_v0, %v6374_v26 }
 0xc9f   : > { %v8417_v14 = vpop.f32.mrf.mxu0 }
 0xca0   : > { %v6555_v42 = vadd.f32 %v8417_v14, %v6472_v47 }
 0xca1   : > { %v6547_v63 = vpop.f32.mrf.mxu0 }
 0xca2   : > { %v6548_v52 = vadd.f32 %v6547_v63, %v6466_v39  ;;  %v6638_v23 = vadd.f32 %v8424_v13, %v6555_v42 }
 0xca3   : > { %v8431_v60 = vpop.f32.mrf.mxu0 }
 0xca4   : > { %v6721_v35 = vadd.f32 %v8431_v60, %v6638_v23  ;;  %v6630_v33 = vadd.f32 %v6629_v59, %v6548_v52 }
 0xca5   : > { %v6714_v43 = vpop.f32.mrf.mxu0 }
 0xca6   : > { %v6800_v36 = vadd.f32 %v8438_v37, %v6721_v35  ;;  %v6715_v24 = vadd.f32 %v6714_v43, %v6630_v33 }
 0xca8   : > { %v6794_v38 = vadd.f32 %v6793_v19, %v6715_v24  ;;  %6807 = vrot.lane.b32.xlu1 %v6800_v36, %s8745_s19 }
 0xcaa   : > { %6805 = vrot.lane.b32.xlu0 %v6794_v38, %s8745_s19 }
 0xd1a   : > { %v6808_v48 = vpop.permute.xlu1 %6807 }
 0xd1b   : > { %6813 = vst.msk [vmem:[%s10169_s24 + $0x8] sm:$0xff] %vm6811_vm4, %v6808_v48 }
 0xd1c   : > { %v6806_v16 = vpop.permute.xlu0 %6805 }
 0xd1d   : > { %6812 = vst.msk [vmem:[%s10169_s24] sm:$0xff] %vm6811_vm4, %v6806_v16 }
 0xd1e   : > { %8678 = shalt.err (!%p8675_p10)
}
 0xd1f   : > { %s8679_s3 = scalar_lea.hbm %s10418_s28, 256  ;;  %s8683_s7 = scalar_lea.hbm %s10474_s9, 512 }
 0xd20   : > { %p8680_p6 = scmp.ne.s32.totalorder %s10418_s28, %s8679_s3  ;;  %p8684_p3 = scmp.lt.s32.totalorder %s10418_s28, %s10474_s9 }
 0xd21   : > { %p8685_p11 = scmp.lt.s32.totalorder %s8683_s7, %s8679_s3 }
 0xd22   : > { %p8681_p4 = pnand %p8680_p6, %p10504_p1 }
 0xd23   : > { %p8686_p5 = por %p8685_p11, %p8684_p3 }
 0xd24   : > { %p8682_p8 = pneg %p8681_p4 }
 0xd26   : > { %p8687_p7 = pnand %p8686_p5, %p8682_p8 }
 0xd28   : > { %8690 = shalt.err (!%p8687_p7)
}
 0xd29   : > { %s8749_s27 = smov 128   ;;  %s8750_s25 = smov 8  }
 0xd2a   : > { %8453 = dma.vmem_to_hbm [thread:$0]  (%p10504_p1), %s10420_s17, 256, %s10418_s28, %s6815_s23, %s8749_s27, %s8749_s27, %s8750_s25  }
 0xd2b PF: > { %s6843_s20 = sand.u32 1, %s8725_s30   ;;  %p10505_p12 = scmp.ne.s32.totalorder %s10486_s16, 0 }
 0xd2c   : > { %p10506_p9 = scmp.ge.s32.totalorder %s8737_s12, 2  ;;  %s6844_s13 = scalar_lea.sflag [#allocation4], %s6843_s20 }
 0xd2e   : > { %p8470_p13 = pnand %p10506_p9, %p10505_p12 }
 0xd30   : > { %p8471_p0 = pneg %p8470_p13 }
 0xd32   : > { %8720 = dma.done.wait (%p8471_p0), %s6844_s13, 256  }
 0xd33   : > { %8722 = vsyncadd (%p8471_p0), %s6844_s13, 4294967040  ;;  %p24_p2 = scmp.ge.s32.totalorder %s8890_s22, 4   ;;  %s10507_s30 = smov %s8729_s10 }
 0xd34   : > { %s10508_s10 = smov %s8733_s11  ;;  %s10509_s11 = smov %s8900_s29 }
 0xd35   : > { %s10510_s12 = smov %s8890_s22  ;;  %26 = sbr.rel (!%p24_p2) target bundleno = 11 (0xb), region = 113 }
 0xd3a   :  { %6849 = vsyncpa [#allocation3], 1 }
 0xd3b   :  { %6851 = vsyncpa [#allocation3 + $0x1], 1 }
 0xd3c   :  { %6852 = vsyncpa [#allocation6], 1 }
 0xd3d   :  { %6853 = vsyncpa [#allocation9], 1 }
 0xd3e   :  { %6854 = vsyncpa [#allocation4], 1 }
 0xd3f   :  { %6856 = vsyncpa [#allocation4 + $0x1], 1 }

</bundles_post_ra>
